<compile_context>
chip_gen: v6e
topology: v6e:2x2x1
jax: 0.10.0
libtpu: 0.0.40
codegen_flags: <defaults>
</compile_context>

<pallas_src>
import jax
import jax.numpy as jnp
from jax.experimental import pallas as pl
from jax.experimental.pallas import tpu as pltpu

STATE_DIM = 64
HIDDEN_DIM = 128
EPS = 1e-5  # nn.LayerNorm default eps


# ----------------------------------------------------------------------------
# Fused kernel: whole forward pass, everything resident in VMEM.
#
# Inputs (6 DMAs total):
#   data_ref  (1,  512) f32 : [x_cat(256) | intervention(64)@256 | mask(64)@384]
#   bias_ref  (1, 6144) f32 : all biases + LayerNorm params (128-aligned slots)
#   ew1_ref   (256, 512) bf16: block-diag of the 4 encoder first layers
#   ew2_ref   (512, 256) bf16: block-diag of the 4 encoder second layers
#   wslab_ref (640, 128) bf16: [cw1|iw1a|iw1b|iw2(pad)|dw1|dw2|dw3(pad)]
#   cw2_ref   (128,4096) bf16: causal-graph output weight
# Outputs:
#   new_state_ref (1, 64) f32, causal_ref (32, 128) f32, next_ref (1, 128) f32
# ----------------------------------------------------------------------------
def fused_forward_kernel(data_ref, bias_ref, ew1_ref, ew2_ref, wslab_ref,
                         cw2_ref, new_state_ref, causal_ref, next_ref):
    f32 = jnp.float32
    D = STATE_DIM

    def mm(x, w):
        # bf16 x bf16 MXU matmul, f32 accumulation
        return jnp.dot(x.astype(jnp.bfloat16), w, preferred_element_type=f32)

    # --- unpack (all ref slices start on 128-lane / 16-sublane boundaries) ---
    x_cat = data_ref[:, 0:256]       # concat [ego(6)|veh(100)|traffic(50)|road(100)]
    iv = data_ref[:, 256:320]        # (1, 64)
    msk = data_ref[:, 384:448]       # (1, 64)

    # --- encode_state: two block-diagonal matmuls + per-segment LayerNorm ---
    h = jnp.maximum(mm(x_cat, ew1_ref[...]) + bias_ref[:, 0:512], 0.0)   # (1,512)
    y = mm(h, ew2_ref[...]) + bias_ref[:, 512:768]                       # (1,256)
    g_cat = bias_ref[:, 768:1024]    # LN gamma, pre-scaled by [1, .3, .2, .1]
    bt_cat = bias_ref[:, 1024:1280]  # LN beta,  pre-scaled by [1, .3, .2, .1]
    s = jnp.zeros((1, D), f32)
    for i in range(4):               # static unroll: 4 x 64-lane LayerNorm
        lo, hi = i * D, (i + 1) * D
        yi = y[:, lo:hi]
        mu = jnp.mean(yi, axis=-1, keepdims=True)
        var = jnp.mean((yi - mu) ** 2, axis=-1, keepdims=True)
        s = s + (yi - mu) * jax.lax.rsqrt(var + EPS) * g_cat[:, lo:hi] \
              + bt_cat[:, lo:hi]                                        # (1,64)

    # --- learn_causal_graph: MLP -> 64x64 row-softmax ---
    hc = jnp.maximum(mm(s, wslab_ref[0:64, :]) + bias_ref[:, 1280:1408], 0.0)
    logits = mm(hc, cw2_ref[...]) + bias_ref[:, 1408:5504]               # (1,4096)
    # Scatter the flat logits into the lane-dense (32,128) output buffer:
    # physical row i holds causal rows 2i (lanes 0..63) and 2i+1 (lanes 64..127).
    for i in range(32):
        causal_ref[i:i + 1, :] = logits[:, 128 * i:128 * (i + 1)]
    x2 = causal_ref[...]                                                 # (32,128)
    lane = jax.lax.broadcasted_iota(jnp.int32, (32, 128), 1)
    left = lane < D
    # per-causal-row max (numerics fix vs. previous global max)
    m_l = jnp.max(jnp.where(left, x2, -jnp.inf), axis=-1, keepdims=True)
    m_r = jnp.max(jnp.where(left, -jnp.inf, x2), axis=-1, keepdims=True)
    m = jnp.where(left, m_l, m_r)
    e = jnp.exp(x2 - m)
    s_l = jnp.sum(jnp.where(left, e, 0.0), axis=-1, keepdims=True)
    s_r = jnp.sum(jnp.where(left, 0.0, e), axis=-1, keepdims=True)
    denom = jnp.where(left, s_l, s_r)
    causal_ref[...] = e * pl.reciprocal(denom, approx=True)

    # --- predict_with_intervention ---
    # cat([s, intervened]) @ W1 == s @ W1a + intervened @ W1b (exact row split).
    intervened = s * (1.0 - msk) + iv * msk
    hi_act = jnp.maximum(mm(s, wslab_ref[64:128, :])
                         + mm(intervened, wslab_ref[128:192, :])
                         + bias_ref[:, 5504:5632], 0.0)                  # (1,128)
    ns_pad = mm(hi_act, wslab_ref[192:320, :]) + bias_ref[:, 5632:5760]  # (1,128)
    new_state = ns_pad[:, 0:64]                                          # real cols
    new_state_ref[...] = new_state

    # --- dynamics_predictor on intervened state (Dropout = identity, eval) ---
    h1 = jnp.maximum(mm(new_state, wslab_ref[320:384, :]) + bias_ref[:, 5760:5888], 0.0)
    h2 = jnp.maximum(mm(h1, wslab_ref[384:512, :]) + bias_ref[:, 5888:6016], 0.0)
    next_ref[...] = mm(h2, wslab_ref[512:640, :]) + bias_ref[:, 6016:6144]  # (1,128), first 6 real


# ----------------------------------------------------------------------------
# Parameter init (deterministic, PyTorch-Linear-style uniform); weights bf16.
# ----------------------------------------------------------------------------
def _init_linear(key, fan_in, fan_out):
    k1, k2 = jax.random.split(key)
    bound = 1.0 / jnp.sqrt(jnp.float32(fan_in))
    w = jax.random.uniform(k1, (fan_in, fan_out), jnp.float32, -bound, bound)
    b = jax.random.uniform(k2, (1, fan_out), jnp.float32, -bound, bound)
    return w.astype(jnp.bfloat16), b


def init_params(key):
    keys = iter(jax.random.split(key, 20))
    params = {}

    def enc_params(in_dim):
        w1, b1 = _init_linear(next(keys), in_dim, HIDDEN_DIM)
        w2, b2 = _init_linear(next(keys), HIDDEN_DIM, STATE_DIM)
        return {"w1": w1, "b1": b1, "w2": w2, "b2": b2,
                "g": jnp.ones((1, STATE_DIM), jnp.float32),
                "bt": jnp.zeros((1, STATE_DIM), jnp.float32)}

    params["state_encoder"] = enc_params(6)
    params["vehicle_encoder"] = enc_params(100)
    params["traffic_encoder"] = enc_params(50)
    params["road_encoder"] = enc_params(100)

    cw1, cb1 = _init_linear(next(keys), STATE_DIM, HIDDEN_DIM)
    cw2, cb2 = _init_linear(next(keys), HIDDEN_DIM, STATE_DIM * STATE_DIM)
    params["causal"] = {"w1": cw1, "b1": cb1, "w2": cw2, "b2": cb2}

    iw1, ib1 = _init_linear(next(keys), 2 * STATE_DIM, HIDDEN_DIM)
    iw2, ib2 = _init_linear(next(keys), HIDDEN_DIM, STATE_DIM)
    params["interv"] = {"w1a": iw1[:STATE_DIM], "w1b": iw1[STATE_DIM:],
                        "b1": ib1, "w2": iw2, "b2": ib2}

    dw1, db1 = _init_linear(next(keys), STATE_DIM, HIDDEN_DIM)
    dw2, db2 = _init_linear(next(keys), HIDDEN_DIM, HIDDEN_DIM)
    dw3, db3 = _init_linear(next(keys), HIDDEN_DIM, 6)
    params["dyn"] = {"w1": dw1, "b1": db1, "w2": dw2, "b2": db2,
                     "w3": dw3, "b3": db3}
    return params


# ----------------------------------------------------------------------------
# One-time host-side repack of the ~39 small tensors into a few DMA slabs.
# ----------------------------------------------------------------------------
def pack_params(params):
    f32, bf16 = jnp.float32, jnp.bfloat16
    H, D = HIDDEN_DIM, STATE_DIM
    enc_names = ["state_encoder", "vehicle_encoder", "traffic_encoder", "road_encoder"]
    in_dims = [6, 100, 50, 100]          # 6+100+50+100 == 256, no padding needed
    comb = [1.0, 0.3, 0.2, 0.1]          # combination weights folded into LN affine

    ew1 = jnp.zeros((sum(in_dims), 4 * H), f32)   # block-diagonal first layers
    ew2 = jnp.zeros((4 * H, 4 * D), f32)          # block-diagonal second layers
    b1s, b2s, gs, bts = [], [], [], []
    r = 0
    for i, name in enumerate(enc_names):
        p = params[name]
        ew1 = ew1.at[r:r + in_dims[i], i * H:(i + 1) * H].set(p["w1"].astype(f32))
        ew2 = ew2.at[i * H:(i + 1) * H, i * D:(i + 1) * D].set(p["w2"].astype(f32))
        r += in_dims[i]
        b1s.append(p["b1"][0])
        b2s.append(p["b2"][0])
        gs.append(comb[i] * p["g"][0])
        bts.append(comb[i] * p["bt"][0])

    cp, ip, dp = params["causal"], params["interv"], params["dyn"]

    def pad_cols(w, n=128):
        w = w.astype(f32)
        return jnp.pad(w, ((0, 0), (0, n - w.shape[1])))

    wslab = jnp.concatenate([
        cp["w1"].astype(f32),       # rows   0: 64  causal L1
        ip["w1a"].astype(f32),      # rows  64:128  interv L1 (state half)
        ip["w1b"].astype(f32),      # rows 128:192  interv L1 (intervened half)
        pad_cols(ip["w2"]),         # rows 192:320  interv L2 (cols 64->128 zero-pad)
        dp["w1"].astype(f32),       # rows 320:384  dyn L1
        dp["w2"].astype(f32),       # rows 384:512  dyn L2
        pad_cols(dp["w3"]),         # rows 512:640  dyn L3   (cols 6->128 zero-pad)
    ], axis=0)

    def padv(v, n):
        v = v.reshape(-1).astype(f32)
        return jnp.pad(v, (0, n - v.shape[0]))

    bias = jnp.concatenate([
        jnp.concatenate(b1s),       #    0: 512 encoder L1 biases
        jnp.concatenate(b2s),       #  512: 768 encoder L2 biases
        jnp.concatenate(gs),        #  768:1024 LN gamma (comb-weighted)
        jnp.concatenate(bts),       # 1024:1280 LN beta  (comb-weighted)
        cp["b1"][0],                # 1280:1408
        cp["b2"][0],                # 1408:5504
        ip["b1"][0],                # 5504:5632
        padv(ip["b2"], 128),        # 5632:5760
        dp["b1"][0],                # 5760:5888
        dp["b2"][0],                # 5888:6016
        padv(dp["b3"], 128),        # 6016:6144
    ]).reshape(1, 6144).astype(f32)

    return {"bias": bias,
            "ew1": ew1.astype(bf16),
            "ew2": ew2.astype(bf16),
            "wslab": wslab.astype(bf16),
            "cw2": cp["w2"].astype(bf16)}


# ----------------------------------------------------------------------------
# Forward (glue in JAX, full hot path in ONE Pallas call)
# ----------------------------------------------------------------------------
def _pad_to(x, n):
    x = x.reshape(-1).astype(jnp.float32)
    if x.shape[0] >= n:
        return x[:n]
    return jnp.concatenate([x, jnp.zeros(n - x.shape[0], jnp.float32)])


@jax.jit
def causal_world_model_forward(packed, ego, veh_feat, tr_feat, road_feat,
                               intervention, intervention_mask):
    D = STATE_DIM
    f32 = jnp.float32

    x_cat = jnp.concatenate([ego, veh_feat, tr_feat, road_feat]).astype(f32)  # (256,)
    data = jnp.zeros((1, 512), f32)
    data = data.at[0, 0:256].set(x_cat)
    data = data.at[0, 256:320].set(intervention.astype(f32))
    data = data.at[0, 384:448].set(intervention_mask.astype(f32))

    out_shape = (
        jax.ShapeDtypeStruct((1, D), f32),      # new state (post-intervention)
        jax.ShapeDtypeStruct((32, 128), f32),   # causal graph, lane-dense
        jax.ShapeDtypeStruct((1, 128), f32),    # next-state prediction (first 6 real)
    )
    new_state, causal32, next_pad = pl.pallas_call(
        fused_forward_kernel,
        out_shape=out_shape,
        in_specs=[pl.BlockSpec(memory_space=pltpu.MemorySpace.VMEM)] * 6,
        out_specs=(pl.BlockSpec(memory_space=pltpu.MemorySpace.VMEM),) * 3,
        compiler_params=pltpu.CompilerParams(vmem_limit_bytes=8 * 1024 * 1024),
    )(data, packed["bias"], packed["ew1"], packed["ew2"],
      packed["wslab"], packed["cw2"])

    return {
        "state_encoding": new_state[0],
        "causal_graph": causal32.reshape(1, D, D),   # free reshape in XLA
        "next_state_prediction": next_pad[0, :6],
        "intervention_effect": intervention,
    }


# ----------------------------------------------------------------------------
# Pure-JAX f32 reference (for correctness check only)
# ----------------------------------------------------------------------------
def reference_forward(params, ego, veh, tr, road, iv, msk):
    f32 = jnp.float32

    def enc(x, p):
        h = jnp.maximum(x @ p["w1"].astype(f32) + p["b1"][0], 0.0)
        y = h @ p["w2"].astype(f32) + p["b2"][0]
        m = y.mean()
        v = ((y - m) ** 2).mean()
        return (y - m) / jnp.sqrt(v + EPS) * p["g"][0] + p["bt"][0]

    s = (enc(ego, params["state_encoder"]) + 0.3 * enc(veh, params["vehicle_encoder"])
         + 0.2 * enc(tr, params["traffic_encoder"]) + 0.1 * enc(road, params["road_encoder"]))
    cp = params["causal"]
    logits = (jnp.maximum(s @ cp["w1"].astype(f32) + cp["b1"][0], 0.0)
              @ cp["w2"].astype(f32) + cp["b2"][0])
    cg = jax.nn.softmax(logits.reshape(1, STATE_DIM, STATE_DIM), axis=-1)
    ip = params["interv"]
    intervened = s * (1 - msk) + iv * msk
    cat = jnp.concatenate([s, intervened])
    w1_full = jnp.concatenate([ip["w1a"], ip["w1b"]], axis=0).astype(f32)
    s2 = (jnp.maximum(cat @ w1_full + ip["b1"][0], 0.0)
          @ ip["w2"].astype(f32) + ip["b2"][0])
    dp = params["dyn"]
    h1 = jnp.maximum(s2 @ dp["w1"].astype(f32) + dp["b1"][0], 0.0)
    h2 = jnp.maximum(h1 @ dp["w2"].astype(f32) + dp["b2"][0], 0.0)
    nxt = h2 @ dp["w3"].astype(f32) + dp["b3"][0]
    return {"state_encoding": s2, "causal_graph": cg,
            "next_state_prediction": nxt, "intervention_effect": iv}


# ----------------------------------------------------------------------------
if __name__ == "__main__":
    key = jax.random.PRNGKey(0)
    k_param, k_ws, k_iv = jax.random.split(key, 3)
    params = init_params(k_param)
    packed = pack_params(params)   # one-time weight repack (not in the hot path)

    # Synthetic WorldState (small, shapes consistent with the module's contract)
    ks = jax.random.split(k_ws, 5)
    ego_state = jax.random.normal(ks[0], (6,), jnp.float32)
    vehicle_positions = jax.random.normal(ks[1], (4, 3), jnp.float32)
    vehicle_velocities = jax.random.normal(ks[2], (4, 2), jnp.float32)
    traffic_lights = jax.random.normal(ks[3], (3, 4), jnp.float32)
    road_geometry = jax.random.normal(ks[4], (10, 4), jnp.float32)

    intervention = jax.random.normal(k_iv, (STATE_DIM,), jnp.float32)
    intervention_mask = jnp.concatenate(
        [jnp.ones(16, jnp.float32), jnp.zeros(STATE_DIM - 16, jnp.float32)])

    # Glue: build padded feature vectors exactly as encode_state() does
    vehicle_features = jnp.concatenate(
        [vehicle_positions, vehicle_velocities], axis=-1)      # (N, 5)
    veh_feat = _pad_to(vehicle_features, 100)
    tr_feat = _pad_to(traffic_lights, 50)
    road_feat = _pad_to(road_geometry, 100)

    # TODO(synk): tensor validation (NaN/Inf/shape checks) is host-side control
    # flow with no Pallas equivalent; inputs constructed here are valid by design.

    out = causal_world_model_forward(
        packed, ego_state, veh_feat, tr_feat, road_feat,
        intervention, intervention_mask)
    jax.block_until_ready(out)

    ref = reference_forward(params, ego_state, veh_feat, tr_feat, road_feat,
                            intervention, intervention_mask)
    # bf16 weights + bf16-activation matmuls vs f32 reference: 2e-2 tolerance.
    for name in ("state_encoding", "causal_graph", "next_state_prediction"):
        assert out[name].shape == ref[name].shape, name
        assert bool(jnp.all(jnp.isfinite(out[name]))), name
        assert bool(jnp.allclose(out[name], ref[name], rtol=2e-2, atol=2e-2)), name

    print("KERNEL_OK")
</pallas_src>

<mosaic_0001>
module attributes {stable_mosaic.version = 11 : i64} {
  func.func @fused_forward_kernel(%arg0: memref<1x512xf32, #tpu.memory_space<vmem>>, %arg1: memref<1x6144xf32, #tpu.memory_space<vmem>>, %arg2: memref<256x512xbf16, #tpu.memory_space<vmem>>, %arg3: memref<512x256xbf16, #tpu.memory_space<vmem>>, %arg4: memref<640x128xbf16, #tpu.memory_space<vmem>>, %arg5: memref<128x4096xbf16, #tpu.memory_space<vmem>>, %arg6: memref<1x64xf32, #tpu.memory_space<vmem>>, %arg7: memref<32x128xf32, #tpu.memory_space<vmem>>, %arg8: memref<1x128xf32, #tpu.memory_space<vmem>>) attributes {dimension_semantics = [], scalar_prefetch = 0 : i64, scratch_operands = 0 : i64, tpu.core_type = #tpu.core_type<tc>} {
    %c0 = arith.constant 0 : index
    %c0_0 = arith.constant 0 : index
    %0 = vector.load %arg0[%c0, %c0_0] : memref<1x512xf32, #tpu.memory_space<vmem>>, vector<1x256xf32>
    %c0_1 = arith.constant 0 : index
    %c256 = arith.constant 256 : index
    %1 = vector.load %arg0[%c0_1, %c256] : memref<1x512xf32, #tpu.memory_space<vmem>>, vector<1x64xf32>
    %c0_2 = arith.constant 0 : index
    %c384 = arith.constant 384 : index
    %2 = vector.load %arg0[%c0_2, %c384] : memref<1x512xf32, #tpu.memory_space<vmem>>, vector<1x64xf32>
    %c0_3 = arith.constant 0 : index
    %c0_4 = arith.constant 0 : index
    %3 = vector.load %arg2[%c0_3, %c0_4] : memref<256x512xbf16, #tpu.memory_space<vmem>>, vector<256x512xbf16>
    %4 = arith.truncf %0 : vector<1x256xf32> to vector<1x256xbf16>
    %cst = arith.constant dense<0.000000e+00> : vector<1x512xf32>
    %5 = tpu.matmul %4, %3, %cst {dimension_numbers = #tpu.dot_dimension_numbers<[1], [0], [0], [1], [0, 0, 1, 1], [], []>} : vector<1x256xbf16>, vector<256x512xbf16>, vector<1x512xf32> -> vector<1x512xf32>
    %c0_5 = arith.constant 0 : index
    %c0_6 = arith.constant 0 : index
    %6 = vector.load %arg1[%c0_5, %c0_6] : memref<1x6144xf32, #tpu.memory_space<vmem>>, vector<1x512xf32>
    %7 = arith.addf %5, %6 : vector<1x512xf32>
    %cst_7 = arith.constant 0.000000e+00 : f32
    %8 = vector.broadcast %cst_7 : f32 to vector<1x512xf32>
    %9 = arith.maximumf %7, %8 : vector<1x512xf32>
    %c0_8 = arith.constant 0 : index
    %c0_9 = arith.constant 0 : index
    %10 = vector.load %arg3[%c0_8, %c0_9] : memref<512x256xbf16, #tpu.memory_space<vmem>>, vector<512x256xbf16>
    %11 = arith.truncf %9 : vector<1x512xf32> to vector<1x512xbf16>
    %cst_10 = arith.constant dense<0.000000e+00> : vector<1x256xf32>
    %12 = tpu.matmul %11, %10, %cst_10 {dimension_numbers = #tpu.dot_dimension_numbers<[1], [0], [0], [1], [0, 0, 1, 1], [], []>} : vector<1x512xbf16>, vector<512x256xbf16>, vector<1x256xf32> -> vector<1x256xf32>
    %c0_11 = arith.constant 0 : index
    %c512 = arith.constant 512 : index
    %13 = vector.load %arg1[%c0_11, %c512] : memref<1x6144xf32, #tpu.memory_space<vmem>>, vector<1x256xf32>
    %14 = arith.addf %12, %13 : vector<1x256xf32>
    %c0_12 = arith.constant 0 : index
    %c768 = arith.constant 768 : index
    %15 = vector.load %arg1[%c0_12, %c768] : memref<1x6144xf32, #tpu.memory_space<vmem>>, vector<1x256xf32>
    %c0_13 = arith.constant 0 : index
    %c1024 = arith.constant 1024 : index
    %16 = vector.load %arg1[%c0_13, %c1024] : memref<1x6144xf32, #tpu.memory_space<vmem>>, vector<1x256xf32>
    %cst_14 = arith.constant 0.000000e+00 : f32
    %17 = vector.broadcast %cst_14 : f32 to vector<1x64xf32>
    %18 = vector.extract_strided_slice %14 {offsets = [0, 0], sizes = [1, 64], strides = [1, 1]} : vector<1x256xf32> to vector<1x64xf32>
    %cst_15 = arith.constant dense<0.000000e+00> : vector<1xf32>
    %19 = vector.multi_reduction <add>, %18, %cst_15 [1] : vector<1x64xf32> to vector<1xf32>
    %20 = vector.shape_cast %19 : vector<1xf32> to vector<1x1xf32>
    %cst_16 = arith.constant 6.400000e+01 : f32
    %21 = vector.broadcast %cst_16 : f32 to vector<1x1xf32>
    %22 = arith.divf %20, %21 : vector<1x1xf32>
    %23 = vector.broadcast %22 : vector<1x1xf32> to vector<1x64xf32>
    %24 = arith.subf %18, %23 : vector<1x64xf32>
    %25 = arith.mulf %24, %24 : vector<1x64xf32>
    %cst_17 = arith.constant dense<0.000000e+00> : vector<1xf32>
    %26 = vector.multi_reduction <add>, %25, %cst_17 [1] : vector<1x64xf32> to vector<1xf32>
    %27 = vector.shape_cast %26 : vector<1xf32> to vector<1x1xf32>
    %cst_18 = arith.constant 6.400000e+01 : f32
    %28 = vector.broadcast %cst_18 : f32 to vector<1x1xf32>
    %29 = arith.divf %27, %28 : vector<1x1xf32>
    %30 = vector.broadcast %22 : vector<1x1xf32> to vector<1x64xf32>
    %31 = arith.subf %18, %30 : vector<1x64xf32>
    %cst_19 = arith.constant 9.99999974E-6 : f32
    %32 = vector.broadcast %cst_19 : f32 to vector<1x1xf32>
    %33 = arith.addf %29, %32 : vector<1x1xf32>
    %34 = math.rsqrt %33 : vector<1x1xf32>
    %35 = vector.broadcast %34 : vector<1x1xf32> to vector<1x64xf32>
    %36 = arith.mulf %31, %35 : vector<1x64xf32>
    %37 = vector.extract_strided_slice %15 {offsets = [0, 0], sizes = [1, 64], strides = [1, 1]} : vector<1x256xf32> to vector<1x64xf32>
    %38 = arith.mulf %36, %37 : vector<1x64xf32>
    %39 = arith.addf %17, %38 : vector<1x64xf32>
    %40 = vector.extract_strided_slice %16 {offsets = [0, 0], sizes = [1, 64], strides = [1, 1]} : vector<1x256xf32> to vector<1x64xf32>
    %41 = arith.addf %39, %40 : vector<1x64xf32>
    %42 = vector.extract_strided_slice %14 {offsets = [0, 64], sizes = [1, 64], strides = [1, 1]} : vector<1x256xf32> to vector<1x64xf32>
    %cst_20 = arith.constant dense<0.000000e+00> : vector<1xf32>
    %43 = vector.multi_reduction <add>, %42, %cst_20 [1] : vector<1x64xf32> to vector<1xf32>
    %44 = vector.shape_cast %43 : vector<1xf32> to vector<1x1xf32>
    %cst_21 = arith.constant 6.400000e+01 : f32
    %45 = vector.broadcast %cst_21 : f32 to vector<1x1xf32>
    %46 = arith.divf %44, %45 : vector<1x1xf32>
    %47 = vector.broadcast %46 : vector<1x1xf32> to vector<1x64xf32>
    %48 = arith.subf %42, %47 : vector<1x64xf32>
    %49 = arith.mulf %48, %48 : vector<1x64xf32>
    %cst_22 = arith.constant dense<0.000000e+00> : vector<1xf32>
    %50 = vector.multi_reduction <add>, %49, %cst_22 [1] : vector<1x64xf32> to vector<1xf32>
    %51 = vector.shape_cast %50 : vector<1xf32> to vector<1x1xf32>
    %cst_23 = arith.constant 6.400000e+01 : f32
    %52 = vector.broadcast %cst_23 : f32 to vector<1x1xf32>
    %53 = arith.divf %51, %52 : vector<1x1xf32>
    %54 = vector.broadcast %46 : vector<1x1xf32> to vector<1x64xf32>
    %55 = arith.subf %42, %54 : vector<1x64xf32>
    %cst_24 = arith.constant 9.99999974E-6 : f32
    %56 = vector.broadcast %cst_24 : f32 to vector<1x1xf32>
    %57 = arith.addf %53, %56 : vector<1x1xf32>
    %58 = math.rsqrt %57 : vector<1x1xf32>
    %59 = vector.broadcast %58 : vector<1x1xf32> to vector<1x64xf32>
    %60 = arith.mulf %55, %59 : vector<1x64xf32>
    %61 = vector.extract_strided_slice %15 {offsets = [0, 64], sizes = [1, 64], strides = [1, 1]} : vector<1x256xf32> to vector<1x64xf32>
    %62 = arith.mulf %60, %61 : vector<1x64xf32>
    %63 = arith.addf %41, %62 : vector<1x64xf32>
    %64 = vector.extract_strided_slice %16 {offsets = [0, 64], sizes = [1, 64], strides = [1, 1]} : vector<1x256xf32> to vector<1x64xf32>
    %65 = arith.addf %63, %64 : vector<1x64xf32>
    %66 = vector.extract_strided_slice %14 {offsets = [0, 128], sizes = [1, 64], strides = [1, 1]} : vector<1x256xf32> to vector<1x64xf32>
    %cst_25 = arith.constant dense<0.000000e+00> : vector<1xf32>
    %67 = vector.multi_reduction <add>, %66, %cst_25 [1] : vector<1x64xf32> to vector<1xf32>
    %68 = vector.shape_cast %67 : vector<1xf32> to vector<1x1xf32>
    %cst_26 = arith.constant 6.400000e+01 : f32
    %69 = vector.broadcast %cst_26 : f32 to vector<1x1xf32>
    %70 = arith.divf %68, %69 : vector<1x1xf32>
    %71 = vector.broadcast %70 : vector<1x1xf32> to vector<1x64xf32>
    %72 = arith.subf %66, %71 : vector<1x64xf32>
    %73 = arith.mulf %72, %72 : vector<1x64xf32>
    %cst_27 = arith.constant dense<0.000000e+00> : vector<1xf32>
    %74 = vector.multi_reduction <add>, %73, %cst_27 [1] : vector<1x64xf32> to vector<1xf32>
    %75 = vector.shape_cast %74 : vector<1xf32> to vector<1x1xf32>
    %cst_28 = arith.constant 6.400000e+01 : f32
    %76 = vector.broadcast %cst_28 : f32 to vector<1x1xf32>
    %77 = arith.divf %75, %76 : vector<1x1xf32>
    %78 = vector.broadcast %70 : vector<1x1xf32> to vector<1x64xf32>
    %79 = arith.subf %66, %78 : vector<1x64xf32>
    %cst_29 = arith.constant 9.99999974E-6 : f32
    %80 = vector.broadcast %cst_29 : f32 to vector<1x1xf32>
    %81 = arith.addf %77, %80 : vector<1x1xf32>
    %82 = math.rsqrt %81 : vector<1x1xf32>
    %83 = vector.broadcast %82 : vector<1x1xf32> to vector<1x64xf32>
    %84 = arith.mulf %79, %83 : vector<1x64xf32>
    %85 = vector.extract_strided_slice %15 {offsets = [0, 128], sizes = [1, 64], strides = [1, 1]} : vector<1x256xf32> to vector<1x64xf32>
    %86 = arith.mulf %84, %85 : vector<1x64xf32>
    %87 = arith.addf %65, %86 : vector<1x64xf32>
    %88 = vector.extract_strided_slice %16 {offsets = [0, 128], sizes = [1, 64], strides = [1, 1]} : vector<1x256xf32> to vector<1x64xf32>
    %89 = arith.addf %87, %88 : vector<1x64xf32>
    %90 = vector.extract_strided_slice %14 {offsets = [0, 192], sizes = [1, 64], strides = [1, 1]} : vector<1x256xf32> to vector<1x64xf32>
    %cst_30 = arith.constant dense<0.000000e+00> : vector<1xf32>
    %91 = vector.multi_reduction <add>, %90, %cst_30 [1] : vector<1x64xf32> to vector<1xf32>
    %92 = vector.shape_cast %91 : vector<1xf32> to vector<1x1xf32>
    %cst_31 = arith.constant 6.400000e+01 : f32
    %93 = vector.broadcast %cst_31 : f32 to vector<1x1xf32>
    %94 = arith.divf %92, %93 : vector<1x1xf32>
    %95 = vector.broadcast %94 : vector<1x1xf32> to vector<1x64xf32>
    %96 = arith.subf %90, %95 : vector<1x64xf32>
    %97 = arith.mulf %96, %96 : vector<1x64xf32>
    %cst_32 = arith.constant dense<0.000000e+00> : vector<1xf32>
    %98 = vector.multi_reduction <add>, %97, %cst_32 [1] : vector<1x64xf32> to vector<1xf32>
    %99 = vector.shape_cast %98 : vector<1xf32> to vector<1x1xf32>
    %cst_33 = arith.constant 6.400000e+01 : f32
    %100 = vector.broadcast %cst_33 : f32 to vector<1x1xf32>
    %101 = arith.divf %99, %100 : vector<1x1xf32>
    %102 = vector.broadcast %94 : vector<1x1xf32> to vector<1x64xf32>
    %103 = arith.subf %90, %102 : vector<1x64xf32>
    %cst_34 = arith.constant 9.99999974E-6 : f32
    %104 = vector.broadcast %cst_34 : f32 to vector<1x1xf32>
    %105 = arith.addf %101, %104 : vector<1x1xf32>
    %106 = math.rsqrt %105 : vector<1x1xf32>
    %107 = vector.broadcast %106 : vector<1x1xf32> to vector<1x64xf32>
    %108 = arith.mulf %103, %107 : vector<1x64xf32>
    %109 = vector.extract_strided_slice %15 {offsets = [0, 192], sizes = [1, 64], strides = [1, 1]} : vector<1x256xf32> to vector<1x64xf32>
    %110 = arith.mulf %108, %109 : vector<1x64xf32>
    %111 = arith.addf %89, %110 : vector<1x64xf32>
    %112 = vector.extract_strided_slice %16 {offsets = [0, 192], sizes = [1, 64], strides = [1, 1]} : vector<1x256xf32> to vector<1x64xf32>
    %113 = arith.addf %111, %112 : vector<1x64xf32>
    %c0_35 = arith.constant 0 : index
    %c0_36 = arith.constant 0 : index
    %114 = vector.load %arg4[%c0_35, %c0_36] : memref<640x128xbf16, #tpu.memory_space<vmem>>, vector<64x128xbf16>
    %115 = arith.truncf %113 : vector<1x64xf32> to vector<1x64xbf16>
    %cst_37 = arith.constant dense<0.000000e+00> : vector<1x128xf32>
    %116 = tpu.matmul %115, %114, %cst_37 {dimension_numbers = #tpu.dot_dimension_numbers<[1], [0], [0], [1], [0, 0, 1, 1], [], []>} : vector<1x64xbf16>, vector<64x128xbf16>, vector<1x128xf32> -> vector<1x128xf32>
    %c0_38 = arith.constant 0 : index
    %c1280 = arith.constant 1280 : index
    %117 = vector.load %arg1[%c0_38, %c1280] : memref<1x6144xf32, #tpu.memory_space<vmem>>, vector<1x128xf32>
    %118 = arith.addf %116, %117 : vector<1x128xf32>
    %cst_39 = arith.constant 0.000000e+00 : f32
    %119 = vector.broadcast %cst_39 : f32 to vector<1x128xf32>
    %120 = arith.maximumf %118, %119 : vector<1x128xf32>
    %c0_40 = arith.constant 0 : index
    %c0_41 = arith.constant 0 : index
    %121 = vector.load %arg5[%c0_40, %c0_41] : memref<128x4096xbf16, #tpu.memory_space<vmem>>, vector<128x4096xbf16>
    %122 = arith.truncf %120 : vector<1x128xf32> to vector<1x128xbf16>
    %cst_42 = arith.constant dense<0.000000e+00> : vector<1x4096xf32>
    %123 = tpu.matmul %122, %121, %cst_42 {dimension_numbers = #tpu.dot_dimension_numbers<[1], [0], [0], [1], [0, 0, 1, 1], [], []>} : vector<1x128xbf16>, vector<128x4096xbf16>, vector<1x4096xf32> -> vector<1x4096xf32>
    %c0_43 = arith.constant 0 : index
    %c1408 = arith.constant 1408 : index
    %124 = vector.load %arg1[%c0_43, %c1408] : memref<1x6144xf32, #tpu.memory_space<vmem>>, vector<1x4096xf32>
    %125 = arith.addf %123, %124 : vector<1x4096xf32>
    %126 = vector.extract_strided_slice %125 {offsets = [0, 0], sizes = [1, 128], strides = [1, 1]} : vector<1x4096xf32> to vector<1x128xf32>
    %c0_44 = arith.constant 0 : index
    %c0_45 = arith.constant 0 : index
    %127 = vector.load %arg7[%c0_44, %c0_45] : memref<32x128xf32, #tpu.memory_space<vmem>>, vector<1x128xf32>
    tpu.vector_store %arg7[%c0_44, %c0_45], %126 {strides = array<i32>} : memref<32x128xf32, #tpu.memory_space<vmem>>, vector<1x128xf32>,
    %128 = vector.extract_strided_slice %125 {offsets = [0, 128], sizes = [1, 128], strides = [1, 1]} : vector<1x4096xf32> to vector<1x128xf32>
    %c1 = arith.constant 1 : index
    %c0_46 = arith.constant 0 : index
    %129 = vector.load %arg7[%c1, %c0_46] : memref<32x128xf32, #tpu.memory_space<vmem>>, vector<1x128xf32>
    tpu.vector_store %arg7[%c1, %c0_46], %128 {strides = array<i32>} : memref<32x128xf32, #tpu.memory_space<vmem>>, vector<1x128xf32>,
    %130 = vector.extract_strided_slice %125 {offsets = [0, 256], sizes = [1, 128], strides = [1, 1]} : vector<1x4096xf32> to vector<1x128xf32>
    %c2 = arith.constant 2 : index
    %c0_47 = arith.constant 0 : index
    %131 = vector.load %arg7[%c2, %c0_47] : memref<32x128xf32, #tpu.memory_space<vmem>>, vector<1x128xf32>
    tpu.vector_store %arg7[%c2, %c0_47], %130 {strides = array<i32>} : memref<32x128xf32, #tpu.memory_space<vmem>>, vector<1x128xf32>,
    %132 = vector.extract_strided_slice %125 {offsets = [0, 384], sizes = [1, 128], strides = [1, 1]} : vector<1x4096xf32> to vector<1x128xf32>
    %c3 = arith.constant 3 : index
    %c0_48 = arith.constant 0 : index
    %133 = vector.load %arg7[%c3, %c0_48] : memref<32x128xf32, #tpu.memory_space<vmem>>, vector<1x128xf32>
    tpu.vector_store %arg7[%c3, %c0_48], %132 {strides = array<i32>} : memref<32x128xf32, #tpu.memory_space<vmem>>, vector<1x128xf32>,
    %134 = vector.extract_strided_slice %125 {offsets = [0, 512], sizes = [1, 128], strides = [1, 1]} : vector<1x4096xf32> to vector<1x128xf32>
    %c4 = arith.constant 4 : index
    %c0_49 = arith.constant 0 : index
    %135 = vector.load %arg7[%c4, %c0_49] : memref<32x128xf32, #tpu.memory_space<vmem>>, vector<1x128xf32>
    tpu.vector_store %arg7[%c4, %c0_49], %134 {strides = array<i32>} : memref<32x128xf32, #tpu.memory_space<vmem>>, vector<1x128xf32>,
    %136 = vector.extract_strided_slice %125 {offsets = [0, 640], sizes = [1, 128], strides = [1, 1]} : vector<1x4096xf32> to vector<1x128xf32>
    %c5 = arith.constant 5 : index
    %c0_50 = arith.constant 0 : index
    %137 = vector.load %arg7[%c5, %c0_50] : memref<32x128xf32, #tpu.memory_space<vmem>>, vector<1x128xf32>
    tpu.vector_store %arg7[%c5, %c0_50], %136 {strides = array<i32>} : memref<32x128xf32, #tpu.memory_space<vmem>>, vector<1x128xf32>,
    %138 = vector.extract_strided_slice %125 {offsets = [0, 768], sizes = [1, 128], strides = [1, 1]} : vector<1x4096xf32> to vector<1x128xf32>
    %c6 = arith.constant 6 : index
    %c0_51 = arith.constant 0 : index
    %139 = vector.load %arg7[%c6, %c0_51] : memref<32x128xf32, #tpu.memory_space<vmem>>, vector<1x128xf32>
    tpu.vector_store %arg7[%c6, %c0_51], %138 {strides = array<i32>} : memref<32x128xf32, #tpu.memory_space<vmem>>, vector<1x128xf32>,
    %140 = vector.extract_strided_slice %125 {offsets = [0, 896], sizes = [1, 128], strides = [1, 1]} : vector<1x4096xf32> to vector<1x128xf32>
    %c7 = arith.constant 7 : index
    %c0_52 = arith.constant 0 : index
    %141 = vector.load %arg7[%c7, %c0_52] : memref<32x128xf32, #tpu.memory_space<vmem>>, vector<1x128xf32>
    tpu.vector_store %arg7[%c7, %c0_52], %140 {strides = array<i32>} : memref<32x128xf32, #tpu.memory_space<vmem>>, vector<1x128xf32>,
    %142 = vector.extract_strided_slice %125 {offsets = [0, 1024], sizes = [1, 128], strides = [1, 1]} : vector<1x4096xf32> to vector<1x128xf32>
    %c8 = arith.constant 8 : index
    %c0_53 = arith.constant 0 : index
    %143 = vector.load %arg7[%c8, %c0_53] : memref<32x128xf32, #tpu.memory_space<vmem>>, vector<1x128xf32>
    tpu.vector_store %arg7[%c8, %c0_53], %142 {strides = array<i32>} : memref<32x128xf32, #tpu.memory_space<vmem>>, vector<1x128xf32>,
    %144 = vector.extract_strided_slice %125 {offsets = [0, 1152], sizes = [1, 128], strides = [1, 1]} : vector<1x4096xf32> to vector<1x128xf32>
    %c9 = arith.constant 9 : index
    %c0_54 = arith.constant 0 : index
    %145 = vector.load %arg7[%c9, %c0_54] : memref<32x128xf32, #tpu.memory_space<vmem>>, vector<1x128xf32>
    tpu.vector_store %arg7[%c9, %c0_54], %144 {strides = array<i32>} : memref<32x128xf32, #tpu.memory_space<vmem>>, vector<1x128xf32>,
    %146 = vector.extract_strided_slice %125 {offsets = [0, 1280], sizes = [1, 128], strides = [1, 1]} : vector<1x4096xf32> to vector<1x128xf32>
    %c10 = arith.constant 10 : index
    %c0_55 = arith.constant 0 : index
    %147 = vector.load %arg7[%c10, %c0_55] : memref<32x128xf32, #tpu.memory_space<vmem>>, vector<1x128xf32>
    tpu.vector_store %arg7[%c10, %c0_55], %146 {strides = array<i32>} : memref<32x128xf32, #tpu.memory_space<vmem>>, vector<1x128xf32>,
    %148 = vector.extract_strided_slice %125 {offsets = [0, 1408], sizes = [1, 128], strides = [1, 1]} : vector<1x4096xf32> to vector<1x128xf32>
    %c11 = arith.constant 11 : index
    %c0_56 = arith.constant 0 : index
    %149 = vector.load %arg7[%c11, %c0_56] : memref<32x128xf32, #tpu.memory_space<vmem>>, vector<1x128xf32>
    tpu.vector_store %arg7[%c11, %c0_56], %148 {strides = array<i32>} : memref<32x128xf32, #tpu.memory_space<vmem>>, vector<1x128xf32>,
    %150 = vector.extract_strided_slice %125 {offsets = [0, 1536], sizes = [1, 128], strides = [1, 1]} : vector<1x4096xf32> to vector<1x128xf32>
    %c12 = arith.constant 12 : index
    %c0_57 = arith.constant 0 : index
    %151 = vector.load %arg7[%c12, %c0_57] : memref<32x128xf32, #tpu.memory_space<vmem>>, vector<1x128xf32>
    tpu.vector_store %arg7[%c12, %c0_57], %150 {strides = array<i32>} : memref<32x128xf32, #tpu.memory_space<vmem>>, vector<1x128xf32>,
    %152 = vector.extract_strided_slice %125 {offsets = [0, 1664], sizes = [1, 128], strides = [1, 1]} : vector<1x4096xf32> to vector<1x128xf32>
    %c13 = arith.constant 13 : index
    %c0_58 = arith.constant 0 : index
    %153 = vector.load %arg7[%c13, %c0_58] : memref<32x128xf32, #tpu.memory_space<vmem>>, vector<1x128xf32>
    tpu.vector_store %arg7[%c13, %c0_58], %152 {strides = array<i32>} : memref<32x128xf32, #tpu.memory_space<vmem>>, vector<1x128xf32>,
    %154 = vector.extract_strided_slice %125 {offsets = [0, 1792], sizes = [1, 128], strides = [1, 1]} : vector<1x4096xf32> to vector<1x128xf32>
    %c14 = arith.constant 14 : index
    %c0_59 = arith.constant 0 : index
    %155 = vector.load %arg7[%c14, %c0_59] : memref<32x128xf32, #tpu.memory_space<vmem>>, vector<1x128xf32>
    tpu.vector_store %arg7[%c14, %c0_59], %154 {strides = array<i32>} : memref<32x128xf32, #tpu.memory_space<vmem>>, vector<1x128xf32>,
    %156 = vector.extract_strided_slice %125 {offsets = [0, 1920], sizes = [1, 128], strides = [1, 1]} : vector<1x4096xf32> to vector<1x128xf32>
    %c15 = arith.constant 15 : index
    %c0_60 = arith.constant 0 : index
    %157 = vector.load %arg7[%c15, %c0_60] : memref<32x128xf32, #tpu.memory_space<vmem>>, vector<1x128xf32>
    tpu.vector_store %arg7[%c15, %c0_60], %156 {strides = array<i32>} : memref<32x128xf32, #tpu.memory_space<vmem>>, vector<1x128xf32>,
    %158 = vector.extract_strided_slice %125 {offsets = [0, 2048], sizes = [1, 128], strides = [1, 1]} : vector<1x4096xf32> to vector<1x128xf32>
    %c16 = arith.constant 16 : index
    %c0_61 = arith.constant 0 : index
    %159 = vector.load %arg7[%c16, %c0_61] : memref<32x128xf32, #tpu.memory_space<vmem>>, vector<1x128xf32>
    tpu.vector_store %arg7[%c16, %c0_61], %158 {strides = array<i32>} : memref<32x128xf32, #tpu.memory_space<vmem>>, vector<1x128xf32>,
    %160 = vector.extract_strided_slice %125 {offsets = [0, 2176], sizes = [1, 128], strides = [1, 1]} : vector<1x4096xf32> to vector<1x128xf32>
    %c17 = arith.constant 17 : index
    %c0_62 = arith.constant 0 : index
    %161 = vector.load %arg7[%c17, %c0_62] : memref<32x128xf32, #tpu.memory_space<vmem>>, vector<1x128xf32>
    tpu.vector_store %arg7[%c17, %c0_62], %160 {strides = array<i32>} : memref<32x128xf32, #tpu.memory_space<vmem>>, vector<1x128xf32>,
    %162 = vector.extract_strided_slice %125 {offsets = [0, 2304], sizes = [1, 128], strides = [1, 1]} : vector<1x4096xf32> to vector<1x128xf32>
    %c18 = arith.constant 18 : index
    %c0_63 = arith.constant 0 : index
    %163 = vector.load %arg7[%c18, %c0_63] : memref<32x128xf32, #tpu.memory_space<vmem>>, vector<1x128xf32>
    tpu.vector_store %arg7[%c18, %c0_63], %162 {strides = array<i32>} : memref<32x128xf32, #tpu.memory_space<vmem>>, vector<1x128xf32>,
    %164 = vector.extract_strided_slice %125 {offsets = [0, 2432], sizes = [1, 128], strides = [1, 1]} : vector<1x4096xf32> to vector<1x128xf32>
    %c19 = arith.constant 19 : index
    %c0_64 = arith.constant 0 : index
    %165 = vector.load %arg7[%c19, %c0_64] : memref<32x128xf32, #tpu.memory_space<vmem>>, vector<1x128xf32>
    tpu.vector_store %arg7[%c19, %c0_64], %164 {strides = array<i32>} : memref<32x128xf32, #tpu.memory_space<vmem>>, vector<1x128xf32>,
    %166 = vector.extract_strided_slice %125 {offsets = [0, 2560], sizes = [1, 128], strides = [1, 1]} : vector<1x4096xf32> to vector<1x128xf32>
    %c20 = arith.constant 20 : index
    %c0_65 = arith.constant 0 : index
    %167 = vector.load %arg7[%c20, %c0_65] : memref<32x128xf32, #tpu.memory_space<vmem>>, vector<1x128xf32>
    tpu.vector_store %arg7[%c20, %c0_65], %166 {strides = array<i32>} : memref<32x128xf32, #tpu.memory_space<vmem>>, vector<1x128xf32>,
    %168 = vector.extract_strided_slice %125 {offsets = [0, 2688], sizes = [1, 128], strides = [1, 1]} : vector<1x4096xf32> to vector<1x128xf32>
    %c21 = arith.constant 21 : index
    %c0_66 = arith.constant 0 : index
    %169 = vector.load %arg7[%c21, %c0_66] : memref<32x128xf32, #tpu.memory_space<vmem>>, vector<1x128xf32>
    tpu.vector_store %arg7[%c21, %c0_66], %168 {strides = array<i32>} : memref<32x128xf32, #tpu.memory_space<vmem>>, vector<1x128xf32>,
    %170 = vector.extract_strided_slice %125 {offsets = [0, 2816], sizes = [1, 128], strides = [1, 1]} : vector<1x4096xf32> to vector<1x128xf32>
    %c22 = arith.constant 22 : index
    %c0_67 = arith.constant 0 : index
    %171 = vector.load %arg7[%c22, %c0_67] : memref<32x128xf32, #tpu.memory_space<vmem>>, vector<1x128xf32>
    tpu.vector_store %arg7[%c22, %c0_67], %170 {strides = array<i32>} : memref<32x128xf32, #tpu.memory_space<vmem>>, vector<1x128xf32>,
    %172 = vector.extract_strided_slice %125 {offsets = [0, 2944], sizes = [1, 128], strides = [1, 1]} : vector<1x4096xf32> to vector<1x128xf32>
    %c23 = arith.constant 23 : index
    %c0_68 = arith.constant 0 : index
    %173 = vector.load %arg7[%c23, %c0_68] : memref<32x128xf32, #tpu.memory_space<vmem>>, vector<1x128xf32>
    tpu.vector_store %arg7[%c23, %c0_68], %172 {strides = array<i32>} : memref<32x128xf32, #tpu.memory_space<vmem>>, vector<1x128xf32>,
    %174 = vector.extract_strided_slice %125 {offsets = [0, 3072], sizes = [1, 128], strides = [1, 1]} : vector<1x4096xf32> to vector<1x128xf32>
    %c24 = arith.constant 24 : index
    %c0_69 = arith.constant 0 : index
    %175 = vector.load %arg7[%c24, %c0_69] : memref<32x128xf32, #tpu.memory_space<vmem>>, vector<1x128xf32>
    tpu.vector_store %arg7[%c24, %c0_69], %174 {strides = array<i32>} : memref<32x128xf32, #tpu.memory_space<vmem>>, vector<1x128xf32>,
    %176 = vector.extract_strided_slice %125 {offsets = [0, 3200], sizes = [1, 128], strides = [1, 1]} : vector<1x4096xf32> to vector<1x128xf32>
    %c25 = arith.constant 25 : index
    %c0_70 = arith.constant 0 : index
    %177 = vector.load %arg7[%c25, %c0_70] : memref<32x128xf32, #tpu.memory_space<vmem>>, vector<1x128xf32>
    tpu.vector_store %arg7[%c25, %c0_70], %176 {strides = array<i32>} : memref<32x128xf32, #tpu.memory_space<vmem>>, vector<1x128xf32>,
    %178 = vector.extract_strided_slice %125 {offsets = [0, 3328], sizes = [1, 128], strides = [1, 1]} : vector<1x4096xf32> to vector<1x128xf32>
    %c26 = arith.constant 26 : index
    %c0_71 = arith.constant 0 : index
    %179 = vector.load %arg7[%c26, %c0_71] : memref<32x128xf32, #tpu.memory_space<vmem>>, vector<1x128xf32>
    tpu.vector_store %arg7[%c26, %c0_71], %178 {strides = array<i32>} : memref<32x128xf32, #tpu.memory_space<vmem>>, vector<1x128xf32>,
    %180 = vector.extract_strided_slice %125 {offsets = [0, 3456], sizes = [1, 128], strides = [1, 1]} : vector<1x4096xf32> to vector<1x128xf32>
    %c27 = arith.constant 27 : index
    %c0_72 = arith.constant 0 : index
    %181 = vector.load %arg7[%c27, %c0_72] : memref<32x128xf32, #tpu.memory_space<vmem>>, vector<1x128xf32>
    tpu.vector_store %arg7[%c27, %c0_72], %180 {strides = array<i32>} : memref<32x128xf32, #tpu.memory_space<vmem>>, vector<1x128xf32>,
    %182 = vector.extract_strided_slice %125 {offsets = [0, 3584], sizes = [1, 128], strides = [1, 1]} : vector<1x4096xf32> to vector<1x128xf32>
    %c28 = arith.constant 28 : index
    %c0_73 = arith.constant 0 : index
    %183 = vector.load %arg7[%c28, %c0_73] : memref<32x128xf32, #tpu.memory_space<vmem>>, vector<1x128xf32>
    tpu.vector_store %arg7[%c28, %c0_73], %182 {strides = array<i32>} : memref<32x128xf32, #tpu.memory_space<vmem>>, vector<1x128xf32>,
    %184 = vector.extract_strided_slice %125 {offsets = [0, 3712], sizes = [1, 128], strides = [1, 1]} : vector<1x4096xf32> to vector<1x128xf32>
    %c29 = arith.constant 29 : index
    %c0_74 = arith.constant 0 : index
    %185 = vector.load %arg7[%c29, %c0_74] : memref<32x128xf32, #tpu.memory_space<vmem>>, vector<1x128xf32>
    tpu.vector_store %arg7[%c29, %c0_74], %184 {strides = array<i32>} : memref<32x128xf32, #tpu.memory_space<vmem>>, vector<1x128xf32>,
    %186 = vector.extract_strided_slice %125 {offsets = [0, 3840], sizes = [1, 128], strides = [1, 1]} : vector<1x4096xf32> to vector<1x128xf32>
    %c30 = arith.constant 30 : index
    %c0_75 = arith.constant 0 : index
    %187 = vector.load %arg7[%c30, %c0_75] : memref<32x128xf32, #tpu.memory_space<vmem>>, vector<1x128xf32>
    tpu.vector_store %arg7[%c30, %c0_75], %186 {strides = array<i32>} : memref<32x128xf32, #tpu.memory_space<vmem>>, vector<1x128xf32>,
    %188 = vector.extract_strided_slice %125 {offsets = [0, 3968], sizes = [1, 128], strides = [1, 1]} : vector<1x4096xf32> to vector<1x128xf32>
    %c31 = arith.constant 31 : index
    %c0_76 = arith.constant 0 : index
    %189 = vector.load %arg7[%c31, %c0_76] : memref<32x128xf32, #tpu.memory_space<vmem>>, vector<1x128xf32>
    tpu.vector_store %arg7[%c31, %c0_76], %188 {strides = array<i32>} : memref<32x128xf32, #tpu.memory_space<vmem>>, vector<1x128xf32>,
    %c0_77 = arith.constant 0 : index
    %c0_78 = arith.constant 0 : index
    %190 = vector.load %arg7[%c0_77, %c0_78] : memref<32x128xf32, #tpu.memory_space<vmem>>, vector<32x128xf32>
    %191 = tpu.iota {dimensions = array<i32: 1>} : vector<32x128xi32>
    %c64_i32 = arith.constant 64 : i32
    %192 = vector.broadcast %c64_i32 : i32 to vector<32x128xi32>
    %193 = arith.cmpi slt, %191, %192 : vector<32x128xi32>
    %cst_79 = arith.constant 0xFF800000 : f32
    %194 = vector.broadcast %cst_79 : f32 to vector<32x128xf32>
    %195 = arith.select %193, %190, %194 : vector<32x128xi1>, vector<32x128xf32>
    %cst_80 = arith.constant dense<0xFF800000> : vector<32xf32>
    %196 = vector.multi_reduction <maximumf>, %195, %cst_80 [1] : vector<32x128xf32> to vector<32xf32>
    %197 = vector.shape_cast %196 : vector<32xf32> to vector<32x1xf32>
    %cst_81 = arith.constant 0xFF800000 : f32
    %198 = vector.broadcast %cst_81 : f32 to vector<32x128xf32>
    %199 = arith.select %193, %198, %190 : vector<32x128xi1>, vector<32x128xf32>
    %cst_82 = arith.constant dense<0xFF800000> : vector<32xf32>
    %200 = vector.multi_reduction <maximumf>, %199, %cst_82 [1] : vector<32x128xf32> to vector<32xf32>
    %201 = vector.shape_cast %200 : vector<32xf32> to vector<32x1xf32>
    %202 = vector.shape_cast %197 : vector<32x1xf32> to vector<32x1xf32>
    %203 = vector.broadcast %202 : vector<32x1xf32> to vector<32x128xf32>
    %204 = vector.shape_cast %201 : vector<32x1xf32> to vector<32x1xf32>
    %205 = vector.broadcast %204 : vector<32x1xf32> to vector<32x128xf32>
    %206 = arith.select %193, %203, %205 : vector<32x128xi1>, vector<32x128xf32>
    %207 = arith.subf %190, %206 : vector<32x128xf32>
    %208 = math.exp %207 : vector<32x128xf32>
    %cst_83 = arith.constant 0.000000e+00 : f32
    %209 = vector.broadcast %cst_83 : f32 to vector<32x128xf32>
    %210 = arith.select %193, %208, %209 : vector<32x128xi1>, vector<32x128xf32>
    %cst_84 = arith.constant dense<0.000000e+00> : vector<32xf32>
    %211 = vector.multi_reduction <add>, %210, %cst_84 [1] : vector<32x128xf32> to vector<32xf32>
    %212 = vector.shape_cast %211 : vector<32xf32> to vector<32x1xf32>
    %cst_85 = arith.constant 0.000000e+00 : f32
    %213 = vector.broadcast %cst_85 : f32 to vector<32x128xf32>
    %214 = arith.select %193, %213, %208 : vector<32x128xi1>, vector<32x128xf32>
    %cst_86 = arith.constant dense<0.000000e+00> : vector<32xf32>
    %215 = vector.multi_reduction <add>, %214, %cst_86 [1] : vector<32x128xf32> to vector<32xf32>
    %216 = vector.shape_cast %215 : vector<32xf32> to vector<32x1xf32>
    %217 = vector.shape_cast %212 : vector<32x1xf32> to vector<32x1xf32>
    %218 = vector.broadcast %217 : vector<32x1xf32> to vector<32x128xf32>
    %219 = vector.shape_cast %216 : vector<32x1xf32> to vector<32x1xf32>
    %220 = vector.broadcast %219 : vector<32x1xf32> to vector<32x128xf32>
    %221 = arith.select %193, %218, %220 : vector<32x128xi1>, vector<32x128xf32>
    %222 = tpu.reciprocal %221 {approx = true} : vector<32x128xf32> -> vector<32x128xf32>
    %223 = arith.mulf %208, %222 : vector<32x128xf32>
    %c0_87 = arith.constant 0 : index
    %c0_88 = arith.constant 0 : index
    %224 = vector.load %arg7[%c0_87, %c0_88] : memref<32x128xf32, #tpu.memory_space<vmem>>, vector<32x128xf32>
    tpu.vector_store %arg7[%c0_87, %c0_88], %223 {strides = array<i32>} : memref<32x128xf32, #tpu.memory_space<vmem>>, vector<32x128xf32>,
    %cst_89 = arith.constant 1.000000e+00 : f32
    %225 = vector.broadcast %cst_89 : f32 to vector<1x64xf32>
    %226 = arith.subf %225, %2 : vector<1x64xf32>
    %227 = arith.mulf %113, %226 : vector<1x64xf32>
    %228 = arith.mulf %1, %2 : vector<1x64xf32>
    %229 = arith.addf %227, %228 : vector<1x64xf32>
    %c64 = arith.constant 64 : index
    %c0_90 = arith.constant 0 : index
    %230 = vector.load %arg4[%c64, %c0_90] : memref<640x128xbf16, #tpu.memory_space<vmem>>, vector<64x128xbf16>
    %231 = arith.truncf %113 : vector<1x64xf32> to vector<1x64xbf16>
    %cst_91 = arith.constant dense<0.000000e+00> : vector<1x128xf32>
    %232 = tpu.matmul %231, %230, %cst_91 {dimension_numbers = #tpu.dot_dimension_numbers<[1], [0], [0], [1], [0, 0, 1, 1], [], []>} : vector<1x64xbf16>, vector<64x128xbf16>, vector<1x128xf32> -> vector<1x128xf32>
    %c128 = arith.constant 128 : index
    %c0_92 = arith.constant 0 : index
    %233 = vector.load %arg4[%c128, %c0_92] : memref<640x128xbf16, #tpu.memory_space<vmem>>, vector<64x128xbf16>
    %234 = arith.truncf %229 : vector<1x64xf32> to vector<1x64xbf16>
    %cst_93 = arith.constant dense<0.000000e+00> : vector<1x128xf32>
    %235 = tpu.matmul %234, %233, %cst_93 {dimension_numbers = #tpu.dot_dimension_numbers<[1], [0], [0], [1], [0, 0, 1, 1], [], []>} : vector<1x64xbf16>, vector<64x128xbf16>, vector<1x128xf32> -> vector<1x128xf32>
    %236 = arith.addf %232, %235 : vector<1x128xf32>
    %c0_94 = arith.constant 0 : index
    %c5504 = arith.constant 5504 : index
    %237 = vector.load %arg1[%c0_94, %c5504] : memref<1x6144xf32, #tpu.memory_space<vmem>>, vector<1x128xf32>
    %238 = arith.addf %236, %237 : vector<1x128xf32>
    %cst_95 = arith.constant 0.000000e+00 : f32
    %239 = vector.broadcast %cst_95 : f32 to vector<1x128xf32>
    %240 = arith.maximumf %238, %239 : vector<1x128xf32>
    %c192 = arith.constant 192 : index
    %c0_96 = arith.constant 0 : index
    %241 = vector.load %arg4[%c192, %c0_96] : memref<640x128xbf16, #tpu.memory_space<vmem>>, vector<128x128xbf16>
    %242 = arith.truncf %240 : vector<1x128xf32> to vector<1x128xbf16>
    %cst_97 = arith.constant dense<0.000000e+00> : vector<1x128xf32>
    %243 = tpu.matmul %242, %241, %cst_97 {dimension_numbers = #tpu.dot_dimension_numbers<[1], [0], [0], [1], [0, 0, 1, 1], [], []>} : vector<1x128xbf16>, vector<128x128xbf16>, vector<1x128xf32> -> vector<1x128xf32>
    %c0_98 = arith.constant 0 : index
    %c5632 = arith.constant 5632 : index
    %244 = vector.load %arg1[%c0_98, %c5632] : memref<1x6144xf32, #tpu.memory_space<vmem>>, vector<1x128xf32>
    %245 = arith.addf %243, %244 : vector<1x128xf32>
    %246 = vector.extract_strided_slice %245 {offsets = [0, 0], sizes = [1, 64], strides = [1, 1]} : vector<1x128xf32> to vector<1x64xf32>
    %c0_99 = arith.constant 0 : index
    %c0_100 = arith.constant 0 : index
    %247 = vector.load %arg6[%c0_99, %c0_100] : memref<1x64xf32, #tpu.memory_space<vmem>>, vector<1x64xf32>
    tpu.vector_store %arg6[%c0_99, %c0_100], %246 {strides = array<i32>} : memref<1x64xf32, #tpu.memory_space<vmem>>, vector<1x64xf32>,
    %c320 = arith.constant 320 : index
    %c0_101 = arith.constant 0 : index
    %248 = vector.load %arg4[%c320, %c0_101] : memref<640x128xbf16, #tpu.memory_space<vmem>>, vector<64x128xbf16>
    %249 = arith.truncf %246 : vector<1x64xf32> to vector<1x64xbf16>
    %cst_102 = arith.constant dense<0.000000e+00> : vector<1x128xf32>
    %250 = tpu.matmul %249, %248, %cst_102 {dimension_numbers = #tpu.dot_dimension_numbers<[1], [0], [0], [1], [0, 0, 1, 1], [], []>} : vector<1x64xbf16>, vector<64x128xbf16>, vector<1x128xf32> -> vector<1x128xf32>
    %c0_103 = arith.constant 0 : index
    %c5760 = arith.constant 5760 : index
    %251 = vector.load %arg1[%c0_103, %c5760] : memref<1x6144xf32, #tpu.memory_space<vmem>>, vector<1x128xf32>
    %252 = arith.addf %250, %251 : vector<1x128xf32>
    %cst_104 = arith.constant 0.000000e+00 : f32
    %253 = vector.broadcast %cst_104 : f32 to vector<1x128xf32>
    %254 = arith.maximumf %252, %253 : vector<1x128xf32>
    %c384_105 = arith.constant 384 : index
    %c0_106 = arith.constant 0 : index
    %255 = vector.load %arg4[%c384_105, %c0_106] : memref<640x128xbf16, #tpu.memory_space<vmem>>, vector<128x128xbf16>
    %256 = arith.truncf %254 : vector<1x128xf32> to vector<1x128xbf16>
    %cst_107 = arith.constant dense<0.000000e+00> : vector<1x128xf32>
    %257 = tpu.matmul %256, %255, %cst_107 {dimension_numbers = #tpu.dot_dimension_numbers<[1], [0], [0], [1], [0, 0, 1, 1], [], []>} : vector<1x128xbf16>, vector<128x128xbf16>, vector<1x128xf32> -> vector<1x128xf32>
    %c0_108 = arith.constant 0 : index
    %c5888 = arith.constant 5888 : index
    %258 = vector.load %arg1[%c0_108, %c5888] : memref<1x6144xf32, #tpu.memory_space<vmem>>, vector<1x128xf32>
    %259 = arith.addf %257, %258 : vector<1x128xf32>
    %cst_109 = arith.constant 0.000000e+00 : f32
    %260 = vector.broadcast %cst_109 : f32 to vector<1x128xf32>
    %261 = arith.maximumf %259, %260 : vector<1x128xf32>
    %c512_110 = arith.constant 512 : index
    %c0_111 = arith.constant 0 : index
    %262 = vector.load %arg4[%c512_110, %c0_111] : memref<640x128xbf16, #tpu.memory_space<vmem>>, vector<128x128xbf16>
    %263 = arith.truncf %261 : vector<1x128xf32> to vector<1x128xbf16>
    %cst_112 = arith.constant dense<0.000000e+00> : vector<1x128xf32>
    %264 = tpu.matmul %263, %262, %cst_112 {dimension_numbers = #tpu.dot_dimension_numbers<[1], [0], [0], [1], [0, 0, 1, 1], [], []>} : vector<1x128xbf16>, vector<128x128xbf16>, vector<1x128xf32> -> vector<1x128xf32>
    %c0_113 = arith.constant 0 : index
    %c6016 = arith.constant 6016 : index
    %265 = vector.load %arg1[%c0_113, %c6016] : memref<1x6144xf32, #tpu.memory_space<vmem>>, vector<1x128xf32>
    %266 = arith.addf %264, %265 : vector<1x128xf32>
    %c0_114 = arith.constant 0 : index
    %c0_115 = arith.constant 0 : index
    %267 = vector.load %arg8[%c0_114, %c0_115] : memref<1x128xf32, #tpu.memory_space<vmem>>, vector<1x128xf32>
    tpu.vector_store %arg8[%c0_114, %c0_115], %266 {strides = array<i32>} : memref<1x128xf32, #tpu.memory_space<vmem>>, vector<1x128xf32>,
    return
  }
}

</mosaic_0001>

<bundles_post_ra>
// kernel: causal_world_model_forward.1
= control target key start
LH: loop header
LB: loop body
LE: loop exit
PB: predicated region body
PF: predicated region fallthrough
CT: control target
= control target key end

     0   :  { %14 = vsyncpa [#allocation3], 0  ;;  %s5865_s0 = inlined_call_operand.vmem [shape: f32[1,512], index: 0, kind: input, shape index: {}]   ;;  %s5866_s1 = inlined_call_operand.vmem [shape: f32[1,6144], index: 1, kind: input, shape index: {}]   ;;  %s5867_s2 = inlined_call_operand.hbm [shape: bf16[256,512], index: 2, kind: input, shape index: {}]   ;;  %s5868_s3 = inlined_call_operand.hbm [shape: bf16[512,256], index: 3, kind: input, shape index: {}]   ;;  %s5869_s4 = inlined_call_operand.hbm [shape: bf16[640,128], index: 4, kind: input, shape index: {}]   ;;  %s5870_s5 = inlined_call_operand.hbm [shape: bf16[128,4096], index: 5, kind: input, shape index: {}]   ;;  %s5871_s6 = inlined_call_operand.hbm [shape: f32[1,64], index: 6, kind: output, shape index: {0}]   ;;  %s5872_s7 = inlined_call_operand.vmem [shape: f32[32,128], index: 7, kind: output, shape index: {1}]   ;;  %s5873_s8 = inlined_call_operand.vmem [shape: f32[1,128], index: 8, kind: output, shape index: {2}]  }
   0x1   :  { %15 = vsyncpa [#allocation6], 0 }
   0x2   :  { %16 = vsyncpa [#allocation9], 0 }
   0x3   :  { %17 = vsyncpa [#allocation4], 0  ;;  %s5287_s27 = smov [#allocation5]  }
   0x4   :  { %s39_s28 = sshll.u32 %s5287_s27, 4  ;;  %s40_s28 = int_to_ptr.vmem [resolvable:$true] %s39_s28 }
   0x5   :  { %s5187_s29 = scalar_lea.vmem %s40_s28, 8192  ;;  %p5192_p1 = scmp.lt.s32.totalorder %s40_s28, %s40_s28 }
   0x6   :  { %p5188_p0 = scmp.ne.s32.totalorder %s40_s28, %s5187_s29  ;;  %p5193_p2 = scmp.lt.s32.totalorder %s5187_s29, %s5187_s29 }
   0x8   :  { %p5194_p3 = por %p5193_p2, %p5192_p1 }
   0xa   :  { %p5195_p4 = pnand %p5194_p3, %p5188_p0 }
   0xc   :  { %5198 = shalt.err (!%p5195_p4)
}
   0xd   :  { %s5288_s30 = smov 128   ;;  %s5289_s9 = smov 8  }
   0xe   :  { %45 = dma.hbm_to_vmem [thread:$0]  %s5868_s3, 8192, %s40_s28, [#allocation6], %s5288_s30, %s5288_s30, %s5289_s9  }
   0xf   :  { %s5290_s12 = smov [#allocation2]  }
  0x10   :  { %s27_s13 = sshll.u32 %s5290_s12, 4  ;;  %s28_s13 = int_to_ptr.vmem [resolvable:$true] %s27_s13 }
  0x11   :  { %s5207_s14 = scalar_lea.vmem %s28_s13, 8192  ;;  %p5212_p6 = scmp.lt.s32.totalorder %s28_s13, %s28_s13 }
  0x12   :  { %p5208_p5 = scmp.ne.s32.totalorder %s28_s13, %s5207_s14  ;;  %p5213_p7 = scmp.lt.s32.totalorder %s5207_s14, %s5207_s14 }
  0x14   :  { %p5214_p8 = por %p5213_p7, %p5212_p6 }
  0x16   :  { %p5215_p9 = pnand %p5214_p8, %p5208_p5 }
  0x18   :  { %5218 = shalt.err (!%p5215_p9)
}
  0x19   :  { %s5291_s15 = smov 256   ;;  %s5292_s16 = smov 16  }
  0x1a   :  { %33 = dma.hbm_to_vmem [thread:$0]  %s5867_s2, 8192, %s28_s13, [#allocation3], %s5291_s15, %s5291_s15, %s5292_s16  }
  0x1b   :  { %s5293_s19 = smov [#allocation7]  }
  0x1c   :  { %s51_s20 = sshll.u32 %s5293_s19, 4  ;;  %s52_s20 = int_to_ptr.vmem [resolvable:$true] %s51_s20 }
  0x1d   :  { %s5227_s3 = scalar_lea.vmem %s52_s20, 5120  ;;  %p5232_p11 = scmp.lt.s32.totalorder %s52_s20, %s52_s20 }
  0x1e   :  { %p5228_p10 = scmp.ne.s32.totalorder %s52_s20, %s5227_s3  ;;  %p5233_p12 = scmp.lt.s32.totalorder %s5227_s3, %s5227_s3 }
  0x20   :  { %p5234_p13 = por %p5233_p12, %p5232_p11 }
  0x22   :  { %p5235_p0 = pnand %p5234_p13, %p5228_p10 }
  0x24   :  { %5238 = shalt.err (!%p5235_p0)
}
  0x25   :  { %s5294_s21 = smov 64   ;;  %s5295_s22 = smov 4  }
  0x26   :  { %57 = dma.hbm_to_vmem [thread:$0]  %s5869_s4, 5120, %s52_s20, [#allocation6], %s5294_s21, %s5294_s21, %s5295_s22  }
  0x27   :  { %s5296_s25 = smov [#allocation8]  }
  0x28   :  { %s63_s2 = sshll.u32 %s5296_s25, 4  ;;  %s64_s2 = int_to_ptr.vmem [resolvable:$true] %s63_s2 }
  0x29   :  { %s5247_s26 = scalar_lea.vmem %s64_s2, 32768  ;;  %p5252_p2 = scmp.lt.s32.totalorder %s64_s2, %s64_s2 }
  0x2a   :  { %p5248_p1 = scmp.ne.s32.totalorder %s64_s2, %s5247_s26  ;;  %p5253_p3 = scmp.lt.s32.totalorder %s5247_s26, %s5247_s26 }
  0x2c   :  { %p5254_p4 = por %p5253_p3, %p5252_p2 }
  0x2e   :  { %p5255_p5 = pnand %p5254_p4, %p5248_p1 }
  0x30   :  { %5258 = shalt.err (!%p5255_p5)
}
  0x31   :  { %s5297_s27 = smov 2048  }
  0x32   :  { %69 = dma.hbm_to_vmem [thread:$0]  %s5870_s5, 32768, %s64_s2, [#allocation9], %s5297_s27, %s5297_s27, %s5288_s30  }
  0x33   :  { %5279 = dma.done.wait [#allocation3], 8192  }
  0x34   :  { %5280 = vsyncadd [#allocation3], 4294959104 }
  0x35   :  { %5281 = dma.done.wait [#allocation6], 13312  }
  0x36   :  { %5282 = vsyncadd [#allocation6], 4294953984 }
  0x37   :  { %5283 = dma.done.wait [#allocation9], 32768  }
  0x38   :  { %5284 = vsyncadd [#allocation9], 4294934528  ;;  %v4923_v0 = vld [vmem:[#allocation2 + $0xe4] ss:$16 sps:$4 sm:$0xff]   ;;  %v4925_v1 = vld [vmem:[#allocation2 + $0xec] ss:$16 sps:$4 sm:$0xff]   ;;  %v151_v36 = vlaneseq }
  0x39   :  { %505 = vmatprep.subr.bf16.mxu0 %v4923_v0  ;;  %v4927_v2 = vld [vmem:[#allocation2 + $0xe0] ss:$16 sps:$4 sm:$0xff]   ;;  %v4928_v3 = vld [vmem:[#allocation2 + $0xe8] ss:$16 sps:$4 sm:$0xff]   ;;  %546 = vmatprep.subr.bf16.mxu1 %v4925_v1  ;;  %v4929_v4 = vld [vmem:[#allocation2 + $0xc4] ss:$16 sps:$4 sm:$0xff]  }
  0x3a   :  { %506 = vmatpush1.bf16.msra.mxu0 %v4927_v2  ;;  %547 = vmatpush1.bf16.msra.mxu1 %v4928_v3  ;;  %v4931_v5 = vld [vmem:[#allocation2 + $0xcc] ss:$16 sps:$4 sm:$0xff]   ;;  %v4933_v6 = vld [vmem:[#allocation2 + $0xc0] ss:$16 sps:$4 sm:$0xff]   ;;  %v4934_v7 = vld [vmem:[#allocation2 + $0xc8] ss:$16 sps:$4 sm:$0xff]  }
  0x3b   :  { %507 = vmatprep.subr.bf16.mxu0 %v4929_v4  ;;  %548 = vmatprep.subr.bf16.mxu1 %v4931_v5  ;;  %v4935_v8 = vld [vmem:[#allocation2 + $0xa4] ss:$16 sps:$4 sm:$0xff]   ;;  %v4937_v9 = vld [vmem:[#allocation2 + $0xac] ss:$16 sps:$4 sm:$0xff]   ;;  %v4939_v10 = vld [vmem:[#allocation2 + $0xa0] ss:$16 sps:$4 sm:$0xff]  }
  0x3c   :  { %v4940_v11 = vld [vmem:[#allocation2 + $0xa8] ss:$16 sps:$4 sm:$0xff]   ;;  %v4941_v12 = vld [vmem:[#allocation2 + $0x84] ss:$16 sps:$4 sm:$0xff]   ;;  %v4943_v13 = vld [vmem:[#allocation2 + $0x8c] ss:$16 sps:$4 sm:$0xff]  }
  0x3d   :  { %v4945_v14 = vld [vmem:[#allocation2 + $0x80] ss:$16 sps:$4 sm:$0xff]   ;;  %v4946_v15 = vld [vmem:[#allocation2 + $0x88] ss:$16 sps:$4 sm:$0xff]   ;;  %v4947_v16 = vld [vmem:[#allocation2 + $0x64] ss:$16 sps:$4 sm:$0xff]  }
  0x3e   :  { %508 = vmatpush1.bf16.msra.mxu0 %v4933_v6  ;;  %549 = vmatpush1.bf16.msra.mxu1 %v4934_v7  ;;  %v4949_v17 = vld [vmem:[#allocation2 + $0x6c] ss:$16 sps:$4 sm:$0xff]   ;;  %v4951_v18 = vld [vmem:[#allocation2 + $0x60] ss:$16 sps:$4 sm:$0xff]   ;;  %v4952_v19 = vld [vmem:[#allocation2 + $0x68] ss:$16 sps:$4 sm:$0xff]  }
  0x3f   :  { %509 = vmatprep.subr.bf16.mxu0 %v4935_v8  ;;  %550 = vmatprep.subr.bf16.mxu1 %v4937_v9  ;;  %v4953_v20 = vld [vmem:[#allocation2 + $0x44] ss:$16 sps:$4 sm:$0xff]   ;;  %v4955_v21 = vld [vmem:[#allocation2 + $0x4c] ss:$16 sps:$4 sm:$0xff]   ;;  %v4957_v22 = vld [vmem:[#allocation2 + $0x40] ss:$16 sps:$4 sm:$0xff]  }
  0x40   :  { %v4958_v23 = vld [vmem:[#allocation2 + $0x48] ss:$16 sps:$4 sm:$0xff]   ;;  %v4959_v24 = vld [vmem:[#allocation2 + $0x24] ss:$16 sps:$4 sm:$0xff]   ;;  %v4961_v25 = vld [vmem:[#allocation2 + $0x2c] ss:$16 sps:$4 sm:$0xff]  }
  0x41   :  { %v4963_v26 = vld [vmem:[#allocation2 + $0x20] ss:$16 sps:$4 sm:$0xff]   ;;  %v4964_v27 = vld [vmem:[#allocation2 + $0x28] ss:$16 sps:$4 sm:$0xff]   ;;  %v4965_v28 = vld [vmem:[#allocation2 + $0x4] ss:$16 sps:$4 sm:$0xff]  }
  0x42   :  { %510 = vmatpush1.bf16.msra.mxu0 %v4939_v10  ;;  %551 = vmatpush1.bf16.msra.mxu1 %v4940_v11  ;;  %v4967_v29 = vld [vmem:[#allocation2 + $0xc] ss:$16 sps:$4 sm:$0xff]   ;;  %v4969_v30 = vld [vmem:[#allocation2] ss:$16 sps:$4 sm:$0xff]   ;;  %v4970_v31 = vld [vmem:[#allocation2 + $0x8] ss:$16 sps:$4 sm:$0xff]  }
  0x43   :  { %511 = vmatprep.subr.bf16.mxu0 %v4941_v12  ;;  %552 = vmatprep.subr.bf16.mxu1 %v4943_v13  ;;  %v4971_v32 = vld [vmem:[#allocation2 + $0x1e4] ss:$16 sps:$4 sm:$0xff]   ;;  %v4973_v33 = vld [vmem:[#allocation2 + $0x1ec] ss:$16 sps:$4 sm:$0xff]   ;;  %v4975_v34 = vld [vmem:[#allocation2 + $0x1e0] ss:$16 sps:$4 sm:$0xff]  }
  0x44   :  { %v4976_v35 = vld [vmem:[#allocation2 + $0x1e8] ss:$16 sps:$4 sm:$0xff]   ;;  %v4977_v37 = vld [vmem:[#allocation2 + $0x1c4] ss:$16 sps:$4 sm:$0xff]   ;;  %v4979_v38 = vld [vmem:[#allocation2 + $0x1cc] ss:$16 sps:$4 sm:$0xff]  }
  0x45   :  { %v4981_v39 = vld [vmem:[#allocation2 + $0x1c0] ss:$16 sps:$4 sm:$0xff]   ;;  %v5365_v40 = vshrl.u32 %v151_v36, 7  ;;  %v4982_v41 = vld [vmem:[#allocation2 + $0x1c8] ss:$16 sps:$4 sm:$0xff]   ;;  %vm1075_vm0 = vcmask 516096  }
  0x46   :  { %512 = vmatpush1.bf16.msra.mxu0 %v4945_v14  ;;  %553 = vmatpush1.bf16.msra.mxu1 %v4946_v15  ;;  %v4983_v42 = vld [vmem:[#allocation2 + $0x1a4] ss:$16 sps:$4 sm:$0xff]   ;;  %v4985_v43 = vld [vmem:[#allocation2 + $0x1ac] ss:$16 sps:$4 sm:$0xff]   ;;  %v4987_v44 = vld [vmem:[#allocation2 + $0x1a0] ss:$16 sps:$4 sm:$0xff]  }
  0x47   :  { %513 = vmatprep.subr.bf16.mxu0 %v4947_v16  ;;  %554 = vmatprep.subr.bf16.mxu1 %v4949_v17  ;;  %v4988_v45 = vld [vmem:[#allocation2 + $0x1a8] ss:$16 sps:$4 sm:$0xff]   ;;  %v5368_v46 = vsub.s32 1, %v5365_v40  ;;  %v4989_v47 = vld [vmem:[#allocation2 + $0x184] ss:$16 sps:$4 sm:$0xff]   ;;  %v5375_v1 = vsub.s32 0, %v5365_v40 }
  0x48   :  { %v4991_v48 = vld [vmem:[#allocation2 + $0x18c] ss:$16 sps:$4 sm:$0xff]   ;;  %v83_v49 = vld [vmem:[%s5865_s0] sm:$0x3]  ;;  %v4994_v52 = vld [vmem:[#allocation2 + $0x188] ss:$16 sps:$4 sm:$0xff]  }
  0x49   :  { %v4993_v50 = vld [vmem:[#allocation2 + $0x180] ss:$16 sps:$4 sm:$0xff]   ;;  %v158_v51 = vrot.slane %v83_v49, %v5368_v46  ;;  %v4995_v53 = vld [vmem:[#allocation2 + $0x164] ss:$16 sps:$4 sm:$0xff]   ;;  %v4997_v54 = vld [vmem:[#allocation2 + $0x16c] ss:$16 sps:$4 sm:$0xff]   ;;  %v154_v6 = vrot.slane %v83_v49, %v5375_v1 }
  0x4a   :  { %514 = vmatpush1.bf16.msra.mxu0 %v4951_v18  ;;  %555 = vmatpush1.bf16.msra.mxu1 %v4952_v19  ;;  %v4999_v56 = vld [vmem:[#allocation2 + $0x160] ss:$16 sps:$4 sm:$0xff]   ;;  %v5000_v57 = vld [vmem:[#allocation2 + $0x168] ss:$16 sps:$4 sm:$0xff]   ;;  %v5001_v58 = vld [vmem:[#allocation2 + $0x144] ss:$16 sps:$4 sm:$0xff]  }
  0x4b   :  { %515 = vmatprep.subr.bf16.mxu0 %v4953_v20  ;;  %556 = vmatprep.subr.bf16.mxu1 %v4955_v21  ;;  %v162_v55 = vpack.c.bf16 %v158_v51, %v158_v51  ;;  %v5003_v59 = vld [vmem:[#allocation2 + $0x14c] ss:$16 sps:$4 sm:$0xff]   ;;  %v5005_v60 = vld [vmem:[#allocation2 + $0x140] ss:$16 sps:$4 sm:$0xff]   ;;  %v5006_v61 = vld [vmem:[#allocation2 + $0x148] ss:$16 sps:$4 sm:$0xff]   ;;  %v161_v10 = vpack.c.bf16 %v154_v6, %v154_v6 }
  0x4c   :  { %v5007_v62 = vld [vmem:[#allocation2 + $0x124] ss:$16 sps:$4 sm:$0xff]   ;;  %v5009_v63 = vld [vmem:[#allocation2 + $0x12c] ss:$16 sps:$4 sm:$0xff]   ;;  %v5011_v0 = vld [vmem:[#allocation2 + $0x120] ss:$16 sps:$4 sm:$0xff]  }
  0x4d   :  { %537 = vmatprep.mubr.bf16.mxu0 %v162_v55  ;;  %578 = vmatprep.mubr.bf16.mxu1 %v162_v55  ;;  %v5012_v2 = vld [vmem:[#allocation2 + $0x128] ss:$16 sps:$4 sm:$0xff]   ;;  %v5013_v3 = vld [vmem:[#allocation2 + $0x104] ss:$16 sps:$4 sm:$0xff]   ;;  %v5015_v4 = vld [vmem:[#allocation2 + $0x10c] ss:$16 sps:$4 sm:$0xff]  }
  0x4e   :  { %516 = vmatpush1.bf16.msra.mxu0 %v4957_v22  ;;  %557 = vmatpush1.bf16.msra.mxu1 %v4958_v23  ;;  %v5017_v5 = vld [vmem:[#allocation2 + $0x100] ss:$16 sps:$4 sm:$0xff]   ;;  %v5018_v7 = vld [vmem:[#allocation2 + $0x108] ss:$16 sps:$4 sm:$0xff]   ;;  %v5021_v8 = vld [vmem:[#allocation5 + $0x74] ss:$8 sps:$4 sm:$0xff]  }
  0x4f   :  { %517 = vmatprep.subr.bf16.mxu0 %v4959_v24  ;;  %558 = vmatprep.subr.bf16.mxu1 %v4961_v25  ;;  %v5024_v9 = vld [vmem:[#allocation5 + $0x174] ss:$8 sps:$4 sm:$0xff]   ;;  %v5019_v11 = vld [vmem:[#allocation5 + $0x70] ss:$8 sps:$4 sm:$0xff]   ;;  %v5027_v13 = vld [vmem:[#allocation5 + $0x64] ss:$8 sps:$4 sm:$0xff]  }
  0x50   :  { %v5022_v12 = vld [vmem:[#allocation5 + $0x170] ss:$8 sps:$4 sm:$0xff]   ;;  %v5030_v14 = vld [vmem:[#allocation5 + $0x164] ss:$8 sps:$4 sm:$0xff]   ;;  %v5025_v15 = vld [vmem:[#allocation5 + $0x60] ss:$8 sps:$4 sm:$0xff]  }
  0x51   :  { %v5028_v16 = vld [vmem:[#allocation5 + $0x160] ss:$8 sps:$4 sm:$0xff]   ;;  %v5033_v17 = vld [vmem:[#allocation5 + $0x54] ss:$8 sps:$4 sm:$0xff]   ;;  %v5031_v19 = vld [vmem:[#allocation5 + $0x50] ss:$8 sps:$4 sm:$0xff]  }
  0x52   :  { %518 = vmatpush1.bf16.msra.mxu0 %v4963_v26  ;;  %559 = vmatpush1.bf16.msra.mxu1 %v4964_v27  ;;  %v5036_v18 = vld [vmem:[#allocation5 + $0x154] ss:$8 sps:$4 sm:$0xff]   ;;  %v5034_v20 = vld [vmem:[#allocation5 + $0x150] ss:$8 sps:$4 sm:$0xff]   ;;  %v5039_v21 = vld [vmem:[#allocation5 + $0x44] ss:$8 sps:$4 sm:$0xff]  }
  0x53   :  { %519 = vmatprep.subr.bf16.mxu0 %v4965_v28  ;;  %560 = vmatprep.subr.bf16.mxu1 %v4967_v29  ;;  %v5042_v22 = vld [vmem:[#allocation5 + $0x144] ss:$8 sps:$4 sm:$0xff]   ;;  %v5037_v23 = vld [vmem:[#allocation5 + $0x40] ss:$8 sps:$4 sm:$0xff]   ;;  %v5045_v25 = vld [vmem:[#allocation5 + $0x34] ss:$8 sps:$4 sm:$0xff]  }
  0x54   :  { %v5040_v24 = vld [vmem:[#allocation5 + $0x140] ss:$8 sps:$4 sm:$0xff]   ;;  %v5048_v26 = vld [vmem:[#allocation5 + $0x134] ss:$8 sps:$4 sm:$0xff]   ;;  %v5043_v27 = vld [vmem:[#allocation5 + $0x30] ss:$8 sps:$4 sm:$0xff]  }
  0x55   :  { %v5046_v28 = vld [vmem:[#allocation5 + $0x130] ss:$8 sps:$4 sm:$0xff]   ;;  %v5051_v29 = vld [vmem:[#allocation5 + $0x24] ss:$8 sps:$4 sm:$0xff]   ;;  %v5076_v51 = vld [vmem:[#allocation5 + $0x1e0] ss:$8 sps:$4 sm:$0xff]  }
  0x56   :  { %520 = vmatpush1.bf16.msra.mxu0 %v4969_v30  ;;  %561 = vmatpush1.bf16.msra.mxu1 %v4970_v31  ;;  %v5054_v30 = vld [vmem:[#allocation5 + $0x124] ss:$8 sps:$4 sm:$0xff]   ;;  %v5049_v31 = vld [vmem:[#allocation5 + $0x20] ss:$8 sps:$4 sm:$0xff]   ;;  %v5082_v55 = vld [vmem:[#allocation5 + $0x1d0] ss:$8 sps:$4 sm:$0xff]  }
  0x57   :  { %521 = vmatprep.subr.bf16.mxu0 %v4971_v32  ;;  %562 = vmatprep.subr.bf16.mxu1 %v4973_v33  ;;  %v5052_v32 = vld [vmem:[#allocation5 + $0x120] ss:$8 sps:$4 sm:$0xff]   ;;  %v5057_v33 = vld [vmem:[#allocation5 + $0x14] ss:$8 sps:$4 sm:$0xff]   ;;  %v5078_v49 = vld [vmem:[#allocation5 + $0x1e4] ss:$8 sps:$4 sm:$0xff]  }
  0x58   :  { %v5108_v6 = vld [vmem:[#allocation5 + $0x194] ss:$8 sps:$4 sm:$0xff]   ;;  %vm5299_vm1 = vmmov 0   ;;  %vm1221_vm2 = vcmask 523264   ;;  %s5301_s10 = smov [#allocation10]  }
  0x5a   :  { %522 = vmatpush2.bf16.msra.mxu0 %v4975_v34  ;;  %563 = vmatpush2.bf16.msra.mxu1 %v4976_v35  ;;  %v5060_v34 = vld [vmem:[#allocation5 + $0x114] ss:$8 sps:$4 sm:$0xff]   ;;  %v5055_v35 = vld [vmem:[#allocation5 + $0x10] ss:$8 sps:$4 sm:$0xff]  }
  0x5b   :  { %523 = vmatprep.subr.bf16.mxu0 %v4977_v37  ;;  %564 = vmatprep.subr.bf16.mxu1 %v4979_v38  ;;  %v5058_v37 = vld [vmem:[#allocation5 + $0x110] ss:$8 sps:$4 sm:$0xff]   ;;  %v5063_v38 = vld [vmem:[#allocation5 + $0x4] ss:$8 sps:$4 sm:$0xff]  }
  0x5e   :  { %524 = vmatpush2.bf16.msra.mxu0 %v4981_v39  ;;  %565 = vmatpush2.bf16.msra.mxu1 %v4982_v41  ;;  %v5066_v39 = vld [vmem:[#allocation5 + $0x104] ss:$8 sps:$4 sm:$0xff]   ;;  %v5061_v41 = vld [vmem:[#allocation5] ss:$8 sps:$4 sm:$0xff]  }
  0x5f   :  { %525 = vmatprep.subr.bf16.mxu0 %v4983_v42  ;;  %566 = vmatprep.subr.bf16.mxu1 %v4985_v43  ;;  %v5064_v42 = vld [vmem:[#allocation5 + $0x100] ss:$8 sps:$4 sm:$0xff]   ;;  %v5069_v43 = vld [vmem:[#allocation5 + $0xf4] ss:$8 sps:$4 sm:$0xff]  }
  0x62   :  { %526 = vmatpush2.bf16.msra.mxu0 %v4987_v44  ;;  %567 = vmatpush2.bf16.msra.mxu1 %v4988_v45  ;;  %v5072_v44 = vld [vmem:[#allocation5 + $0x1f4] ss:$8 sps:$4 sm:$0xff]   ;;  %v5067_v45 = vld [vmem:[#allocation5 + $0xf0] ss:$8 sps:$4 sm:$0xff]  }
  0x63   :  { %527 = vmatprep.subr.bf16.mxu0 %v4989_v47  ;;  %568 = vmatprep.subr.bf16.mxu1 %v4991_v48  ;;  %v5070_v47 = vld [vmem:[#allocation5 + $0x1f0] ss:$8 sps:$4 sm:$0xff]   ;;  %v5075_v48 = vld [vmem:[#allocation5 + $0xe4] ss:$8 sps:$4 sm:$0xff]  }
  0x66   :  { %528 = vmatpush2.bf16.msra.mxu0 %v4993_v50  ;;  %569 = vmatpush2.bf16.msra.mxu1 %v4994_v52  ;;  %v5073_v50 = vld [vmem:[#allocation5 + $0xe0] ss:$8 sps:$4 sm:$0xff]   ;;  %v5081_v52 = vld [vmem:[#allocation5 + $0xd4] ss:$8 sps:$4 sm:$0xff]  }
  0x67   :  { %529 = vmatprep.subr.bf16.mxu0 %v4995_v53  ;;  %570 = vmatprep.subr.bf16.mxu1 %v4997_v54  ;;  %v5084_v53 = vld [vmem:[#allocation5 + $0x1d4] ss:$8 sps:$4 sm:$0xff]   ;;  %v5079_v54 = vld [vmem:[#allocation5 + $0xd0] ss:$8 sps:$4 sm:$0xff]  }
  0x6a   :  { %530 = vmatpush2.bf16.msra.mxu0 %v4999_v56  ;;  %571 = vmatpush2.bf16.msra.mxu1 %v5000_v57  ;;  %v5087_v56 = vld [vmem:[#allocation5 + $0xc4] ss:$8 sps:$4 sm:$0xff]  }
  0x6b   :  { %531 = vmatprep.subr.bf16.mxu0 %v5001_v58  ;;  %572 = vmatprep.subr.bf16.mxu1 %v5003_v59  ;;  %v5090_v57 = vld [vmem:[#allocation5 + $0x1c4] ss:$8 sps:$4 sm:$0xff]   ;;  %v5085_v58 = vld [vmem:[#allocation5 + $0xc0] ss:$8 sps:$4 sm:$0xff]  }
  0x6c   :  { %v5088_v59 = vld [vmem:[#allocation5 + $0x1c0] ss:$8 sps:$4 sm:$0xff]  }
  0x6e   :  { %532 = vmatpush2.bf16.msra.mxu0 %v5005_v60  ;;  %573 = vmatpush2.bf16.msra.mxu1 %v5006_v61  ;;  %v5093_v60 = vld [vmem:[#allocation5 + $0xb4] ss:$8 sps:$4 sm:$0xff]  }
  0x6f   :  { %533 = vmatprep.subr.bf16.mxu0 %v5007_v62  ;;  %574 = vmatprep.subr.bf16.mxu1 %v5009_v63  ;;  %v5096_v61 = vld [vmem:[#allocation5 + $0x1b4] ss:$8 sps:$4 sm:$0xff]   ;;  %v5091_v62 = vld [vmem:[#allocation5 + $0xb0] ss:$8 sps:$4 sm:$0xff]  }
  0x70   :  { %v5094_v63 = vld [vmem:[#allocation5 + $0x1b0] ss:$8 sps:$4 sm:$0xff]  }
  0x72   :  { %534 = vmatpush2.bf16.msra.mxu0 %v5011_v0  ;;  %575 = vmatpush2.bf16.msra.mxu1 %v5012_v2  ;;  %v5099_v0 = vld [vmem:[#allocation5 + $0xa4] ss:$8 sps:$4 sm:$0xff]  }
  0x73   :  { %535 = vmatprep.subr.bf16.mxu0 %v5013_v3  ;;  %576 = vmatprep.subr.bf16.mxu1 %v5015_v4  ;;  %v5102_v2 = vld [vmem:[#allocation5 + $0x1a4] ss:$8 sps:$4 sm:$0xff]   ;;  %v5097_v3 = vld [vmem:[#allocation5 + $0xa0] ss:$8 sps:$4 sm:$0xff]  }
  0x74   :  { %v5100_v4 = vld [vmem:[#allocation5 + $0x1a0] ss:$8 sps:$4 sm:$0xff]  }
  0x76   :  { %536 = vmatpush2.bf16.msra.mxu0 %v5017_v5  ;;  %577 = vmatpush2.bf16.msra.mxu1 %v5018_v7  ;;  %v5105_v5 = vld [vmem:[#allocation5 + $0x94] ss:$8 sps:$4 sm:$0xff]   ;;  %v5103_v7 = vld [vmem:[#allocation5 + $0x90] ss:$8 sps:$4 sm:$0xff]  }
  0x77   :  { %991 = vmatprep.subr.bf16.mxu0 %v5021_v8  ;;  %1032 = vmatprep.subr.bf16.mxu1 %v5024_v9  ;;  %v5106_v8 = vld [vmem:[#allocation5 + $0x190] ss:$8 sps:$4 sm:$0xff]   ;;  %v5111_v9 = vld [vmem:[#allocation5 + $0x84] ss:$8 sps:$4 sm:$0xff]  }
  0x79   :  { %538 = vmatmul.mubr.bf16.vlgmr.msra.gmra.mxu0 %v161_v10  ;;  %579 = vmatmul.mubr.bf16.vlgmr.msra.gmra.mxu1 %v161_v10  ;;  %v5114_v10 = vld [vmem:[#allocation5 + $0x184] ss:$8 sps:$4 sm:$0xff]  }
  0x7a   :  { %992 = vmatpush1.bf16.msra.mxu0 %v5019_v11  ;;  %1033 = vmatpush1.bf16.msra.mxu1 %v5022_v12  ;;  %v5109_v11 = vld [vmem:[#allocation5 + $0x80] ss:$8 sps:$4 sm:$0xff]  }
  0x7b   :  { %993 = vmatprep.subr.bf16.mxu0 %v5027_v13  ;;  %1034 = vmatprep.subr.bf16.mxu1 %v5030_v14  ;;  %v5112_v12 = vld [vmem:[#allocation5 + $0x180] ss:$8 sps:$4 sm:$0xff]   ;;  %v5379_v13 = vsub.s32 2, %v5365_v40 }
  0x7c   :  { %v163_v14 = vld [vmem:[%s5866_s1] sm:$0xf] }
  0x7e   :  { %994 = vmatpush1.bf16.msra.mxu0 %v5025_v15  ;;  %1035 = vmatpush1.bf16.msra.mxu1 %v5028_v16  ;;  %v5385_v15 = vsub.s32 3, %v5365_v40  ;;  %v488_v16 = vrot.slane %v163_v14, %v5375_v1 }
  0x7f   :  { %995 = vmatprep.subr.bf16.mxu0 %v5033_v17  ;;  %1036 = vmatprep.subr.bf16.mxu1 %v5036_v18  ;;  %v496_v17 = vrot.slane %v163_v14, %v5379_v13  ;;  %v492_v18 = vrot.slane %v163_v14, %v5368_v46 }
  0x82   :  { %996 = vmatpush1.bf16.msra.mxu0 %v5031_v19  ;;  %1037 = vmatpush1.bf16.msra.mxu1 %v5034_v20  ;;  %v500_v19 = vrot.slane %v163_v14, %v5385_v15  ;;  %v5409_v14 = vld [vmem:[%s5866_s1 + $0x8] sm:$0x3] }
  0x83   :  { %997 = vmatprep.subr.bf16.mxu0 %v5039_v21  ;;  %1038 = vmatprep.subr.bf16.mxu1 %v5042_v22 }
  0x86   :  { %998 = vmatpush1.bf16.msra.mxu0 %v5037_v23  ;;  %1039 = vmatpush1.bf16.msra.mxu1 %v5040_v24 }
  0x87   :  { %999 = vmatprep.subr.bf16.mxu0 %v5045_v25  ;;  %1040 = vmatprep.subr.bf16.mxu1 %v5048_v26 }
  0x8a   :  { %1000 = vmatpush1.bf16.msra.mxu0 %v5043_v27  ;;  %1041 = vmatpush1.bf16.msra.mxu1 %v5046_v28 }
  0x8b   :  { %1001 = vmatprep.subr.bf16.mxu0 %v5051_v29  ;;  %1042 = vmatprep.subr.bf16.mxu1 %v5054_v30 }
  0x8e   :  { %1002 = vmatpush1.bf16.msra.mxu0 %v5049_v31  ;;  %1043 = vmatpush1.bf16.msra.mxu1 %v5052_v32 }
  0x8f   :  { %1003 = vmatprep.subr.bf16.mxu0 %v5057_v33  ;;  %1044 = vmatprep.subr.bf16.mxu1 %v5060_v34 }
  0x92   :  { %1004 = vmatpush1.bf16.msra.mxu0 %v5055_v35  ;;  %1045 = vmatpush1.bf16.msra.mxu1 %v5058_v37 }
  0x93   :  { %1005 = vmatprep.subr.bf16.mxu0 %v5063_v38  ;;  %1046 = vmatprep.subr.bf16.mxu1 %v5066_v39 }
  0x96   :  { %1006 = vmatpush1.bf16.msra.mxu0 %v5061_v41  ;;  %1047 = vmatpush1.bf16.msra.mxu1 %v5064_v42  ;;  %v659_v42 = vld [vmem:[%s5866_s1 + $0x4] sm:$0x3] }
  0x97   :  { %1007 = vmatprep.subr.bf16.mxu0 %v5069_v43  ;;  %1048 = vmatprep.subr.bf16.mxu1 %v5072_v44  ;;  %v984_v43 = vrot.slane %v659_v42, %v5375_v1  ;;  %v988_v44 = vrot.slane %v659_v42, %v5368_v46  ;;  %v5118_v42 = vld [vmem:[#allocation7] sm:$0xff]  }
  0x9a   :  { %1008 = vmatpush2.bf16.msra.mxu0 %v5067_v45  ;;  %1049 = vmatpush2.bf16.msra.mxu1 %v5070_v47 }
  0x9b   :  { %1009 = vmatprep.subr.bf16.mxu0 %v5075_v48  ;;  %1050 = vmatprep.subr.bf16.mxu1 %v5078_v49 }
  0x9e   :  { %1010 = vmatpush2.bf16.msra.mxu0 %v5073_v50  ;;  %1051 = vmatpush2.bf16.msra.mxu1 %v5076_v51 }
  0x9f   :  { %1011 = vmatprep.subr.bf16.mxu0 %v5081_v52  ;;  %1052 = vmatprep.subr.bf16.mxu1 %v5084_v53 }
  0xa2   :  { %1012 = vmatpush2.bf16.msra.mxu0 %v5079_v54  ;;  %1053 = vmatpush2.bf16.msra.mxu1 %v5082_v55 }
  0xa3   :  { %1013 = vmatprep.subr.bf16.mxu0 %v5087_v56  ;;  %1054 = vmatprep.subr.bf16.mxu1 %v5090_v57 }
  0xa6   :  { %1014 = vmatpush2.bf16.msra.mxu0 %v5085_v58  ;;  %1055 = vmatpush2.bf16.msra.mxu1 %v5088_v59 }
  0xa7   :  { %1015 = vmatprep.subr.bf16.mxu0 %v5093_v60  ;;  %1056 = vmatprep.subr.bf16.mxu1 %v5096_v61 }
  0xaa   :  { %1016 = vmatpush2.bf16.msra.mxu0 %v5091_v62  ;;  %1057 = vmatpush2.bf16.msra.mxu1 %v5094_v63 }
  0xab   :  { %1017 = vmatprep.subr.bf16.mxu0 %v5099_v0  ;;  %1058 = vmatprep.subr.bf16.mxu1 %v5102_v2 }
  0xae   :  { %1018 = vmatpush2.bf16.msra.mxu0 %v5097_v3  ;;  %1059 = vmatpush2.bf16.msra.mxu1 %v5100_v4 }
  0xaf   :  { %1019 = vmatprep.subr.bf16.mxu0 %v5105_v5  ;;  %1060 = vmatprep.subr.bf16.mxu1 %v5108_v6 }
  0xb2   :  { %1020 = vmatpush2.bf16.msra.mxu0 %v5103_v7  ;;  %1061 = vmatpush2.bf16.msra.mxu1 %v5106_v8 }
  0xb3   :  { %1021 = vmatprep.subr.bf16.mxu0 %v5111_v9  ;;  %1062 = vmatprep.subr.bf16.mxu1 %v5114_v10 }
  0xb6   :  { %1022 = vmatpush2.bf16.msra.mxu0 %v5109_v11  ;;  %1063 = vmatpush2.bf16.msra.mxu1 %v5112_v12 }
 0x139   :  { %v539_v20 = vpop.f32.mrf.mxu0  ;;  %v580_v21 = vpop.f32.mrf.mxu1 }
 0x13a   :  { %v540_v22 = vadd.f32 %v539_v20, %v488_v16  ;;  %v581_v23 = vadd.f32 %v580_v21, %v496_v17  ;;  %v1124_v16 = vrot.slane %v5409_v14, %v5375_v1 }
 0x13b   :  { %v541_v24 = vpop.f32.mrf.mxu0  ;;  %v582_v25 = vpop.f32.mrf.mxu1 }
 0x13c   :  { %v589_v26 = vmax.f32 %v581_v23, 0.0  ;;  %v542_v27 = vadd.f32 %v541_v24, %v492_v18  ;;  %v583_v28 = vadd.f32 %v582_v25, %v500_v19  ;;  %v587_v29 = vmax.f32 %v540_v22, 0.0 }
 0x13d   :  { %v543_v30 = vpop.f32.mrf.mxu0  ;;  %v584_v31 = vpop.f32.mrf.mxu1 }
 0x13e   :  { %v588_v32 = vmax.f32 %v542_v27, 0.0  ;;  %v590_v33 = vmax.f32 %v583_v28, 0.0  ;;  %v657_v34 = vpack.c.bf16 %v589_v26, %v589_v26  ;;  %v655_v41 = vpack.c.bf16 %v587_v29, %v587_v29  ;;  %v5115_v27 = vld [vmem:[#allocation7 + $0x18] sm:$0xff]  }
 0x13f   :  { %v544_v35 = vpop.f32.mrf.mxu0  ;;  %v585_v37 = vpop.f32.mrf.mxu1  ;;  %v5298_v28 = vmov 0.0  }
 0x140   :  { %v656_v38 = vpack.c.bf16 %v588_v32, %v588_v32  ;;  %v658_v39 = vpack.c.bf16 %v590_v33, %v590_v33  ;;  %4800 = vmatprep.subr.bf16.mxu0 %v5298_v28  ;;  %v5116_v35 = vld [vmem:[#allocation7 + $0x10] sm:$0xff]   ;;  %v5117_v37 = vld [vmem:[#allocation7 + $0x8] sm:$0xff]  }
 0x142   :  { %1023 = vmatprep.mubr.bf16.mxu0 %v656_v38  ;;  %1064 = vmatprep.mubr.bf16.mxu1 %v658_v39  ;;  %v5430_v39 = vld [vmem:[%s5866_s1 + $0x6] sm:$0x3] }
 0x143   :  { %1024 = vmatmul.mubr.bf16.vlgmr.msra.gmra.mxu0 %v655_v41  ;;  %1065 = vmatmul.mubr.bf16.vlgmr.msra.gmra.mxu1 %v657_v34 }
 0x144   :  { %4801 = vmatpush3.bf16.msra.mxu0 %v5115_v27  ;;  %4808 = vmatprep.mubr.msk.bf16.mxu0 %vm5299_vm1, %v5298_v28 }
 0x145   :  { %4802 = vmatprep.subr.bf16.mxu0 %v5298_v28 }
 0x148   :  { %4803 = vmatpush3.bf16.msra.mxu0 %v5116_v35 }
 0x149   :  { %4804 = vmatprep.subr.bf16.mxu0 %v5298_v28 }
 0x14c   :  { %4805 = vmatpush3.bf16.msra.mxu0 %v5117_v37 }
 0x14d   :  { %4806 = vmatprep.subr.bf16.mxu0 %v5298_v28 }
 0x150   :  { %4807 = vmatpush3.bf16.msra.mxu0 %v5118_v42 }
 0x203   :  { %v1025_v45 = vpop.f32.mrf.mxu0  ;;  %v1066_v47 = vpop.f32.mrf.mxu1 }
 0x204   :  { %v1026_v48 = vadd.f32 %v1025_v45, %v984_v43 }
 0x205   :  { %v1027_v49 = vpop.f32.mrf.mxu0  ;;  %v1068_v50 = vpop.f32.mrf.mxu1 }
 0x206   :  { %v1067_v51 = vadd.f32 %v1066_v47, %v1026_v48  ;;  %v1028_v52 = vadd.f32 %v1027_v49, %v988_v44  ;;  %v5436_v44 = vrot.slane %v5430_v39, %v5368_v46  ;;  %v5441_v48 = vrot.slane %v5409_v14, %v5368_v46 }
 0x207   :  { %v1029_v53 = vpop.f32.mrf.mxu0  ;;  %v1070_v54 = vpop.f32.mrf.mxu1 }
 0x208   :  { %1094 = vrot.lane.b32.xlu0 %v1067_v51, %s5294_s21  ;;  %v1069_v57 = vadd.f32 %v1068_v50, %v1028_v52  ;;  %v1076_v7 = vsel %vm1075_vm0, %v1067_v51, 0.0  ;;  %v1490_v50 = vld [vmem:[#allocation8 + $0x700] sm:$0xff]  ;;  %v5446_v52 = vld [vmem:[#allocation8 + $0x708] sm:$0xff] }
 0x209   :  { %v1030_v55 = vpop.f32.mrf.mxu0  ;;  %v1071_v56 = vpop.f32.mrf.mxu1 }
 0x20a   :  { %v1129_v8 = vsel %vm1075_vm0, %v1069_v57, 0.0  ;;  %v5451_v55 = vld [vmem:[#allocation8 + $0x788] sm:$0xff]  ;;  %v1458_v56 = vld [vmem:[#allocation8 + $0x600] sm:$0xff] }
 0x20c   :  { %1157 = vrot.lane.b32.xlu0 %v1069_v57, %s5294_s21 }
 0x27a   :  { %v1095_v58 = vpop.permute.xlu0 %1094 }
 0x27b   :  { %v1097_v59 = vsel %vm1075_vm0, %v1095_v58, 0.0  ;;  %v4684_v58 = vcombine.low %v5446_v52, %v5451_v55 }
 0x27c   :  { %1098 = vadd.xlane.f32.xlu1 %v1097_v59  ;;  %v4685_v59 = vcombine.high %v5446_v52, %v5451_v55 }
 0x27e   :  { %v1158_v60 = vpop.permute.xlu0 %1157  ;;  %3012 = vmatprep.subr.bf16.mxu0 %v4685_v59  ;;  %v1395_v59 = vld [vmem:[#allocation8 + $0x408] sm:$0xff] }
 0x27f   :  { %v1160_v61 = vsel %vm1075_vm0, %v1158_v60, 0.0 }
 0x280   :  { %1161 = vadd.xlane.f32.xlu1 %v1160_v61  ;;  %v1426_v61 = vld [vmem:[#allocation8 + $0x500] sm:$0xff] }
 0x305   :  { %v1099_v62 = vpop.xlane.xlu1 %1098 }
 0x306   :  { %v1100_v63 = vmul.f32 0.015625, %v1099_v62  ;;  %v1442_v62 = vld [vmem:[#allocation8 + $0x580] sm:$0xff] }
 0x308   :  { %v1101_v0 = vsub.f32 %v1067_v51, %v1100_v63 }
 0x309   :  { %v1162_v2 = vpop.xlane.xlu1 %1161 }
 0x30a   :  { %v1163_v3 = vmul.f32 0.015625, %v1162_v2  ;;  %v1102_v4 = vmul.f32 %v1101_v0, %v1101_v0  ;;  %v1394_v2 = vld [vmem:[#allocation8 + $0x400] sm:$0xff] }
 0x30c   :  { %v1164_v5 = vsub.f32 %v1069_v57, %v1163_v3  ;;  %1104 = vrot.lane.b32.xlu0 %v1102_v4, %s5294_s21  ;;  %v1410_v3 = vld [vmem:[#allocation8 + $0x480] sm:$0xff]  ;;  %v4618_v4 = vcombine.low %v1426_v61, %v1442_v62 }
 0x30e   :  { %v1165_v6 = vmul.f32 %v1164_v5, %v1164_v5 }
 0x310   :  { %1167 = vrot.lane.b32.xlu1 %v1165_v6, %s5294_s21  ;;  %v1362_v6 = vld [vmem:[#allocation8 + $0x300] sm:$0xff] }
 0x32b   :  { %1077 = vadd.xlane.f32.xlu0 %v1076_v7  ;;  %v1378_v7 = vld [vmem:[#allocation8 + $0x380] sm:$0xff] }
 0x334   :  { %1130 = vadd.xlane.f32.xlu1 %v1129_v8  ;;  %v4586_v8 = vcombine.low %v1394_v2, %v1410_v3 }
 0x345   :  { %1125 = vrot.lane.b32.xlu1 %v1124_v16, %s5294_s21 }
 0x37e   :  { %v1105_v9 = vpop.permute.xlu0 %1104 }
 0x37f   :  { %v1107_v10 = vsel %vm1075_vm0, %v1105_v9, 0.0  ;;  %v4555_v9 = vcombine.high %v1362_v6, %v1378_v7 }
 0x380   :  { %1108 = vadd.xlane.f32.xlu0 %v1107_v10  ;;  %v1330_v10 = vld [vmem:[#allocation8 + $0x200] sm:$0xff] }
 0x382   :  { %v1168_v11 = vpop.permute.xlu1 %1167 }
 0x383   :  { %v1170_v12 = vsel %vm1075_vm0, %v1168_v11, 0.0  ;;  %v1346_v11 = vld [vmem:[#allocation8 + $0x280] sm:$0xff] }
 0x384   :  { %1171 = vadd.xlane.f32.xlu0 %v1170_v12  ;;  %v4554_v12 = vcombine.low %v1362_v6, %v1378_v7  ;;  %v4523_v16 = vcombine.high %v1330_v10, %v1346_v11  ;;  %v1315_v6 = vld [vmem:[#allocation8 + $0x188] sm:$0xff] }
 0x3b4   :  { %v1078_v17 = vpop.xlane.xlu0 %1077 }
 0x3b5   :  { %v1080_v18 = vmul.f32 0.015625, %v1078_v17  ;;  %v1298_v17 = vld [vmem:[#allocation8 + $0x100] sm:$0xff] }
 0x3b7   :  { %v5414_v19 = vsub.f32 %v1067_v51, %v1080_v18  ;;  %v1506_v51 = vld [vmem:[#allocation8 + $0x780] sm:$0xff] }
 0x3b8   :  { %v4682_v53 = vcombine.low %v1490_v50, %v1506_v51  ;;  %v4683_v54 = vcombine.high %v1490_v50, %v1506_v51  ;;  %v1314_v18 = vld [vmem:[#allocation8 + $0x180] sm:$0xff] }
 0x3b9   :  { %v1082_v20 = vmul.f32 %v5414_v19, %v5414_v19 }
 0x3ba   :  { %2971 = vmatprep.subr.bf16.mxu1 %v4683_v54  ;;  %v1475_v54 = vld [vmem:[#allocation8 + $0x688] sm:$0xff] }
 0x3bb   :  { %v1083_v21 = vsel %vm1075_vm0, %v1082_v20, 0.0  ;;  %2972 = vmatpush1.bf16.msra.mxu1 %v4682_v53  ;;  %v4522_v20 = vcombine.low %v1330_v10, %v1346_v11  ;;  %v1266_v10 = vld [vmem:[#allocation8] sm:$0xff] }
 0x3bc   :  { %1084 = vadd.xlane.f32.xlu0 %v1083_v21  ;;  %v4491_v21 = vcombine.high %v1298_v17, %v1314_v18  ;;  %v1282_v11 = vld [vmem:[#allocation8 + $0x80] sm:$0xff] }
 0x3bd   :  { %v1131_v22 = vpop.xlane.xlu1 %1130 }
 0x3be   :  { %v1132_v23 = vmul.f32 0.015625, %v1131_v22  ;;  %v4490_v22 = vcombine.low %v1298_v17, %v1314_v18  ;;  %v1283_v17 = vld [vmem:[#allocation8 + $0x88] sm:$0xff]  ;;  %v4458_v18 = vcombine.low %v1266_v10, %v1282_v11 }
 0x3c0   :  { %v5419_v24 = vsub.f32 %v1069_v57, %v1132_v23  ;;  %v1474_v57 = vld [vmem:[#allocation8 + $0x680] sm:$0xff] }
 0x3c1   :  { %v4651_v60 = vcombine.high %v1458_v56, %v1474_v57  ;;  %v4650_v63 = vcombine.low %v1458_v56, %v1474_v57  ;;  %v1126_v42 = vpop.permute.xlu1 %1125  ;;  %v1427_v56 = vld [vmem:[#allocation8 + $0x508] sm:$0xff] }
 0x3c2   :  { %v1134_v25 = vmul.f32 %v5419_v24, %v5419_v24  ;;  %v1443_v57 = vld [vmem:[#allocation8 + $0x588] sm:$0xff] }
 0x3c3   :  { %2973 = vmatprep.subr.bf16.mxu1 %v4651_v60  ;;  %v1411_v60 = vld [vmem:[#allocation8 + $0x488] sm:$0xff] }
 0x3c4   :  { %v1135_v26 = vsel %vm1075_vm0, %v1134_v25, 0.0  ;;  %2974 = vmatpush1.bf16.msra.mxu1 %v4650_v63  ;;  %v1363_v63 = vld [vmem:[#allocation8 + $0x308] sm:$0xff] }
 0x3c5   :  { %1136 = vadd.xlane.f32.xlu0 %v1135_v26 }
 0x409   :  { %v1109_v29 = vpop.xlane.xlu0 %1108 }
 0x40a   :  { %v1110_v30 = vmul.f32 0.015625, %v1109_v29 }
 0x40c   :  { %v1111_v31 = vadd.f32 1e-05, %v1110_v30 }
 0x40d   :  { %v1172_v32 = vpop.xlane.xlu0 %1171 }
 0x40e   :  { %5155 = vrsqrt.f32 %v1111_v31  ;;  %v1173_v33 = vmul.f32 0.015625, %v1172_v32 }
 0x410   :  { %v1174_v34 = vadd.f32 1e-05, %v1173_v33 }
 0x412   :  { %5157 = vrsqrt.f32 %v1174_v34 }
 0x41b   :  { %v5156_v38 = vpop.eup %5155 }
 0x41c   :  { %v1113_v41 = vmul.f32 %v5156_v38, %v1101_v0  ;;  %v4619_v0 = vcombine.high %v1426_v61, %v1442_v62  ;;  %v4620_v61 = vcombine.low %v1427_v56, %v1443_v57  ;;  %v4589_v62 = vcombine.high %v1395_v59, %v1411_v60 }
 0x41e   :  { %v1114_v43 = vmul.f32 %v1113_v41, %v5430_v39  ;;  %2975 = vmatprep.subr.bf16.mxu1 %v4619_v0  ;;  %v1379_v0 = vld [vmem:[#allocation8 + $0x388] sm:$0xff] }
 0x41f   :  { %v5158_v45 = vpop.eup %5157  ;;  %2976 = vmatpush1.bf16.msra.mxu1 %v4618_v4  ;;  %v1331_v4 = vld [vmem:[#allocation8 + $0x208] sm:$0xff]  ;;  %v4556_v52 = vcombine.low %v1363_v63, %v1379_v0 }
 0x420   :  { %1116 = vrot.lane.b32.xlu0 %v1114_v43, %s5294_s21  ;;  %v1176_v47 = vmul.f32 %v5158_v45, %v1164_v5  ;;  %v4587_v5 = vcombine.high %v1394_v2, %v1410_v3  ;;  %v4588_v2 = vcombine.low %v1395_v59, %v1411_v60  ;;  %v4557_v3 = vcombine.high %v1363_v63, %v1379_v0  ;;  %v1396_v60 = vld [vmem:[#allocation8 + $0x410] sm:$0xff]  ;;  %v1413_v63 = vld [vmem:[#allocation8 + $0x498] sm:$0xff] }
 0x422   :  { %v1177_v49 = vmul.f32 %v1176_v47, %v5436_v44  ;;  %2977 = vmatprep.subr.bf16.mxu1 %v4587_v5  ;;  %v1347_v5 = vld [vmem:[#allocation8 + $0x288] sm:$0xff] }
 0x423   :  { %2978 = vmatpush1.bf16.msra.mxu1 %v4586_v8  ;;  %v4525_v55 = vcombine.high %v1331_v4, %v1347_v5  ;;  %v4524_v7 = vcombine.low %v1331_v4, %v1347_v5  ;;  %v1364_v5 = vld [vmem:[#allocation8 + $0x310] sm:$0xff] }
 0x424   :  { %1179 = vrot.lane.b32.xlu1 %v1177_v49, %s5294_s21  ;;  %1183 = vrot.lane.b32.xlu0 %v5441_v48, %s5294_s21 }
 0x425   :  { %2979 = vmatprep.subr.bf16.mxu1 %v4555_v9 }
 0x427   :  { %2980 = vmatpush1.bf16.msra.mxu1 %v4554_v12  ;;  %v1267_v12 = vld [vmem:[#allocation8 + $0x8] sm:$0xff] }
 0x428   :  { %2981 = vmatprep.subr.bf16.mxu1 %v4523_v16  ;;  %v4459_v16 = vcombine.high %v1266_v10, %v1282_v11  ;;  %v1332_v10 = vld [vmem:[#allocation8 + $0x210] sm:$0xff] }
 0x429   :  { %v1348_v11 = vld [vmem:[#allocation8 + $0x290] sm:$0xff] }
 0x42b   :  { %2982 = vmatpush1.bf16.msra.mxu1 %v4522_v20  ;;  %v4460_v20 = vcombine.low %v1267_v12, %v1283_v17 }
 0x42c   :  { %2983 = vmatprep.subr.bf16.mxu1 %v4491_v21  ;;  %v4461_v21 = vcombine.high %v1267_v12, %v1283_v17  ;;  %v1333_v12 = vld [vmem:[#allocation8 + $0x218] sm:$0xff] }
 0x42f   :  { %2984 = vmatpush1.bf16.msra.mxu1 %v4490_v22  ;;  %v1492_v22 = vld [vmem:[#allocation8 + $0x710] sm:$0xff] }
 0x430   :  { %2985 = vmatprep.subr.bf16.mxu1 %v4459_v16  ;;  %v1349_v16 = vld [vmem:[#allocation8 + $0x298] sm:$0xff] }
 0x433   :  { %2986 = vmatpush1.bf16.msra.mxu1 %v4458_v18 }
 0x445   :  { %v1085_v23 = vpop.xlane.xlu0 %1084 }
 0x446   :  { %v1086_v25 = vmul.f32 0.015625, %v1085_v23  ;;  %v1508_v23 = vld [vmem:[#allocation8 + $0x790] sm:$0xff] }
 0x448   :  { %v1087_v26 = vadd.f32 1e-05, %v1086_v25  ;;  %v1493_v25 = vld [vmem:[#allocation8 + $0x718] sm:$0xff] }
 0x44a   :  { %5159 = vrsqrt.f32 %v1087_v26  ;;  %v4687_v26 = vcombine.high %v1492_v22, %v1508_v23 }
 0x44c   :  { %3053 = vmatprep.subr.bf16.mxu1 %v4687_v26  ;;  %v1317_v26 = vld [vmem:[#allocation8 + $0x198] sm:$0xff] }
 0x44e   :  { %v1137_v27 = vpop.xlane.xlu0 %1136 }
 0x44f   :  { %v1138_v29 = vmul.f32 0.015625, %v1137_v27  ;;  %v1509_v27 = vld [vmem:[#allocation8 + $0x798] sm:$0xff] }
 0x451   :  { %v1139_v30 = vadd.f32 1e-05, %v1138_v29  ;;  %v4686_v29 = vcombine.low %v1492_v22, %v1508_v23  ;;  %v1300_v22 = vld [vmem:[#allocation8 + $0x110] sm:$0xff] }
 0x452   :  { %v1316_v23 = vld [vmem:[#allocation8 + $0x190] sm:$0xff] }
 0x453   :  { %5161 = vrsqrt.f32 %v1139_v30  ;;  %v4688_v30 = vcombine.low %v1493_v25, %v1509_v27 }
 0x457   :  { %v5160_v31 = vpop.eup %5159 }
 0x458   :  { %v1089_v32 = vmul.f32 %v5160_v31, %v5414_v19  ;;  %v1459_v19 = vld [vmem:[#allocation8 + $0x608] sm:$0xff]  ;;  %v4689_v31 = vcombine.high %v1493_v25, %v1509_v27  ;;  %v1301_v25 = vld [vmem:[#allocation8 + $0x118] sm:$0xff]  ;;  %v4526_v27 = vcombine.low %v1332_v10, %v1348_v11 }
 0x45a   :  { %v1090_v33 = vmul.f32 %v1089_v32, %v5430_v39  ;;  %v5300_v32 = vmov 0  }
 0x45b   :  { %3003 = vmatprep.mubr.bf16.mxu1 %v5300_v32 }
 0x45c   :  { %v1092_v35 = vadd.f32 %v1090_v33, %v5409_v14  ;;  %v1196_v33 = vld [vmem:[%s5866_s1 + $0xa] sm:$0x1] }
 0x460   :  { %v5162_v34 = vpop.eup %5161 }
 0x461   :  { %v1141_v37 = vmul.f32 %v5162_v34, %v5419_v24  ;;  %v4653_v24 = vcombine.high %v1459_v19, %v1475_v54 }
 0x463   :  { %v1148_v45 = vmul.f32 %v5436_v44, %v1141_v37  ;;  %v4652_v44 = vcombine.low %v1459_v19, %v1475_v54  ;;  %v1460_v37 = vld [vmem:[#allocation8 + $0x610] sm:$0xff] }
 0x464   :  { %v1444_v54 = vld [vmem:[#allocation8 + $0x590] sm:$0xff] }
 0x492   :  { %v1117_v38 = vpop.permute.xlu0 %1116 }
 0x493   :  { %v1119_v41 = vadd.f32 %v1117_v38, %v1092_v35 }
 0x495   :  { %v1128_v43 = vadd.f32 %v1126_v42, %v1119_v41  ;;  %v1476_v41 = vld [vmem:[#allocation8 + $0x690] sm:$0xff]  ;;  %v1461_v42 = vld [vmem:[#allocation8 + $0x618] sm:$0xff] }
 0x496   :  { %v1180_v50 = vpop.permute.xlu1 %1179  ;;  %v1184_v51 = vpop.permute.xlu0 %1183 }
 0x497   :  { %v1149_v47 = vadd.f32 %v1148_v45, %v1128_v43  ;;  %v1477_v43 = vld [vmem:[#allocation8 + $0x698] sm:$0xff] }
 0x499   :  { %v1155_v49 = vadd.f32 %v5441_v48, %v1149_v47  ;;  %v4621_v48 = vcombine.high %v1427_v56, %v1443_v57  ;;  %v1445_v56 = vld [vmem:[#allocation8 + $0x598] sm:$0xff]  ;;  %v4654_v57 = vcombine.low %v1460_v37, %v1476_v41 }
 0x49b   :  { %v1182_v53 = vadd.f32 %v1180_v50, %v1155_v49  ;;  %v4655_v50 = vcombine.high %v1460_v37, %v1476_v41  ;;  %v1285_v37 = vld [vmem:[#allocation8 + $0x98] sm:$0xff]  ;;  %v4496_v41 = vcombine.low %v1301_v25, %v1317_v26 }
 0x49d   :  { %v5463_v39 = vadd.f32 %v1184_v51, %v1182_v53  ;;  %v4657_v51 = vcombine.high %v1461_v42, %v1477_v43  ;;  %v1428_v53 = vld [vmem:[#allocation8 + $0x510] sm:$0xff] }
 0x49e   :  { %v4622_v0 = vcombine.low %v1428_v53, %v1444_v54 }
 0x49f   :  { %v5467_v14 = vpack.c.bf16 %v5463_v39, %v5463_v39 }
 0x4a1   :  { %4809 = vmatmul.mubr.msk.bf16.vlgmr.msra.gmra.mxu0 %vm1221_vm2, %v5467_v14 }
 0x4a2   :  { %3013 = vmatpush1.bf16.msra.mxu0 %v4684_v58  ;;  %v1299_v58 = vld [vmem:[#allocation8 + $0x108] sm:$0xff]  ;;  %3044 = vmatprep.mubr.bf16.mxu0 %v5300_v32 }
 0x4a3   :  { %3014 = vmatprep.subr.bf16.mxu0 %v4653_v24  ;;  %v4493_v8 = vcombine.high %v1299_v58, %v1315_v6  ;;  %v4492_v9 = vcombine.low %v1299_v58, %v1315_v6  ;;  %v1429_v24 = vld [vmem:[#allocation8 + $0x518] sm:$0xff] }
 0x4a4   :  { %v4625_v59 = vcombine.high %v1429_v24, %v1445_v56  ;;  %v1381_v58 = vld [vmem:[#allocation8 + $0x398] sm:$0xff] }
 0x4a6   :  { %3015 = vmatpush1.bf16.msra.mxu0 %v4652_v44  ;;  %v4656_v44 = vcombine.low %v1461_v42, %v1477_v43 }
 0x4a7   :  { %3016 = vmatprep.subr.bf16.mxu0 %v4621_v48  ;;  %v4623_v48 = vcombine.high %v1428_v53, %v1444_v54 }
 0x4aa   :  { %3017 = vmatpush1.bf16.msra.mxu0 %v4620_v61  ;;  %v1412_v61 = vld [vmem:[#allocation8 + $0x490] sm:$0xff] }
 0x4ab   :  { %3018 = vmatprep.subr.bf16.mxu0 %v4589_v62  ;;  %v1397_v62 = vld [vmem:[#allocation8 + $0x418] sm:$0xff]  ;;  %v4590_v6 = vcombine.low %v1396_v60, %v1412_v61 }
 0x4ac   :  { %v4593_v4 = vcombine.high %v1397_v62, %v1413_v63 }
 0x4ae   :  { %3019 = vmatpush1.bf16.msra.mxu0 %v4588_v2  ;;  %v4624_v2 = vcombine.low %v1429_v24, %v1445_v56  ;;  %v1462_v56 = vld [vmem:[#allocation8 + $0x620] sm:$0xff] }
 0x4af   :  { %3020 = vmatprep.subr.bf16.mxu0 %v4557_v3  ;;  %v4591_v3 = vcombine.high %v1396_v60, %v1412_v61 }
 0x4b2   :  { %3021 = vmatpush1.bf16.msra.mxu0 %v4556_v52  ;;  %v1380_v52 = vld [vmem:[#allocation8 + $0x390] sm:$0xff] }
 0x4b3   :  { %3022 = vmatprep.subr.bf16.mxu0 %v4525_v55  ;;  %v1365_v55 = vld [vmem:[#allocation8 + $0x318] sm:$0xff]  ;;  %v4558_v17 = vcombine.low %v1364_v5, %v1380_v52 }
 0x4b4   :  { %v4560_v18 = vcombine.low %v1365_v55, %v1381_v58 }
 0x4b6   :  { %3023 = vmatpush1.bf16.msra.mxu0 %v4524_v7  ;;  %v4592_v7 = vcombine.low %v1397_v62, %v1413_v63  ;;  %v1430_v63 = vld [vmem:[#allocation8 + $0x520] sm:$0xff] }
 0x4b7   :  { %3024 = vmatprep.subr.bf16.mxu0 %v4493_v8  ;;  %v4559_v8 = vcombine.high %v1364_v5, %v1380_v52 }
 0x4ba   :  { %3025 = vmatpush1.bf16.msra.mxu0 %v4492_v9  ;;  %v4561_v9 = vcombine.high %v1365_v55, %v1381_v58  ;;  %v1398_v58 = vld [vmem:[#allocation8 + $0x420] sm:$0xff] }
 0x4bb   :  { %3026 = vmatprep.subr.bf16.mxu0 %v4461_v21  ;;  %v4529_v21 = vcombine.high %v1333_v12, %v1349_v16 }
 0x4be   :  { %3027 = vmatpush1.bf16.msra.mxu0 %v4460_v20  ;;  %v4527_v20 = vcombine.high %v1332_v10, %v1348_v11 }
 0x4bf   :  { %3094 = vmatprep.subr.bf16.mxu0 %v4689_v31  ;;  %v4497_v31 = vcombine.high %v1301_v25, %v1317_v26  ;;  %v1334_v26 = vld [vmem:[#allocation8 + $0x220] sm:$0xff] }
 0x561   :  { %v1259_v34 = vpop.f32.mrf.mxu0 }
 0x562   :  { %v1260_v35 = vadd.f32 %v1259_v34, %v1196_v33  ;;  %v1268_v33 = vld [vmem:[#allocation8 + $0x10] sm:$0xff] }
 0x563   :  { %v4810_v38 = vpop.f32.mrf.mxu0  ;;  %v1284_v34 = vld [vmem:[#allocation8 + $0x90] sm:$0xff] }
 0x564   :  { %v1265_v45 = vmax.f32 %v1260_v35, 0.0  ;;  %v1269_v35 = vld [vmem:[#allocation8 + $0x18] sm:$0xff]  ;;  %v4494_v38 = vcombine.low %v1300_v22, %v1316_v23  ;;  %v4463_v42 = vcombine.high %v1268_v33, %v1284_v34  ;;  %v4462_v53 = vcombine.low %v1268_v33, %v1284_v34 }
 0x565   :  { %v1262_v47 = vpop.f32.mrf.mxu0  ;;  %v4465_v43 = vcombine.high %v1269_v35, %v1285_v37 }
 0x566   :  { %v5479_v49 = vpack.c.bf16 %v1265_v45, %v1265_v45  ;;  %v1494_v45 = vld [vmem:[#allocation8 + $0x720] sm:$0xff] }
 0x567   :  { %v4811_v19 = vpop.f32.mrf.mxu0  ;;  %v1510_v47 = vld [vmem:[#allocation8 + $0x7a0] sm:$0xff] }
 0x568   :  { %3004 = vmatmul.mubr.bf16.vlgmr.msra.gmra.mxu1 %v5479_v49  ;;  %3045 = vmatmul.mubr.bf16.vlgmr.msra.gmra.mxu0 %v5479_v49  ;;  %v4464_v19 = vcombine.low %v1269_v35, %v1285_v37  ;;  %v4691_v54 = vcombine.high %v1494_v45, %v1510_v47  ;;  %v1302_v37 = vld [vmem:[#allocation8 + $0x120] sm:$0xff] }
 0x569   :  { %3054 = vmatpush1.bf16.msra.mxu1 %v4686_v29  ;;  %3095 = vmatpush1.bf16.msra.mxu0 %v4688_v30  ;;  %v4528_v29 = vcombine.low %v1333_v12, %v1349_v16  ;;  %v4495_v30 = vcombine.high %v1300_v22, %v1316_v23  ;;  %v1366_v16 = vld [vmem:[#allocation8 + $0x320] sm:$0xff] }
 0x56a   :  { %3055 = vmatprep.subr.bf16.mxu1 %v4655_v50  ;;  %3096 = vmatprep.subr.bf16.mxu0 %v4657_v51  ;;  %v1495_v50 = vld [vmem:[#allocation8 + $0x728] sm:$0xff] }
 0x56b   :  { %3085 = vmatprep.mubr.bf16.mxu1 %v5300_v32  ;;  %3126 = vmatprep.mubr.bf16.mxu0 %v5300_v32  ;;  %v1511_v51 = vld [vmem:[#allocation8 + $0x7a8] sm:$0xff] }
 0x56c   :  { %v4693_v24 = vcombine.high %v1495_v50, %v1511_v51  ;;  %v4692_v60 = vcombine.low %v1495_v50, %v1511_v51  ;;  %v1270_v51 = vld [vmem:[#allocation8 + $0x20] sm:$0xff] }
 0x56d   :  { %3056 = vmatpush1.bf16.msra.mxu1 %v4654_v57  ;;  %3097 = vmatpush1.bf16.msra.mxu0 %v4656_v44  ;;  %v1478_v57 = vld [vmem:[#allocation8 + $0x6a0] sm:$0xff]  ;;  %v1463_v44 = vld [vmem:[#allocation8 + $0x628] sm:$0xff] }
 0x56e   :  { %3057 = vmatprep.subr.bf16.mxu1 %v4623_v48  ;;  %3098 = vmatprep.subr.bf16.mxu0 %v4625_v59  ;;  %v1479_v48 = vld [vmem:[#allocation8 + $0x6a8] sm:$0xff]  ;;  %v4690_v59 = vcombine.low %v1494_v45, %v1510_v47  ;;  %v4659_v61 = vcombine.high %v1462_v56, %v1478_v57 }
 0x56f   :  { %v4661_v62 = vcombine.high %v1463_v44, %v1479_v48  ;;  %v4660_v5 = vcombine.low %v1463_v44, %v1479_v48  ;;  %v1496_v48 = vld [vmem:[#allocation8 + $0x730] sm:$0xff] }
 0x571   :  { %3058 = vmatpush1.bf16.msra.mxu1 %v4622_v0  ;;  %3099 = vmatpush1.bf16.msra.mxu0 %v4624_v2  ;;  %v1446_v0 = vld [vmem:[#allocation8 + $0x5a0] sm:$0xff]  ;;  %v1431_v2 = vld [vmem:[#allocation8 + $0x528] sm:$0xff] }
 0x572   :  { %3059 = vmatprep.subr.bf16.mxu1 %v4591_v3  ;;  %3100 = vmatprep.subr.bf16.mxu0 %v4593_v4  ;;  %v1447_v3 = vld [vmem:[#allocation8 + $0x5a8] sm:$0xff]  ;;  %v4658_v4 = vcombine.low %v1462_v56, %v1478_v57  ;;  %v4627_v52 = vcombine.high %v1430_v63, %v1446_v0 }
 0x573   :  { %v4629_v55 = vcombine.high %v1431_v2, %v1447_v3  ;;  %v4628_v10 = vcombine.low %v1431_v2, %v1447_v3  ;;  %v1464_v3 = vld [vmem:[#allocation8 + $0x630] sm:$0xff] }
 0x575   :  { %3060 = vmatpush1.bf16.msra.mxu1 %v4590_v6  ;;  %3101 = vmatpush1.bf16.msra.mxu0 %v4592_v7  ;;  %v1414_v6 = vld [vmem:[#allocation8 + $0x4a0] sm:$0xff]  ;;  %v1399_v7 = vld [vmem:[#allocation8 + $0x428] sm:$0xff] }
 0x576   :  { %3061 = vmatprep.subr.bf16.mxu1 %v4559_v8  ;;  %3102 = vmatprep.subr.bf16.mxu0 %v4561_v9  ;;  %v1415_v8 = vld [vmem:[#allocation8 + $0x4a8] sm:$0xff]  ;;  %v4626_v9 = vcombine.low %v1430_v63, %v1446_v0  ;;  %v4595_v11 = vcombine.high %v1398_v58, %v1414_v6 }
 0x577   :  { %v4597_v12 = vcombine.high %v1399_v7, %v1415_v8  ;;  %v4596_v22 = vcombine.low %v1399_v7, %v1415_v8  ;;  %v1432_v8 = vld [vmem:[#allocation8 + $0x530] sm:$0xff] }
 0x579   :  { %3062 = vmatpush1.bf16.msra.mxu1 %v4558_v17  ;;  %3103 = vmatpush1.bf16.msra.mxu0 %v4560_v18  ;;  %v1382_v17 = vld [vmem:[#allocation8 + $0x3a0] sm:$0xff]  ;;  %v1367_v18 = vld [vmem:[#allocation8 + $0x328] sm:$0xff] }
 0x57a   :  { %3063 = vmatprep.subr.bf16.mxu1 %v4527_v20  ;;  %3104 = vmatprep.subr.bf16.mxu0 %v4529_v21  ;;  %v1383_v20 = vld [vmem:[#allocation8 + $0x3a8] sm:$0xff]  ;;  %v4594_v21 = vcombine.low %v1398_v58, %v1414_v6  ;;  %v4563_v23 = vcombine.high %v1366_v16, %v1382_v17 }
 0x57b   :  { %v4565_v25 = vcombine.high %v1367_v18, %v1383_v20  ;;  %v4564_v33 = vcombine.low %v1367_v18, %v1383_v20  ;;  %v1400_v20 = vld [vmem:[#allocation8 + $0x430] sm:$0xff] }
 0x57d   :  { %3064 = vmatpush1.bf16.msra.mxu1 %v4526_v27  ;;  %3105 = vmatpush1.bf16.msra.mxu0 %v4528_v29  ;;  %v1350_v27 = vld [vmem:[#allocation8 + $0x2a0] sm:$0xff]  ;;  %v1335_v29 = vld [vmem:[#allocation8 + $0x228] sm:$0xff] }
 0x57e   :  { %3065 = vmatprep.subr.bf16.mxu1 %v4495_v30  ;;  %3106 = vmatprep.subr.bf16.mxu0 %v4497_v31  ;;  %v1351_v30 = vld [vmem:[#allocation8 + $0x2a8] sm:$0xff]  ;;  %v4562_v31 = vcombine.low %v1366_v16, %v1382_v17  ;;  %v4531_v34 = vcombine.high %v1334_v26, %v1350_v27 }
 0x57f   :  { %v4533_v35 = vcombine.high %v1335_v29, %v1351_v30  ;;  %v4532_v45 = vcombine.low %v1335_v29, %v1351_v30  ;;  %v1368_v30 = vld [vmem:[#allocation8 + $0x330] sm:$0xff] }
 0x581   :  { %3066 = vmatpush1.bf16.msra.mxu1 %v4494_v38  ;;  %3107 = vmatpush1.bf16.msra.mxu0 %v4496_v41  ;;  %v1318_v38 = vld [vmem:[#allocation8 + $0x1a0] sm:$0xff]  ;;  %v1303_v41 = vld [vmem:[#allocation8 + $0x128] sm:$0xff] }
 0x582   :  { %3067 = vmatprep.subr.bf16.mxu1 %v4463_v42  ;;  %3108 = vmatprep.subr.bf16.mxu0 %v4465_v43  ;;  %v1319_v42 = vld [vmem:[#allocation8 + $0x1a8] sm:$0xff]  ;;  %v4530_v43 = vcombine.low %v1334_v26, %v1350_v27  ;;  %v4499_v47 = vcombine.high %v1302_v37, %v1318_v38 }
 0x583   :  { %v4501_v50 = vcombine.high %v1303_v41, %v1319_v42  ;;  %v4500_v56 = vcombine.low %v1303_v41, %v1319_v42  ;;  %v1336_v42 = vld [vmem:[#allocation8 + $0x230] sm:$0xff] }
 0x585   :  { %3068 = vmatpush1.bf16.msra.mxu1 %v4462_v53  ;;  %3109 = vmatpush1.bf16.msra.mxu0 %v4464_v19  ;;  %v1286_v53 = vld [vmem:[#allocation8 + $0xa0] sm:$0xff]  ;;  %v1271_v19 = vld [vmem:[#allocation8 + $0x28] sm:$0xff] }
 0x586   :  { %3135 = vmatprep.subr.bf16.mxu1 %v4691_v54  ;;  %3176 = vmatprep.subr.bf16.mxu0 %v4693_v24  ;;  %v1287_v54 = vld [vmem:[#allocation8 + $0xa8] sm:$0xff]  ;;  %v4498_v24 = vcombine.low %v1302_v37, %v1318_v38  ;;  %v4467_v57 = vcombine.high %v1270_v51, %v1286_v53 }
 0x587   :  { %v4469_v44 = vcombine.high %v1271_v19, %v1287_v54  ;;  %v4468_v63 = vcombine.low %v1271_v19, %v1287_v54  ;;  %v1304_v54 = vld [vmem:[#allocation8 + $0x130] sm:$0xff] }
 0x588   :  { %3086 = vmatmul.mubr.bf16.vlgmr.msra.gmra.mxu1 %v5479_v49  ;;  %3127 = vmatmul.mubr.bf16.vlgmr.msra.gmra.mxu0 %v5479_v49 }
 0x589   :  { %3136 = vmatpush1.bf16.msra.mxu1 %v4690_v59  ;;  %3177 = vmatpush1.bf16.msra.mxu0 %v4692_v60  ;;  %v1512_v59 = vld [vmem:[#allocation8 + $0x7b0] sm:$0xff]  ;;  %v1497_v60 = vld [vmem:[#allocation8 + $0x738] sm:$0xff] }
 0x58a   :  { %3137 = vmatprep.subr.bf16.mxu1 %v4659_v61  ;;  %3178 = vmatprep.subr.bf16.mxu0 %v4661_v62  ;;  %v1513_v61 = vld [vmem:[#allocation8 + $0x7b8] sm:$0xff]  ;;  %v4466_v62 = vcombine.low %v1270_v51, %v1286_v53  ;;  %v4695_v0 = vcombine.high %v1496_v48, %v1512_v59 }
 0x58b   :  { %3167 = vmatprep.mubr.bf16.mxu1 %v5300_v32  ;;  %3208 = vmatprep.mubr.bf16.mxu0 %v5300_v32  ;;  %v4697_v2 = vcombine.high %v1497_v60, %v1513_v61  ;;  %v4696_v58 = vcombine.low %v1497_v60, %v1513_v61  ;;  %v1272_v61 = vld [vmem:[#allocation8 + $0x30] sm:$0xff] }
 0x58d   :  { %3138 = vmatpush1.bf16.msra.mxu1 %v4658_v4  ;;  %3179 = vmatpush1.bf16.msra.mxu0 %v4660_v5  ;;  %v1480_v4 = vld [vmem:[#allocation8 + $0x6b0] sm:$0xff]  ;;  %v1465_v5 = vld [vmem:[#allocation8 + $0x638] sm:$0xff] }
 0x58e   :  { %3139 = vmatprep.subr.bf16.mxu1 %v4627_v52  ;;  %3180 = vmatprep.subr.bf16.mxu0 %v4629_v55  ;;  %v1481_v52 = vld [vmem:[#allocation8 + $0x6b8] sm:$0xff]  ;;  %v4694_v55 = vcombine.low %v1496_v48, %v1512_v59  ;;  %v4663_v6 = vcombine.high %v1464_v3, %v1480_v4 }
 0x58f   :  { %v4665_v7 = vcombine.high %v1465_v5, %v1481_v52  ;;  %v4664_v16 = vcombine.low %v1465_v5, %v1481_v52  ;;  %v1498_v52 = vld [vmem:[#allocation8 + $0x740] sm:$0xff] }
 0x591   :  { %3140 = vmatpush1.bf16.msra.mxu1 %v4626_v9  ;;  %3181 = vmatpush1.bf16.msra.mxu0 %v4628_v10  ;;  %v1448_v9 = vld [vmem:[#allocation8 + $0x5b0] sm:$0xff]  ;;  %v1433_v10 = vld [vmem:[#allocation8 + $0x538] sm:$0xff] }
 0x592   :  { %3141 = vmatprep.subr.bf16.mxu1 %v4595_v11  ;;  %3182 = vmatprep.subr.bf16.mxu0 %v4597_v12  ;;  %v1449_v11 = vld [vmem:[#allocation8 + $0x5b8] sm:$0xff]  ;;  %v4662_v12 = vcombine.low %v1464_v3, %v1480_v4  ;;  %v4631_v17 = vcombine.high %v1432_v8, %v1448_v9 }
 0x593   :  { %v4633_v18 = vcombine.high %v1433_v10, %v1449_v11  ;;  %v4632_v26 = vcombine.low %v1433_v10, %v1449_v11  ;;  %v1466_v11 = vld [vmem:[#allocation8 + $0x640] sm:$0xff] }
 0x595   :  { %3142 = vmatpush1.bf16.msra.mxu1 %v4594_v21  ;;  %3183 = vmatpush1.bf16.msra.mxu0 %v4596_v22  ;;  %v1416_v21 = vld [vmem:[#allocation8 + $0x4b0] sm:$0xff]  ;;  %v1401_v22 = vld [vmem:[#allocation8 + $0x438] sm:$0xff] }
 0x596   :  { %3143 = vmatprep.subr.bf16.mxu1 %v4563_v23  ;;  %3184 = vmatprep.subr.bf16.mxu0 %v4565_v25  ;;  %v1417_v23 = vld [vmem:[#allocation8 + $0x4b8] sm:$0xff]  ;;  %v4630_v25 = vcombine.low %v1432_v8, %v1448_v9  ;;  %v4599_v27 = vcombine.high %v1400_v20, %v1416_v21 }
 0x597   :  { %v4601_v29 = vcombine.high %v1401_v22, %v1417_v23  ;;  %v4600_v37 = vcombine.low %v1401_v22, %v1417_v23  ;;  %v1434_v23 = vld [vmem:[#allocation8 + $0x540] sm:$0xff] }
 0x599   :  { %3144 = vmatpush1.bf16.msra.mxu1 %v4562_v31  ;;  %3185 = vmatpush1.bf16.msra.mxu0 %v4564_v33  ;;  %v1384_v31 = vld [vmem:[#allocation8 + $0x3b0] sm:$0xff]  ;;  %v1369_v33 = vld [vmem:[#allocation8 + $0x338] sm:$0xff] }
 0x59a   :  { %3145 = vmatprep.subr.bf16.mxu1 %v4531_v34  ;;  %3186 = vmatprep.subr.bf16.mxu0 %v4533_v35  ;;  %v1385_v34 = vld [vmem:[#allocation8 + $0x3b8] sm:$0xff]  ;;  %v4598_v35 = vcombine.low %v1400_v20, %v1416_v21  ;;  %v4567_v38 = vcombine.high %v1368_v30, %v1384_v31 }
 0x59b   :  { %v4569_v41 = vcombine.high %v1369_v33, %v1385_v34  ;;  %v4568_v51 = vcombine.low %v1369_v33, %v1385_v34  ;;  %v1402_v34 = vld [vmem:[#allocation8 + $0x440] sm:$0xff] }
 0x59d   :  { %3146 = vmatpush1.bf16.msra.mxu1 %v4530_v43  ;;  %3187 = vmatpush1.bf16.msra.mxu0 %v4532_v45  ;;  %v1352_v43 = vld [vmem:[#allocation8 + $0x2b0] sm:$0xff]  ;;  %v1337_v45 = vld [vmem:[#allocation8 + $0x238] sm:$0xff] }
 0x59e   :  { %3147 = vmatprep.subr.bf16.mxu1 %v4499_v47  ;;  %3188 = vmatprep.subr.bf16.mxu0 %v4501_v50  ;;  %v1353_v47 = vld [vmem:[#allocation8 + $0x2b8] sm:$0xff]  ;;  %v4566_v50 = vcombine.low %v1368_v30, %v1384_v31  ;;  %v4535_v53 = vcombine.high %v1336_v42, %v1352_v43 }
 0x59f   :  { %v4537_v19 = vcombine.high %v1337_v45, %v1353_v47  ;;  %v4536_v48 = vcombine.low %v1337_v45, %v1353_v47  ;;  %v1370_v47 = vld [vmem:[#allocation8 + $0x340] sm:$0xff] }
 0x5a1   :  { %3148 = vmatpush1.bf16.msra.mxu1 %v4498_v24  ;;  %3189 = vmatpush1.bf16.msra.mxu0 %v4500_v56  ;;  %v1320_v24 = vld [vmem:[#allocation8 + $0x1b0] sm:$0xff]  ;;  %v1305_v56 = vld [vmem:[#allocation8 + $0x138] sm:$0xff] }
 0x5a2   :  { %3149 = vmatprep.subr.bf16.mxu1 %v4467_v57  ;;  %3190 = vmatprep.subr.bf16.mxu0 %v4469_v44  ;;  %v1321_v57 = vld [vmem:[#allocation8 + $0x1b8] sm:$0xff]  ;;  %v4534_v44 = vcombine.low %v1336_v42, %v1352_v43  ;;  %v4503_v59 = vcombine.high %v1304_v54, %v1320_v24 }
 0x5a3   :  { %v4505_v60 = vcombine.high %v1305_v56, %v1321_v57  ;;  %v4504_v3 = vcombine.low %v1305_v56, %v1321_v57  ;;  %v1338_v57 = vld [vmem:[#allocation8 + $0x240] sm:$0xff] }
 0x5a5   :  { %3150 = vmatpush1.bf16.msra.mxu1 %v4466_v62  ;;  %3191 = vmatpush1.bf16.msra.mxu0 %v4468_v63  ;;  %v1288_v62 = vld [vmem:[#allocation8 + $0xb0] sm:$0xff]  ;;  %v1273_v63 = vld [vmem:[#allocation8 + $0x38] sm:$0xff] }
 0x5a6   :  { %3217 = vmatprep.subr.bf16.mxu1 %v4695_v0  ;;  %3258 = vmatprep.subr.bf16.mxu0 %v4697_v2  ;;  %v1289_v0 = vld [vmem:[#allocation8 + $0xb8] sm:$0xff]  ;;  %v4502_v2 = vcombine.low %v1304_v54, %v1320_v24  ;;  %v4471_v4 = vcombine.high %v1272_v61, %v1288_v62 }
 0x5a7   :  { %v4473_v5 = vcombine.high %v1273_v63, %v1289_v0  ;;  %v4472_v8 = vcombine.low %v1273_v63, %v1289_v0  ;;  %v1306_v0 = vld [vmem:[#allocation8 + $0x140] sm:$0xff] }
 0x5a8   :  { %3168 = vmatmul.mubr.bf16.vlgmr.msra.gmra.mxu1 %v5479_v49  ;;  %3209 = vmatmul.mubr.bf16.vlgmr.msra.gmra.mxu0 %v5479_v49 }
 0x5a9   :  { %3218 = vmatpush1.bf16.msra.mxu1 %v4694_v55  ;;  %3259 = vmatpush1.bf16.msra.mxu0 %v4696_v58  ;;  %v1514_v55 = vld [vmem:[#allocation8 + $0x7c0] sm:$0xff]  ;;  %v1499_v58 = vld [vmem:[#allocation8 + $0x748] sm:$0xff] }
 0x5aa   :  { %3219 = vmatprep.subr.bf16.mxu1 %v4663_v6  ;;  %3260 = vmatprep.subr.bf16.mxu0 %v4665_v7  ;;  %v1515_v6 = vld [vmem:[#allocation8 + $0x7c8] sm:$0xff]  ;;  %v4470_v7 = vcombine.low %v1272_v61, %v1288_v62  ;;  %v4699_v9 = vcombine.high %v1498_v52, %v1514_v55 }
 0x5ab   :  { %3249 = vmatprep.mubr.bf16.mxu1 %v5300_v32  ;;  %3290 = vmatprep.mubr.bf16.mxu0 %v5300_v32  ;;  %v4701_v10 = vcombine.high %v1499_v58, %v1515_v6  ;;  %v4700_v20 = vcombine.low %v1499_v58, %v1515_v6  ;;  %v1274_v6 = vld [vmem:[#allocation8 + $0x40] sm:$0xff] }
 0x5ad   :  { %3220 = vmatpush1.bf16.msra.mxu1 %v4662_v12  ;;  %3261 = vmatpush1.bf16.msra.mxu0 %v4664_v16  ;;  %v1482_v12 = vld [vmem:[#allocation8 + $0x6c0] sm:$0xff]  ;;  %v1467_v16 = vld [vmem:[#allocation8 + $0x648] sm:$0xff] }
 0x5ae   :  { %3221 = vmatprep.subr.bf16.mxu1 %v4631_v17  ;;  %3262 = vmatprep.subr.bf16.mxu0 %v4633_v18  ;;  %v1483_v17 = vld [vmem:[#allocation8 + $0x6c8] sm:$0xff]  ;;  %v4698_v18 = vcombine.low %v1498_v52, %v1514_v55  ;;  %v4667_v21 = vcombine.high %v1466_v11, %v1482_v12 }
 0x5af   :  { %v4669_v22 = vcombine.high %v1467_v16, %v1483_v17  ;;  %v4668_v30 = vcombine.low %v1467_v16, %v1483_v17  ;;  %v1500_v17 = vld [vmem:[#allocation8 + $0x750] sm:$0xff] }
 0x5b1   :  { %3222 = vmatpush1.bf16.msra.mxu1 %v4630_v25  ;;  %3263 = vmatpush1.bf16.msra.mxu0 %v4632_v26  ;;  %v1450_v25 = vld [vmem:[#allocation8 + $0x5c0] sm:$0xff]  ;;  %v1435_v26 = vld [vmem:[#allocation8 + $0x548] sm:$0xff] }
 0x5b2   :  { %3223 = vmatprep.subr.bf16.mxu1 %v4599_v27  ;;  %3264 = vmatprep.subr.bf16.mxu0 %v4601_v29  ;;  %v1451_v27 = vld [vmem:[#allocation8 + $0x5c8] sm:$0xff]  ;;  %v4666_v29 = vcombine.low %v1466_v11, %v1482_v12  ;;  %v4635_v31 = vcombine.high %v1434_v23, %v1450_v25 }
 0x5b3   :  { %v4637_v33 = vcombine.high %v1435_v26, %v1451_v27  ;;  %v4636_v42 = vcombine.low %v1435_v26, %v1451_v27  ;;  %v1468_v27 = vld [vmem:[#allocation8 + $0x650] sm:$0xff] }
 0x5b5   :  { %3224 = vmatpush1.bf16.msra.mxu1 %v4598_v35  ;;  %3265 = vmatpush1.bf16.msra.mxu0 %v4600_v37  ;;  %v1418_v35 = vld [vmem:[#allocation8 + $0x4c0] sm:$0xff]  ;;  %v1403_v37 = vld [vmem:[#allocation8 + $0x448] sm:$0xff] }
 0x5b6   :  { %3225 = vmatprep.subr.bf16.mxu1 %v4567_v38  ;;  %3266 = vmatprep.subr.bf16.mxu0 %v4569_v41  ;;  %v1419_v38 = vld [vmem:[#allocation8 + $0x4c8] sm:$0xff]  ;;  %v4634_v41 = vcombine.low %v1434_v23, %v1450_v25  ;;  %v4603_v43 = vcombine.high %v1402_v34, %v1418_v35 }
 0x5b7   :  { %v4605_v45 = vcombine.high %v1403_v37, %v1419_v38  ;;  %v4604_v54 = vcombine.low %v1403_v37, %v1419_v38  ;;  %v1436_v38 = vld [vmem:[#allocation8 + $0x550] sm:$0xff] }
 0x5b9   :  { %3226 = vmatpush1.bf16.msra.mxu1 %v4566_v50  ;;  %3267 = vmatpush1.bf16.msra.mxu0 %v4568_v51  ;;  %v1386_v50 = vld [vmem:[#allocation8 + $0x3c0] sm:$0xff]  ;;  %v1371_v51 = vld [vmem:[#allocation8 + $0x348] sm:$0xff] }
 0x5ba   :  { %3227 = vmatprep.subr.bf16.mxu1 %v4535_v53  ;;  %3268 = vmatprep.subr.bf16.mxu0 %v4537_v19  ;;  %v1387_v53 = vld [vmem:[#allocation8 + $0x3c8] sm:$0xff]  ;;  %v4602_v19 = vcombine.low %v1402_v34, %v1418_v35  ;;  %v4571_v24 = vcombine.high %v1370_v47, %v1386_v50 }
 0x5bb   :  { %v4573_v56 = vcombine.high %v1371_v51, %v1387_v53  ;;  %v4572_v61 = vcombine.low %v1371_v51, %v1387_v53  ;;  %v1404_v53 = vld [vmem:[#allocation8 + $0x450] sm:$0xff] }
 0x5bd   :  { %3228 = vmatpush1.bf16.msra.mxu1 %v4534_v44  ;;  %3269 = vmatpush1.bf16.msra.mxu0 %v4536_v48  ;;  %v1354_v44 = vld [vmem:[#allocation8 + $0x2c0] sm:$0xff]  ;;  %v1339_v48 = vld [vmem:[#allocation8 + $0x248] sm:$0xff] }
 0x5be   :  { %3229 = vmatprep.subr.bf16.mxu1 %v4503_v59  ;;  %3270 = vmatprep.subr.bf16.mxu0 %v4505_v60  ;;  %v1355_v59 = vld [vmem:[#allocation8 + $0x2c8] sm:$0xff]  ;;  %v4570_v60 = vcombine.low %v1370_v47, %v1386_v50  ;;  %v4539_v62 = vcombine.high %v1338_v57, %v1354_v44 }
 0x5bf   :  { %v4541_v63 = vcombine.high %v1339_v48, %v1355_v59  ;;  %v4540_v52 = vcombine.low %v1339_v48, %v1355_v59  ;;  %v1372_v59 = vld [vmem:[#allocation8 + $0x350] sm:$0xff] }
 0x5c1   :  { %3230 = vmatpush1.bf16.msra.mxu1 %v4502_v2  ;;  %3271 = vmatpush1.bf16.msra.mxu0 %v4504_v3  ;;  %v1322_v2 = vld [vmem:[#allocation8 + $0x1c0] sm:$0xff]  ;;  %v1307_v3 = vld [vmem:[#allocation8 + $0x148] sm:$0xff] }
 0x5c2   :  { %3231 = vmatprep.subr.bf16.mxu1 %v4471_v4  ;;  %3272 = vmatprep.subr.bf16.mxu0 %v4473_v5  ;;  %v1323_v4 = vld [vmem:[#allocation8 + $0x1c8] sm:$0xff]  ;;  %v4538_v5 = vcombine.low %v1338_v57, %v1354_v44  ;;  %v4507_v55 = vcombine.high %v1306_v0, %v1322_v2 }
 0x5c3   :  { %v4509_v58 = vcombine.high %v1307_v3, %v1323_v4  ;;  %v4508_v11 = vcombine.low %v1307_v3, %v1323_v4  ;;  %v1340_v4 = vld [vmem:[#allocation8 + $0x250] sm:$0xff] }
 0x5c5   :  { %3232 = vmatpush1.bf16.msra.mxu1 %v4470_v7  ;;  %3273 = vmatpush1.bf16.msra.mxu0 %v4472_v8  ;;  %v1290_v7 = vld [vmem:[#allocation8 + $0xc0] sm:$0xff]  ;;  %v1275_v8 = vld [vmem:[#allocation8 + $0x48] sm:$0xff] }
 0x5c6   :  { %3299 = vmatprep.subr.bf16.mxu1 %v4699_v9  ;;  %3340 = vmatprep.subr.bf16.mxu0 %v4701_v10  ;;  %v1291_v9 = vld [vmem:[#allocation8 + $0xc8] sm:$0xff]  ;;  %v4506_v10 = vcombine.low %v1306_v0, %v1322_v2  ;;  %v4475_v12 = vcombine.high %v1274_v6, %v1290_v7 }
 0x5c7   :  { %v4477_v16 = vcombine.high %v1275_v8, %v1291_v9  ;;  %v4476_v23 = vcombine.low %v1275_v8, %v1291_v9  ;;  %v1308_v9 = vld [vmem:[#allocation8 + $0x150] sm:$0xff] }
 0x5c8   :  { %3250 = vmatmul.mubr.bf16.vlgmr.msra.gmra.mxu1 %v5479_v49  ;;  %3291 = vmatmul.mubr.bf16.vlgmr.msra.gmra.mxu0 %v5479_v49 }
 0x5c9   :  { %3300 = vmatpush1.bf16.msra.mxu1 %v4698_v18  ;;  %3341 = vmatpush1.bf16.msra.mxu0 %v4700_v20  ;;  %v1516_v18 = vld [vmem:[#allocation8 + $0x7d0] sm:$0xff]  ;;  %v1501_v20 = vld [vmem:[#allocation8 + $0x758] sm:$0xff] }
 0x5ca   :  { %3301 = vmatprep.subr.bf16.mxu1 %v4667_v21  ;;  %3342 = vmatprep.subr.bf16.mxu0 %v4669_v22  ;;  %v1517_v21 = vld [vmem:[#allocation8 + $0x7d8] sm:$0xff]  ;;  %v4474_v22 = vcombine.low %v1274_v6, %v1290_v7  ;;  %v4703_v25 = vcombine.high %v1500_v17, %v1516_v18 }
 0x5cb   :  { %3331 = vmatprep.mubr.bf16.mxu1 %v5300_v32  ;;  %3372 = vmatprep.mubr.bf16.mxu0 %v5300_v32  ;;  %v4705_v26 = vcombine.high %v1501_v20, %v1517_v21  ;;  %v4704_v34 = vcombine.low %v1501_v20, %v1517_v21  ;;  %v1276_v21 = vld [vmem:[#allocation8 + $0x50] sm:$0xff] }
 0x5cd   :  { %3302 = vmatpush1.bf16.msra.mxu1 %v4666_v29  ;;  %3343 = vmatpush1.bf16.msra.mxu0 %v4668_v30  ;;  %v1484_v29 = vld [vmem:[#allocation8 + $0x6d0] sm:$0xff]  ;;  %v1469_v30 = vld [vmem:[#allocation8 + $0x658] sm:$0xff] }
 0x5ce   :  { %3303 = vmatprep.subr.bf16.mxu1 %v4635_v31  ;;  %3344 = vmatprep.subr.bf16.mxu0 %v4637_v33  ;;  %v1485_v31 = vld [vmem:[#allocation8 + $0x6d8] sm:$0xff]  ;;  %v4702_v33 = vcombine.low %v1500_v17, %v1516_v18  ;;  %v4671_v35 = vcombine.high %v1468_v27, %v1484_v29 }
 0x5cf   :  { %v4673_v37 = vcombine.high %v1469_v30, %v1485_v31  ;;  %v4672_v47 = vcombine.low %v1469_v30, %v1485_v31  ;;  %v1502_v31 = vld [vmem:[#allocation8 + $0x760] sm:$0xff] }
 0x5d1   :  { %3304 = vmatpush1.bf16.msra.mxu1 %v4634_v41  ;;  %3345 = vmatpush1.bf16.msra.mxu0 %v4636_v42  ;;  %v1452_v41 = vld [vmem:[#allocation8 + $0x5d0] sm:$0xff]  ;;  %v1437_v42 = vld [vmem:[#allocation8 + $0x558] sm:$0xff] }
 0x5d2   :  { %3305 = vmatprep.subr.bf16.mxu1 %v4603_v43  ;;  %3346 = vmatprep.subr.bf16.mxu0 %v4605_v45  ;;  %v1453_v43 = vld [vmem:[#allocation8 + $0x5d8] sm:$0xff]  ;;  %v4670_v45 = vcombine.low %v1468_v27, %v1484_v29  ;;  %v4639_v50 = vcombine.high %v1436_v38, %v1452_v41 }
 0x5d3   :  { %v4641_v51 = vcombine.high %v1437_v42, %v1453_v43  ;;  %v4640_v57 = vcombine.low %v1437_v42, %v1453_v43  ;;  %v1470_v43 = vld [vmem:[#allocation8 + $0x660] sm:$0xff] }
 0x5d5   :  { %3306 = vmatpush1.bf16.msra.mxu1 %v4602_v19  ;;  %3347 = vmatpush1.bf16.msra.mxu0 %v4604_v54  ;;  %v1420_v19 = vld [vmem:[#allocation8 + $0x4d0] sm:$0xff]  ;;  %v1405_v54 = vld [vmem:[#allocation8 + $0x458] sm:$0xff] }
 0x5d6   :  { %3307 = vmatprep.subr.bf16.mxu1 %v4571_v24  ;;  %3348 = vmatprep.subr.bf16.mxu0 %v4573_v56  ;;  %v1421_v24 = vld [vmem:[#allocation8 + $0x4d8] sm:$0xff]  ;;  %v4638_v56 = vcombine.low %v1436_v38, %v1452_v41  ;;  %v4607_v44 = vcombine.high %v1404_v53, %v1420_v19 }
 0x5d7   :  { %v4609_v48 = vcombine.high %v1405_v54, %v1421_v24  ;;  %v4608_v0 = vcombine.low %v1405_v54, %v1421_v24  ;;  %v1438_v24 = vld [vmem:[#allocation8 + $0x560] sm:$0xff] }
 0x5d9   :  { %3308 = vmatpush1.bf16.msra.mxu1 %v4570_v60  ;;  %3349 = vmatpush1.bf16.msra.mxu0 %v4572_v61  ;;  %v1388_v60 = vld [vmem:[#allocation8 + $0x3d0] sm:$0xff]  ;;  %v1373_v61 = vld [vmem:[#allocation8 + $0x358] sm:$0xff] }
 0x5da   :  { %3309 = vmatprep.subr.bf16.mxu1 %v4539_v62  ;;  %3350 = vmatprep.subr.bf16.mxu0 %v4541_v63  ;;  %v1389_v62 = vld [vmem:[#allocation8 + $0x3d8] sm:$0xff]  ;;  %v4606_v63 = vcombine.low %v1404_v53, %v1420_v19  ;;  %v4575_v2 = vcombine.high %v1372_v59, %v1388_v60 }
 0x5db   :  { %v4577_v3 = vcombine.high %v1373_v61, %v1389_v62  ;;  %v4576_v6 = vcombine.low %v1373_v61, %v1389_v62  ;;  %v1406_v62 = vld [vmem:[#allocation8 + $0x460] sm:$0xff] }
 0x5dd   :  { %3310 = vmatpush1.bf16.msra.mxu1 %v4538_v5  ;;  %3351 = vmatpush1.bf16.msra.mxu0 %v4540_v52  ;;  %v1356_v5 = vld [vmem:[#allocation8 + $0x2d0] sm:$0xff]  ;;  %v1341_v52 = vld [vmem:[#allocation8 + $0x258] sm:$0xff] }
 0x5de   :  { %3311 = vmatprep.subr.bf16.mxu1 %v4507_v55  ;;  %3352 = vmatprep.subr.bf16.mxu0 %v4509_v58  ;;  %v1357_v55 = vld [vmem:[#allocation8 + $0x2d8] sm:$0xff]  ;;  %v4574_v58 = vcombine.low %v1372_v59, %v1388_v60  ;;  %v4543_v7 = vcombine.high %v1340_v4, %v1356_v5 }
 0x5df   :  { %v4545_v8 = vcombine.high %v1341_v52, %v1357_v55  ;;  %v4544_v17 = vcombine.low %v1341_v52, %v1357_v55  ;;  %v1374_v55 = vld [vmem:[#allocation8 + $0x360] sm:$0xff] }
 0x5e1   :  { %3312 = vmatpush1.bf16.msra.mxu1 %v4506_v10  ;;  %3353 = vmatpush1.bf16.msra.mxu0 %v4508_v11  ;;  %v1324_v10 = vld [vmem:[#allocation8 + $0x1d0] sm:$0xff]  ;;  %v1309_v11 = vld [vmem:[#allocation8 + $0x158] sm:$0xff] }
 0x5e2   :  { %3313 = vmatprep.subr.bf16.mxu1 %v4475_v12  ;;  %3354 = vmatprep.subr.bf16.mxu0 %v4477_v16  ;;  %v1325_v12 = vld [vmem:[#allocation8 + $0x1d8] sm:$0xff]  ;;  %v4542_v16 = vcombine.low %v1340_v4, %v1356_v5  ;;  %v4511_v18 = vcombine.high %v1308_v9, %v1324_v10 }
 0x5e3   :  { %v4513_v20 = vcombine.high %v1309_v11, %v1325_v12  ;;  %v4512_v27 = vcombine.low %v1309_v11, %v1325_v12  ;;  %v1342_v12 = vld [vmem:[#allocation8 + $0x260] sm:$0xff] }
 0x5e5   :  { %3314 = vmatpush1.bf16.msra.mxu1 %v4474_v22  ;;  %3355 = vmatpush1.bf16.msra.mxu0 %v4476_v23  ;;  %v1292_v22 = vld [vmem:[#allocation8 + $0xd0] sm:$0xff]  ;;  %v1277_v23 = vld [vmem:[#allocation8 + $0x58] sm:$0xff] }
 0x5e6   :  { %3381 = vmatprep.subr.bf16.mxu1 %v4703_v25  ;;  %3422 = vmatprep.subr.bf16.mxu0 %v4705_v26  ;;  %v1293_v25 = vld [vmem:[#allocation8 + $0xd8] sm:$0xff]  ;;  %v4510_v26 = vcombine.low %v1308_v9, %v1324_v10  ;;  %v4479_v29 = vcombine.high %v1276_v21, %v1292_v22 }
 0x5e7   :  { %v4481_v30 = vcombine.high %v1277_v23, %v1293_v25  ;;  %v4480_v38 = vcombine.low %v1277_v23, %v1293_v25  ;;  %v1310_v25 = vld [vmem:[#allocation8 + $0x160] sm:$0xff] }
 0x5e8   :  { %3332 = vmatmul.mubr.bf16.vlgmr.msra.gmra.mxu1 %v5479_v49  ;;  %3373 = vmatmul.mubr.bf16.vlgmr.msra.gmra.mxu0 %v5479_v49 }
 0x5e9   :  { %3382 = vmatpush1.bf16.msra.mxu1 %v4702_v33  ;;  %3423 = vmatpush1.bf16.msra.mxu0 %v4704_v34  ;;  %v1518_v33 = vld [vmem:[#allocation8 + $0x7e0] sm:$0xff]  ;;  %v1503_v34 = vld [vmem:[#allocation8 + $0x768] sm:$0xff] }
 0x5ea   :  { %3383 = vmatprep.subr.bf16.mxu1 %v4671_v35  ;;  %3424 = vmatprep.subr.bf16.mxu0 %v4673_v37  ;;  %v1519_v35 = vld [vmem:[#allocation8 + $0x7e8] sm:$0xff]  ;;  %v4478_v37 = vcombine.low %v1276_v21, %v1292_v22  ;;  %v4707_v41 = vcombine.high %v1502_v31, %v1518_v33 }
 0x5eb   :  { %3413 = vmatprep.mubr.bf16.mxu1 %v5300_v32  ;;  %3454 = vmatprep.mubr.bf16.mxu0 %v5300_v32  ;;  %v4709_v42 = vcombine.high %v1503_v34, %v1519_v35  ;;  %v4708_v53 = vcombine.low %v1503_v34, %v1519_v35  ;;  %v1278_v35 = vld [vmem:[#allocation8 + $0x60] sm:$0xff] }
 0x5ed   :  { %3384 = vmatpush1.bf16.msra.mxu1 %v4670_v45  ;;  %3425 = vmatpush1.bf16.msra.mxu0 %v4672_v47  ;;  %v1486_v45 = vld [vmem:[#allocation8 + $0x6e0] sm:$0xff]  ;;  %v1471_v47 = vld [vmem:[#allocation8 + $0x668] sm:$0xff] }
 0x5ee   :  { %3385 = vmatprep.subr.bf16.mxu1 %v4639_v50  ;;  %3426 = vmatprep.subr.bf16.mxu0 %v4641_v51  ;;  %v1487_v50 = vld [vmem:[#allocation8 + $0x6e8] sm:$0xff]  ;;  %v4706_v51 = vcombine.low %v1502_v31, %v1518_v33  ;;  %v4675_v19 = vcombine.high %v1470_v43, %v1486_v45 }
 0x5ef   :  { %v4677_v54 = vcombine.high %v1471_v47, %v1487_v50  ;;  %v4676_v59 = vcombine.low %v1471_v47, %v1487_v50  ;;  %v1504_v50 = vld [vmem:[#allocation8 + $0x770] sm:$0xff] }
 0x5f1   :  { %3386 = vmatpush1.bf16.msra.mxu1 %v4638_v56  ;;  %3427 = vmatpush1.bf16.msra.mxu0 %v4640_v57  ;;  %v1454_v56 = vld [vmem:[#allocation8 + $0x5e0] sm:$0xff]  ;;  %v1439_v57 = vld [vmem:[#allocation8 + $0x568] sm:$0xff] }
 0x5f2   :  { %3387 = vmatprep.subr.bf16.mxu1 %v4607_v44  ;;  %3428 = vmatprep.subr.bf16.mxu0 %v4609_v48  ;;  %v1455_v44 = vld [vmem:[#allocation8 + $0x5e8] sm:$0xff]  ;;  %v4674_v48 = vcombine.low %v1470_v43, %v1486_v45  ;;  %v4643_v60 = vcombine.high %v1438_v24, %v1454_v56 }
 0x5f3   :  { %v4645_v61 = vcombine.high %v1439_v57, %v1455_v44  ;;  %v4644_v4 = vcombine.low %v1439_v57, %v1455_v44  ;;  %v5508_v44 = vld [vmem:[%s5866_s1 + $0xb] sm:$0xff] }
 0x5f5   :  { %3388 = vmatpush1.bf16.msra.mxu1 %v4606_v63  ;;  %3429 = vmatpush1.bf16.msra.mxu0 %v4608_v0  ;;  %v1422_v63 = vld [vmem:[#allocation8 + $0x4e0] sm:$0xff]  ;;  %v1407_v0 = vld [vmem:[#allocation8 + $0x468] sm:$0xff] }
 0x5f6   :  { %3389 = vmatprep.subr.bf16.mxu1 %v4575_v2  ;;  %3430 = vmatprep.subr.bf16.mxu0 %v4577_v3  ;;  %v1423_v2 = vld [vmem:[#allocation8 + $0x4e8] sm:$0xff]  ;;  %v4642_v3 = vcombine.low %v1438_v24, %v1454_v56  ;;  %v4611_v5 = vcombine.high %v1406_v62, %v1422_v63 }
 0x5f7   :  { %v4613_v52 = vcombine.high %v1407_v0, %v1423_v2  ;;  %v4612_v9 = vcombine.low %v1407_v0, %v1423_v2  ;;  %v2814_v0 = vrot.slane %v5508_v44, %v5375_v1  ;;  %v2822_v2 = vrot.slane %v5508_v44, %v5379_v13 }
 0x5f9   :  { %3390 = vmatpush1.bf16.msra.mxu1 %v4574_v58  ;;  %3431 = vmatpush1.bf16.msra.mxu0 %v4576_v6  ;;  %v1390_v58 = vld [vmem:[#allocation8 + $0x3e0] sm:$0xff]  ;;  %v1375_v6 = vld [vmem:[#allocation8 + $0x368] sm:$0xff] }
 0x5fa   :  { %3391 = vmatprep.subr.bf16.mxu1 %v4543_v7  ;;  %3432 = vmatprep.subr.bf16.mxu0 %v4545_v8  ;;  %v1391_v7 = vld [vmem:[#allocation8 + $0x3e8] sm:$0xff]  ;;  %v4610_v8 = vcombine.low %v1406_v62, %v1422_v63  ;;  %v4579_v10 = vcombine.high %v1374_v55, %v1390_v58 }
 0x5fb   :  { %v4581_v11 = vcombine.high %v1375_v6, %v1391_v7  ;;  %v4580_v21 = vcombine.low %v1375_v6, %v1391_v7  ;;  %v1441_v6 = vld [vmem:[#allocation8 + $0x578] sm:$0xff] }
 0x5fc   :  { %v1457_v7 = vld [vmem:[#allocation8 + $0x5f8] sm:$0xff] }
 0x5fd   :  { %3392 = vmatpush1.bf16.msra.mxu1 %v4542_v16  ;;  %3433 = vmatpush1.bf16.msra.mxu0 %v4544_v17  ;;  %v1358_v16 = vld [vmem:[#allocation8 + $0x2e0] sm:$0xff]  ;;  %v1343_v17 = vld [vmem:[#allocation8 + $0x268] sm:$0xff] }
 0x5fe   :  { %3393 = vmatprep.subr.bf16.mxu1 %v4511_v18  ;;  %3434 = vmatprep.subr.bf16.mxu0 %v4513_v20  ;;  %v1359_v18 = vld [vmem:[#allocation8 + $0x2e8] sm:$0xff]  ;;  %v4578_v20 = vcombine.low %v1374_v55, %v1390_v58  ;;  %v4547_v22 = vcombine.high %v1342_v12, %v1358_v16  ;;  %v2826_v55 = vrot.slane %v5508_v44, %v5385_v15  ;;  %v1456_v58 = vld [vmem:[#allocation8 + $0x5f0] sm:$0xff] }
 0x5ff   :  { %v4549_v23 = vcombine.high %v1343_v17, %v1359_v18  ;;  %v4548_v31 = vcombine.low %v1343_v17, %v1359_v18 }
 0x601   :  { %3394 = vmatpush1.bf16.msra.mxu1 %v4510_v26  ;;  %3435 = vmatpush1.bf16.msra.mxu0 %v4512_v27  ;;  %v1326_v26 = vld [vmem:[#allocation8 + $0x1e0] sm:$0xff]  ;;  %v1311_v27 = vld [vmem:[#allocation8 + $0x168] sm:$0xff] }
 0x602   :  { %3395 = vmatprep.subr.bf16.mxu1 %v4479_v29  ;;  %3436 = vmatprep.subr.bf16.mxu0 %v4481_v30  ;;  %v1327_v29 = vld [vmem:[#allocation8 + $0x1e8] sm:$0xff]  ;;  %v4546_v30 = vcombine.low %v1342_v12, %v1358_v16  ;;  %v4515_v33 = vcombine.high %v1310_v25, %v1326_v26 }
 0x603   :  { %v4517_v34 = vcombine.high %v1311_v27, %v1327_v29  ;;  %v4516_v43 = vcombine.low %v1311_v27, %v1327_v29  ;;  %v1409_v27 = vld [vmem:[#allocation8 + $0x478] sm:$0xff] }
 0x604   :  { %v1425_v29 = vld [vmem:[#allocation8 + $0x4f8] sm:$0xff] }
 0x605   :  { %3396 = vmatpush1.bf16.msra.mxu1 %v4478_v37  ;;  %3437 = vmatpush1.bf16.msra.mxu0 %v4480_v38  ;;  %v1294_v37 = vld [vmem:[#allocation8 + $0xe0] sm:$0xff]  ;;  %v1279_v38 = vld [vmem:[#allocation8 + $0x68] sm:$0xff] }
 0x606   :  { %3463 = vmatprep.subr.bf16.mxu1 %v4707_v41  ;;  %3504 = vmatprep.subr.bf16.mxu0 %v4709_v42  ;;  %v1295_v41 = vld [vmem:[#allocation8 + $0xe8] sm:$0xff]  ;;  %v4514_v42 = vcombine.low %v1310_v25, %v1326_v26  ;;  %v4483_v45 = vcombine.high %v1278_v35, %v1294_v37  ;;  %v1424_v26 = vld [vmem:[#allocation8 + $0x4f0] sm:$0xff] }
 0x607   :  { %v4485_v47 = vcombine.high %v1279_v38, %v1295_v41  ;;  %v4484_v24 = vcombine.low %v1279_v38, %v1295_v41  ;;  %v1376_v41 = vld [vmem:[#allocation8 + $0x370] sm:$0xff] }
 0x608   :  { %3414 = vmatmul.mubr.bf16.vlgmr.msra.gmra.mxu1 %v5479_v49  ;;  %3455 = vmatmul.mubr.bf16.vlgmr.msra.gmra.mxu0 %v5479_v49 }
 0x609   :  { %3464 = vmatpush1.bf16.msra.mxu1 %v4706_v51  ;;  %3505 = vmatpush1.bf16.msra.mxu0 %v4708_v53  ;;  %v1520_v51 = vld [vmem:[#allocation8 + $0x7f0] sm:$0xff]  ;;  %v1505_v53 = vld [vmem:[#allocation8 + $0x778] sm:$0xff] }
 0x60a   :  { %3465 = vmatprep.subr.bf16.mxu1 %v4675_v19  ;;  %3506 = vmatprep.subr.bf16.mxu0 %v4677_v54  ;;  %v1521_v19 = vld [vmem:[#allocation8 + $0x7f8] sm:$0xff]  ;;  %v4482_v54 = vcombine.low %v1278_v35, %v1294_v37  ;;  %v4711_v56 = vcombine.high %v1504_v50, %v1520_v51  ;;  %v4710_v62 = vcombine.low %v1504_v50, %v1520_v51 }
 0x60b   :  { %3495 = vmatprep.mubr.bf16.mxu1 %v5300_v32  ;;  %3536 = vmatprep.mubr.bf16.mxu0 %v5300_v32  ;;  %v4713_v57 = vcombine.high %v1505_v53, %v1521_v19  ;;  %v4712_v63 = vcombine.low %v1505_v53, %v1521_v19  ;;  %v4616_v50 = vcombine.low %v1409_v27, %v1425_v29  ;;  %v1344_v19 = vld [vmem:[#allocation8 + $0x270] sm:$0xff] }
 0x60d   :  { %3466 = vmatpush1.bf16.msra.mxu1 %v4674_v48  ;;  %3507 = vmatpush1.bf16.msra.mxu0 %v4676_v59  ;;  %v1472_v48 = vld [vmem:[#allocation8 + $0x670] sm:$0xff] }
 0x60e   :  { %3467 = vmatprep.subr.bf16.mxu1 %v4643_v60  ;;  %3508 = vmatprep.subr.bf16.mxu0 %v4645_v61  ;;  %v1488_v59 = vld [vmem:[#allocation8 + $0x6f0] sm:$0xff]  ;;  %v1473_v60 = vld [vmem:[#allocation8 + $0x678] sm:$0xff] }
 0x60f   :  { %v1489_v61 = vld [vmem:[#allocation8 + $0x6f8] sm:$0xff] }
 0x610   :  { %v4680_v16 = vcombine.low %v1473_v60, %v1489_v61 }
 0x611   :  { %3468 = vmatpush1.bf16.msra.mxu1 %v4642_v3  ;;  %3509 = vmatpush1.bf16.msra.mxu0 %v4644_v4  ;;  %v4679_v3 = vcombine.high %v1472_v48, %v1488_v59  ;;  %v4681_v4 = vcombine.high %v1473_v60, %v1489_v61  ;;  %v1312_v61 = vld [vmem:[#allocation8 + $0x170] sm:$0xff] }
 0x612   :  { %3469 = vmatprep.subr.bf16.mxu1 %v4611_v5  ;;  %3510 = vmatprep.subr.bf16.mxu0 %v4613_v52  ;;  %v1440_v5 = vld [vmem:[#allocation8 + $0x570] sm:$0xff]  ;;  %v2818_v52 = vrot.slane %v5508_v44, %v5368_v46 }
 0x615   :  { %3470 = vmatpush1.bf16.msra.mxu1 %v4610_v8  ;;  %3511 = vmatpush1.bf16.msra.mxu0 %v4612_v9 }
 0x616   :  { %3471 = vmatprep.subr.bf16.mxu1 %v4579_v10  ;;  %3512 = vmatprep.subr.bf16.mxu0 %v4581_v11  ;;  %v4678_v10 = vcombine.low %v1472_v48, %v1488_v59 }
 0x619   :  { %3472 = vmatpush1.bf16.msra.mxu1 %v4578_v20  ;;  %3513 = vmatpush1.bf16.msra.mxu0 %v4580_v21  ;;  %v4647_v20 = vcombine.high %v1440_v5, %v1456_v58  ;;  %v4649_v21 = vcombine.high %v1441_v6, %v1457_v7 }
 0x61a   :  { %3473 = vmatprep.subr.bf16.mxu1 %v4547_v22  ;;  %3514 = vmatprep.subr.bf16.mxu0 %v4549_v23  ;;  %v1408_v22 = vld [vmem:[#allocation8 + $0x470] sm:$0xff] }
 0x61b   :  { %v4615_v38 = vcombine.high %v1408_v22, %v1424_v26 }
 0x61d   :  { %3474 = vmatpush1.bf16.msra.mxu1 %v4546_v30  ;;  %3515 = vmatpush1.bf16.msra.mxu0 %v4548_v31 }
 0x61e   :  { %3475 = vmatprep.subr.bf16.mxu1 %v4515_v33  ;;  %3516 = vmatprep.subr.bf16.mxu0 %v4517_v34  ;;  %v4646_v33 = vcombine.low %v1440_v5, %v1456_v58  ;;  %v4648_v34 = vcombine.low %v1441_v6, %v1457_v7  ;;  %v1281_v58 = vld [vmem:[#allocation8 + $0x78] sm:$0xff] }
 0x61f   :  { %v1297_v6 = vld [vmem:[#allocation8 + $0xf8] sm:$0xff] }
 0x621   :  { %3476 = vmatpush1.bf16.msra.mxu1 %v4514_v42  ;;  %3517 = vmatpush1.bf16.msra.mxu0 %v4516_v43  ;;  %v1392_v42 = vld [vmem:[#allocation8 + $0x3f0] sm:$0xff]  ;;  %v1377_v43 = vld [vmem:[#allocation8 + $0x378] sm:$0xff] }
 0x622   :  { %3477 = vmatprep.subr.bf16.mxu1 %v4483_v45  ;;  %3518 = vmatprep.subr.bf16.mxu0 %v4485_v47  ;;  %v1393_v45 = vld [vmem:[#allocation8 + $0x3f8] sm:$0xff]  ;;  %v4614_v47 = vcombine.low %v1408_v22, %v1424_v26  ;;  %v4583_v51 = vcombine.high %v1376_v41, %v1392_v42  ;;  %v85_v26 = vld [vmem:[%s5865_s0 + $0x3] sm:$0x1] }
 0x623   :  { %v4585_v53 = vcombine.high %v1377_v43, %v1393_v45  ;;  %v4584_v48 = vcombine.low %v1377_v43, %v1393_v45  ;;  %v5123_v45 = vld [vmem:[#allocation7 + $0x48] sm:$0xff]  }
 0x625   :  { %3478 = vmatpush1.bf16.msra.mxu1 %v4482_v54  ;;  %3519 = vmatpush1.bf16.msra.mxu0 %v4484_v24  ;;  %v1360_v54 = vld [vmem:[#allocation8 + $0x2f0] sm:$0xff]  ;;  %v1345_v24 = vld [vmem:[#allocation8 + $0x278] sm:$0xff] }
 0x626   :  { %3545 = vmatprep.subr.bf16.mxu1 %v4711_v56  ;;  %3586 = vmatprep.subr.bf16.mxu0 %v4713_v57  ;;  %v1361_v56 = vld [vmem:[#allocation8 + $0x2f8] sm:$0xff]  ;;  %v4582_v57 = vcombine.low %v1376_v41, %v1392_v42  ;;  %v4551_v59 = vcombine.high %v1344_v19, %v1360_v54 }
 0x627   :  { %v4553_v60 = vcombine.high %v1345_v24, %v1361_v56 }
 0x628   :  { %3496 = vmatmul.mubr.bf16.vlgmr.msra.gmra.mxu1 %v5479_v49  ;;  %3537 = vmatmul.mubr.bf16.vlgmr.msra.gmra.mxu0 %v5479_v49  ;;  %v3005_v8 = vpop.f32.mrf.mxu1  ;;  %v3046_v9 = vpop.f32.mrf.mxu0 }
 0x629   :  { %v3006_v11 = vadd.f32 %v3005_v8, %v2814_v0  ;;  %v3047_v12 = vadd.f32 %v3046_v9, %v2822_v2  ;;  %3546 = vmatpush1.bf16.msra.mxu1 %v4710_v62  ;;  %3587 = vmatpush1.bf16.msra.mxu0 %v4712_v63  ;;  %v1328_v62 = vld [vmem:[#allocation8 + $0x1f0] sm:$0xff]  ;;  %v1313_v63 = vld [vmem:[#allocation8 + $0x178] sm:$0xff]  ;;  %v4550_v2 = vcombine.low %v1344_v19, %v1360_v54 }
 0x62a   :  { %v3007_v17 = vpop.f32.mrf.mxu1  ;;  %v3048_v18 = vpop.f32.mrf.mxu0  ;;  %3547 = vmatprep.subr.bf16.mxu1 %v4679_v3  ;;  %3588 = vmatprep.subr.bf16.mxu0 %v4681_v4  ;;  %v1329_v0 = vld [vmem:[#allocation8 + $0x1f8] sm:$0xff]  ;;  %v4552_v3 = vcombine.low %v1345_v24, %v1361_v56  ;;  %v4519_v4 = vcombine.high %v1312_v61, %v1328_v62  ;;  %v4518_v7 = vcombine.low %v1312_v61, %v1328_v62  ;;  %v5125_v24 = vld [vmem:[#allocation7 + $0x40] sm:$0xff]  }
 0x62b   :  { %3627 = vst [vmem:[%s5872_s7] sm:$0x1] %v3006_v11  ;;  %3629 = vst [vmem:[%s5872_s7 + $0x2] sm:$0x1] %v3047_v12  ;;  %v3008_v23 = vadd.f32 %v3007_v17, %v2818_v52  ;;  %v3049_v25 = vadd.f32 %v3048_v18, %v2826_v55  ;;  %3577 = vmatprep.mubr.bf16.mxu1 %v5300_v32  ;;  %3618 = vmatprep.mubr.bf16.mxu0 %v5300_v32  ;;  %v1280_v52 = vld [vmem:[#allocation8 + $0x70] sm:$0xff]  ;;  %v5538_v17 = vsub.s32 6, %v5365_v40  ;;  %v5126_v56 = vld [vmem:[#allocation7 + $0x20] sm:$0xff]  }
 0x62c   :  { %v3009_v30 = vpop.f32.mrf.mxu1  ;;  %v3050_v31 = vpop.f32.mrf.mxu0  ;;  %v4617_v32 = vcombine.high %v1409_v27, %v1425_v29  ;;  %v4521_v5 = vcombine.high %v1313_v63, %v1329_v0  ;;  %v1296_v55 = vld [vmem:[#allocation8 + $0xf0] sm:$0xff]  ;;  %v4520_v8 = vcombine.low %v1313_v63, %v1329_v0  ;;  %v4488_v12 = vcombine.low %v1281_v58, %v1297_v6 }
 0x62d   :  { %3628 = vst [vmem:[%s5872_s7 + $0x1] sm:$0x1] %v3008_v23  ;;  %3630 = vst [vmem:[%s5872_s7 + $0x3] sm:$0x1] %v3049_v25  ;;  %3548 = vmatpush1.bf16.msra.mxu1 %v4678_v10  ;;  %3589 = vmatpush1.bf16.msra.mxu0 %v4680_v16  ;;  %v4487_v9 = vcombine.high %v1280_v52, %v1296_v55  ;;  %v4489_v10 = vcombine.high %v1281_v58, %v1297_v6  ;;  %v5535_v16 = vsub.s32 4, %v5365_v40  ;;  %v5119_v23 = vld [vmem:[#allocation7 + $0x58] sm:$0xff]  }
 0x62e   :  { %v3010_v35 = vpop.f32.mrf.mxu1  ;;  %v3051_v37 = vpop.f32.mrf.mxu0  ;;  %3549 = vmatprep.subr.bf16.mxu1 %v4647_v20  ;;  %3590 = vmatprep.subr.bf16.mxu0 %v4649_v21  ;;  %v4486_v11 = vcombine.low %v1280_v52, %v1296_v55  ;;  %v5541_v18 = vsub.s32 5, %v5365_v40  ;;  %v5544_v20 = vsub.s32 7, %v5365_v40  ;;  %v2838_v22 = vrot.slane %v5508_v44, %v5538_v17  ;;  %v5120_v25 = vld [vmem:[#allocation7 + $0x38] sm:$0xff]  }
 0x62f   :  { %v2830_v21 = vrot.slane %v5508_v44, %v5535_v16  ;;  %v5122_v35 = vld [vmem:[#allocation7 + $0x30] sm:$0xff]   ;;  %v3746_v37 = vsub.f32 1.0, %v85_v26 }
 0x630   :  { %v2834_v40 = vrot.slane %v5508_v44, %v5541_v18  ;;  %v2842_v27 = vrot.slane %v5508_v44, %v5544_v20  ;;  %v84_v44 = vld [vmem:[%s5865_s0 + $0x2] sm:$0x1]  ;;  %s4306_s0 = sshll.u32 %s5301_s10, 4  ;;  %s4307_s0 = int_to_ptr.vmem [resolvable:$true] %s4306_s0 }
 0x631   :  { %3550 = vmatpush1.bf16.msra.mxu1 %v4646_v33  ;;  %3591 = vmatpush1.bf16.msra.mxu0 %v4648_v34  ;;  %v5121_v34 = vld [vmem:[#allocation7 + $0x50] sm:$0xff]   ;;  %s5259_s11 = scalar_lea.vmem %s4307_s0, 16  ;;  %s5263_s12 = scalar_lea.vmem %s4307_s0, 32 }
 0x632   :  { %3551 = vmatprep.subr.bf16.mxu1 %v4615_v38  ;;  %3592 = vmatprep.subr.bf16.mxu0 %v4617_v32  ;;  %p5260_p6 = scmp.ne.s32.totalorder %s4307_s0, %s5259_s11  ;;  %p5264_p7 = scmp.lt.s32.totalorder %s4307_s0, %s4307_s0 }
 0x633   :  { %p5265_p8 = scmp.lt.s32.totalorder %s5263_s12, %s5259_s11 }
 0x635   :  { %3552 = vmatpush1.bf16.msra.mxu1 %v4614_v47  ;;  %3593 = vmatpush1.bf16.msra.mxu0 %v4616_v50  ;;  %v5124_v47 = vld [vmem:[#allocation7 + $0x28] sm:$0xff]   ;;  %v5583_v50 = vand.u32 127, %v151_v36  ;;  %p5266_p9 = por %p5265_p8, %p5264_p7 }
 0x636   :  { %3553 = vmatprep.subr.bf16.mxu1 %v4583_v51  ;;  %3594 = vmatprep.subr.bf16.mxu0 %v4585_v53  ;;  %v3748_v51 = vmul.f32 %v85_v26, %v84_v44  ;;  %v3747_v53 = vmul.f32 %v3746_v37, %v5463_v39 }
 0x637   :  { %vm3665_vm3 = vcmp.lt.s32.totalorder %v5583_v50, 64  ;;  %p5267_p10 = pnand %p5266_p9, %p5260_p6 }
 0x639   :  { %3554 = vmatpush1.bf16.msra.mxu1 %v4582_v57  ;;  %3595 = vmatpush1.bf16.msra.mxu0 %v4584_v48  ;;  %v3749_v57 = vadd.f32 %v3748_v51, %v3747_v53  ;;  %v5134_v51 = vld [vmem:[#allocation7 + $0x60] sm:$0xff]  }
 0x63a   :  { %3555 = vmatprep.subr.bf16.mxu1 %v4551_v59  ;;  %3596 = vmatprep.subr.bf16.mxu0 %v4553_v60  ;;  %v1524_v60 = vld [vmem:[%s5866_s1 + $0x13] sm:$0xff]  ;;  %v1525_v53 = vld [vmem:[%s5866_s1 + $0x1b] sm:$0xff] }
 0x63b   :  { %v3766_v59 = vpack.c.bf16 %v3749_v57, %v3749_v57  ;;  %v2846_v61 = vrot.slane %v1524_v60, %v5375_v1  ;;  %v2854_v62 = vrot.slane %v1524_v60, %v5379_v13  ;;  %v2850_v63 = vrot.slane %v1524_v60, %v5368_v46 }
 0x63c   :  { %v2858_v0 = vrot.slane %v1524_v60, %v5385_v15 }
 0x63d   :  { %3556 = vmatpush1.bf16.msra.mxu1 %v4550_v2  ;;  %3597 = vmatpush1.bf16.msra.mxu0 %v4552_v3 }
 0x63e   :  { %3557 = vmatprep.subr.bf16.mxu1 %v4519_v4  ;;  %3598 = vmatprep.subr.bf16.mxu0 %v4521_v5 }
 0x641   :  { %3558 = vmatpush1.bf16.msra.mxu1 %v4518_v7  ;;  %3599 = vmatpush1.bf16.msra.mxu0 %v4520_v8 }
 0x642   :  { %3559 = vmatprep.subr.bf16.mxu1 %v4487_v9  ;;  %3600 = vmatprep.subr.bf16.mxu0 %v4489_v10  ;;  %v5127_v10 = vld [vmem:[#allocation7 + $0x98] sm:$0xff]  }
 0x645   :  { %3560 = vmatpush1.bf16.msra.mxu1 %v4486_v11  ;;  %3601 = vmatpush1.bf16.msra.mxu0 %v4488_v12  ;;  %v5128_v11 = vld [vmem:[#allocation7 + $0x90] sm:$0xff]   ;;  %v2862_v12 = vrot.slane %v1524_v60, %v5535_v16 }
 0x646   :  { %4812 = vmatprep.subr.bf16.mxu1 %v5298_v28  ;;  %4824 = vmatprep.subr.bf16.mxu0 %v5298_v28 }
 0x648   :  { %v3087_v29 = vpop.f32.mrf.mxu1  ;;  %v3128_v30 = vpop.f32.mrf.mxu0  ;;  %3578 = vmatmul.mubr.bf16.vlgmr.msra.gmra.mxu1 %v5479_v49  ;;  %3619 = vmatmul.mubr.bf16.vlgmr.msra.gmra.mxu0 %v5479_v49 }
 0x649   :  { %v3088_v31 = vadd.f32 %v3087_v29, %v2830_v21  ;;  %v3129_v33 = vadd.f32 %v3128_v30, %v2838_v22  ;;  %4813 = vmatpush3.bf16.msra.mxu1 %v5119_v23  ;;  %4825 = vmatpush3.bf16.msra.mxu0 %v5120_v25  ;;  %v2870_v21 = vrot.slane %v1524_v60, %v5538_v17 }
 0x64a   :  { %v3089_v38 = vpop.f32.mrf.mxu1  ;;  %v3130_v32 = vpop.f32.mrf.mxu0  ;;  %4814 = vmatprep.subr.bf16.mxu1 %v5298_v28  ;;  %4826 = vmatprep.subr.bf16.mxu0 %v5298_v28  ;;  %v2866_v22 = vrot.slane %v1524_v60, %v5541_v18  ;;  %v2874_v23 = vrot.slane %v1524_v60, %v5544_v20 }
 0x64b   :  { %3631 = vst [vmem:[%s5872_s7 + $0x4] sm:$0x1] %v3088_v31  ;;  %3633 = vst [vmem:[%s5872_s7 + $0x6] sm:$0x1] %v3129_v33  ;;  %v3090_v49 = vadd.f32 %v3089_v38, %v2834_v40  ;;  %v3131_v41 = vadd.f32 %v3130_v32, %v2842_v27  ;;  %4820 = vmatprep.mubr.msk.bf16.mxu1 %vm5299_vm1, %v5298_v28  ;;  %4832 = vmatprep.mubr.msk.bf16.mxu0 %vm5299_vm1, %v5298_v28  ;;  %v5129_v40 = vld [vmem:[#allocation7 + $0x88] sm:$0xff]   ;;  %v5130_v38 = vld [vmem:[#allocation7 + $0x80] sm:$0xff]  }
 0x64c   :  { %v3091_v42 = vpop.f32.mrf.mxu1  ;;  %v3132_v43 = vpop.f32.mrf.mxu0 }
 0x64d   :  { %3632 = vst [vmem:[%s5872_s7 + $0x5] sm:$0x1] %v3090_v49  ;;  %3634 = vst [vmem:[%s5872_s7 + $0x7] sm:$0x1] %v3131_v41  ;;  %4815 = vmatpush3.bf16.msra.mxu1 %v5121_v34  ;;  %4827 = vmatpush3.bf16.msra.mxu0 %v5122_v35  ;;  %v5131_v49 = vld [vmem:[#allocation7 + $0x78] sm:$0xff]   ;;  %v5132_v41 = vld [vmem:[#allocation7 + $0x70] sm:$0xff]  }
 0x64e   :  { %v3092_v19 = vpop.f32.mrf.mxu1  ;;  %v3133_v54 = vpop.f32.mrf.mxu0  ;;  %4816 = vmatprep.subr.bf16.mxu1 %v5298_v28  ;;  %4828 = vmatprep.subr.bf16.mxu0 %v5298_v28 }
 0x64f   :  { %v2878_v19 = vrot.slane %v1525_v53, %v5375_v1  ;;  %v2886_v54 = vrot.slane %v1525_v53, %v5379_v13 }
 0x651   :  { %4817 = vmatpush3.bf16.msra.mxu1 %v5123_v45  ;;  %4829 = vmatpush3.bf16.msra.mxu0 %v5124_v47  ;;  %v5133_v47 = vld [vmem:[#allocation7 + $0x68] sm:$0xff]  }
 0x652   :  { %4818 = vmatprep.subr.bf16.mxu1 %v5298_v28  ;;  %4830 = vmatprep.subr.bf16.mxu0 %v5298_v28 }
 0x654   :  { %v5594_v36 = vld [vmem:[%s5872_s7] sm:$0xff] }
 0x655   :  { %4819 = vmatpush3.bf16.msra.mxu1 %v5125_v24  ;;  %4831 = vmatpush3.bf16.msra.mxu0 %v5126_v56  ;;  %v3678_v39 = vsel %vm3665_vm3, -inf, %v5594_v36  ;;  %v3666_v48 = vsel %vm3665_vm3, %v5594_v36, -inf  ;;  %v2882_v24 = vrot.slane %v1525_v53, %v5368_v46  ;;  %v2890_v56 = vrot.slane %v1525_v53, %v5385_v15 }
 0x656   :  { %3682 = vmax.xlane.f32.xlu0 %v3678_v39  ;;  %3670 = vmax.xlane.f32.xlu1 %v3666_v48 }
 0x657   :  { %4836 = vmatprep.subr.bf16.mxu1 %v5298_v28  ;;  %4856 = vmatprep.subr.bf16.mxu0 %v5298_v28 }
 0x658   :  { %4821 = vmatmul.mubr.msk.bf16.vlgmr.msra.gmra.mxu1 %vm1221_vm2, %v3766_v59  ;;  %4833 = vmatmul.mubr.msk.bf16.vlgmr.msra.gmra.mxu0 %vm1221_vm2, %v5467_v14 }
 0x659   :  { %4852 = vmatprep.mubr.msk.bf16.mxu1 %vm5299_vm1, %v5298_v28  ;;  %4864 = vmatprep.mubr.msk.bf16.mxu0 %vm5299_vm1, %v5298_v28 }
 0x65a   :  { %4837 = vmatpush3.bf16.msra.mxu1 %v5127_v10 }
 0x65b   :  { %4838 = vmatprep.subr.bf16.mxu1 %v5298_v28 }
 0x65e   :  { %4839 = vmatpush3.bf16.msra.mxu1 %v5128_v11 }
 0x65f   :  { %4840 = vmatprep.subr.bf16.mxu1 %v5298_v28 }
 0x662   :  { %4841 = vmatpush3.bf16.msra.mxu1 %v5129_v40 }
 0x663   :  { %4842 = vmatprep.subr.bf16.mxu1 %v5298_v28 }
 0x666   :  { %4843 = vmatpush3.bf16.msra.mxu1 %v5130_v38 }
 0x667   :  { %4844 = vmatprep.subr.bf16.mxu1 %v5298_v28 }
 0x668   :  { %v3169_v2 = vpop.f32.mrf.mxu1  ;;  %v3210_v14 = vpop.f32.mrf.mxu0 }
 0x669   :  { %v3170_v3 = vadd.f32 %v3169_v2, %v2846_v61  ;;  %v3211_v4 = vadd.f32 %v3210_v14, %v2854_v62 }
 0x66a   :  { %v3171_v5 = vpop.f32.mrf.mxu1  ;;  %v3212_v52 = vpop.f32.mrf.mxu0  ;;  %4845 = vmatpush3.bf16.msra.mxu1 %v5131_v49 }
 0x66b   :  { %3635 = vst [vmem:[%s5872_s7 + $0x8] sm:$0x1] %v3170_v3  ;;  %3637 = vst [vmem:[%s5872_s7 + $0xa] sm:$0x1] %v3211_v4  ;;  %v3172_v55 = vadd.f32 %v3171_v5, %v2850_v63  ;;  %v3213_v58 = vadd.f32 %v3212_v52, %v2858_v0  ;;  %4846 = vmatprep.subr.bf16.mxu1 %v5298_v28  ;;  %v2894_v4 = vrot.slane %v1525_v53, %v5535_v16 }
 0x66c   :  { %v3173_v6 = vpop.f32.mrf.mxu1  ;;  %v3214_v7 = vpop.f32.mrf.mxu0  ;;  %v2902_v5 = vrot.slane %v1525_v53, %v5538_v17  ;;  %v2898_v52 = vrot.slane %v1525_v53, %v5541_v18 }
 0x66d   :  { %3636 = vst [vmem:[%s5872_s7 + $0x9] sm:$0x1] %v3172_v55  ;;  %3638 = vst [vmem:[%s5872_s7 + $0xb] sm:$0x1] %v3213_v58  ;;  %v2906_v55 = vrot.slane %v1525_v53, %v5544_v20 }
 0x66e   :  { %v3174_v8 = vpop.f32.mrf.mxu1  ;;  %v3215_v9 = vpop.f32.mrf.mxu0  ;;  %4847 = vmatpush3.bf16.msra.mxu1 %v5132_v41 }
 0x66f   :  { %4848 = vmatprep.subr.bf16.mxu1 %v5298_v28 }
 0x672   :  { %4849 = vmatpush3.bf16.msra.mxu1 %v5133_v47 }
 0x673   :  { %4850 = vmatprep.subr.bf16.mxu1 %v5298_v28 }
 0x676   :  { %4851 = vmatpush3.bf16.msra.mxu1 %v5134_v51 }
 0x677   :  { %4888 = vmatprep.subr.bf16.mxu1 %v5298_v28 }
 0x688   :  { %v3251_v25 = vpop.f32.mrf.mxu1  ;;  %v3292_v26 = vpop.f32.mrf.mxu0 }
 0x689   :  { %v3252_v27 = vadd.f32 %v3251_v25, %v2862_v12  ;;  %v3293_v29 = vadd.f32 %v3292_v26, %v2870_v21 }
 0x68a   :  { %v3253_v30 = vpop.f32.mrf.mxu1  ;;  %v3294_v31 = vpop.f32.mrf.mxu0 }
 0x68b   :  { %3639 = vst [vmem:[%s5872_s7 + $0xc] sm:$0x1] %v3252_v27  ;;  %3641 = vst [vmem:[%s5872_s7 + $0xe] sm:$0x1] %v3293_v29  ;;  %v3254_v33 = vadd.f32 %v3253_v30, %v2866_v22  ;;  %v3295_v34 = vadd.f32 %v3294_v31, %v2874_v23 }
 0x68c   :  { %v3255_v35 = vpop.f32.mrf.mxu1  ;;  %v3296_v37 = vpop.f32.mrf.mxu0 }
 0x68d   :  { %3640 = vst [vmem:[%s5872_s7 + $0xd] sm:$0x1] %v3254_v33  ;;  %3642 = vst [vmem:[%s5872_s7 + $0xf] sm:$0x1] %v3295_v34  ;;  %v1526_v34 = vld [vmem:[%s5866_s1 + $0x23] sm:$0xff] }
 0x68e   :  { %v3256_v32 = vpop.f32.mrf.mxu1  ;;  %v3297_v44 = vpop.f32.mrf.mxu0  ;;  %v2910_v37 = vrot.slane %v1526_v34, %v5375_v1  ;;  %v2918_v38 = vrot.slane %v1526_v34, %v5379_v13 }
 0x68f   :  { %v2914_v32 = vrot.slane %v1526_v34, %v5368_v46  ;;  %v2922_v44 = vrot.slane %v1526_v34, %v5385_v15 }
 0x694   :  { %v5654_v42 = vld [vmem:[%s5872_s7 + $0x8] sm:$0xff] }
 0x695   :  { %v3667_v43 = vsel %vm3665_vm3, %v5654_v42, -inf  ;;  %v3679_v45 = vsel %vm3665_vm3, -inf, %v5654_v42 }
 0x696   :  { %3672 = vmax.xlane.f32.xlu0 %v3667_v43  ;;  %3684 = vmax.xlane.f32.xlu1 %v3679_v45 }
 0x6a8   :  { %v3333_v57 = vpop.f32.mrf.mxu1  ;;  %v3374_v39 = vpop.f32.mrf.mxu0 }
 0x6a9   :  { %v3334_v48 = vadd.f32 %v3333_v57, %v2878_v19  ;;  %v3375_v59 = vadd.f32 %v3374_v39, %v2886_v54  ;;  %v2934_v57 = vrot.slane %v1526_v34, %v5538_v17  ;;  %v2930_v39 = vrot.slane %v1526_v34, %v5541_v18 }
 0x6aa   :  { %v3335_v60 = vpop.f32.mrf.mxu1  ;;  %v3376_v61 = vpop.f32.mrf.mxu0 }
 0x6ab   :  { %3643 = vst [vmem:[%s5872_s7 + $0x10] sm:$0x1] %v3334_v48  ;;  %3645 = vst [vmem:[%s5872_s7 + $0x12] sm:$0x1] %v3375_v59  ;;  %v3336_v62 = vadd.f32 %v3335_v60, %v2882_v24  ;;  %v3377_v63 = vadd.f32 %v3376_v61, %v2890_v56  ;;  %v2926_v56 = vrot.slane %v1526_v34, %v5535_v16 }
 0x6ac   :  { %v3337_v0 = vpop.f32.mrf.mxu1  ;;  %v3378_v2 = vpop.f32.mrf.mxu0  ;;  %v2938_v48 = vrot.slane %v1526_v34, %v5544_v20 }
 0x6ad   :  { %3644 = vst [vmem:[%s5872_s7 + $0x11] sm:$0x1] %v3336_v62  ;;  %3646 = vst [vmem:[%s5872_s7 + $0x13] sm:$0x1] %v3377_v63 }
 0x6ae   :  { %v3338_v14 = vpop.f32.mrf.mxu1  ;;  %v3379_v3 = vpop.f32.mrf.mxu0 }
 0x6c8   :  { %v3415_v58 = vpop.f32.mrf.mxu1  ;;  %v3456_v6 = vpop.f32.mrf.mxu0 }
 0x6c9   :  { %v3416_v7 = vadd.f32 %v3415_v58, %v2894_v4  ;;  %v3457_v8 = vadd.f32 %v3456_v6, %v2902_v5 }
 0x6ca   :  { %v3417_v9 = vpop.f32.mrf.mxu1  ;;  %v3458_v10 = vpop.f32.mrf.mxu0 }
 0x6cb   :  { %3647 = vst [vmem:[%s5872_s7 + $0x14] sm:$0x1] %v3416_v7  ;;  %3649 = vst [vmem:[%s5872_s7 + $0x16] sm:$0x1] %v3457_v8  ;;  %v3418_v11 = vadd.f32 %v3417_v9, %v2898_v52  ;;  %v3459_v12 = vadd.f32 %v3458_v10, %v2906_v55  ;;  %v3898_v55 = vld [vmem:[%s5866_s1 + $0x2b] sm:$0x1] }
 0x6cc   :  { %v3419_v21 = vpop.f32.mrf.mxu1  ;;  %v3460_v22 = vpop.f32.mrf.mxu0 }
 0x6cd   :  { %3648 = vst [vmem:[%s5872_s7 + $0x15] sm:$0x1] %v3418_v11  ;;  %3650 = vst [vmem:[%s5872_s7 + $0x17] sm:$0x1] %v3459_v12 }
 0x6ce   :  { %v3420_v23 = vpop.f32.mrf.mxu1  ;;  %v3461_v25 = vpop.f32.mrf.mxu0 }
 0x6d4   :  { %v5703_v26 = vld [vmem:[%s5872_s7 + $0x10] sm:$0xff] }
 0x6d5   :  { %v3668_v40 = vsel %vm3665_vm3, %v5703_v26, -inf  ;;  %v3680_v27 = vsel %vm3665_vm3, -inf, %v5703_v26 }
 0x6d6   :  { %3674 = vmax.xlane.f32.xlu0 %v3668_v40 }
 0x6da   :  { %3686 = vmax.xlane.f32.xlu0 %v3680_v27 }
 0x6df   :  { %v3683_v29 = vpop.xlane.xlu0 %3682  ;;  %v3671_v30 = vpop.xlane.xlu1 %3670 }
 0x6e0   :  { %v3690_v31 = vsel %vm3665_vm3, %v3671_v30, %v3683_v29 }
 0x6e1   :  { %v3694_v33 = vsub.f32 %v5594_v36, %v3690_v31 }
 0x6e3   :  { %v3698_v35 = vmul.f32 1.442695, %v3694_v33 }
 0x6e5   :  { %5163 = vpow2.f32 %v3698_v35  ;;  %v5135_v35 = vld [vmem:[#allocation7 + $0xb8] sm:$0xff]  }
 0x6e6   :  { %4857 = vmatpush3.bf16.msra.mxu0 %v5135_v35 }
 0x6e7   :  { %4858 = vmatprep.subr.bf16.mxu0 %v5298_v28 }
 0x6e8   :  { %v3497_v49 = vpop.f32.mrf.mxu1  ;;  %v3538_v41 = vpop.f32.mrf.mxu0 }
 0x6e9   :  { %v3498_v43 = vadd.f32 %v3497_v49, %v2910_v37  ;;  %v3539_v45 = vadd.f32 %v3538_v41, %v2918_v38  ;;  %v5136_v37 = vld [vmem:[#allocation7 + $0xb0] sm:$0xff]  }
 0x6ea   :  { %v3499_v47 = vpop.f32.mrf.mxu1  ;;  %v3540_v36 = vpop.f32.mrf.mxu0  ;;  %4859 = vmatpush3.bf16.msra.mxu0 %v5136_v37 }
 0x6eb   :  { %3651 = vst [vmem:[%s5872_s7 + $0x18] sm:$0x1] %v3498_v43  ;;  %3653 = vst [vmem:[%s5872_s7 + $0x1a] sm:$0x1] %v3539_v45  ;;  %v3500_v1 = vadd.f32 %v3499_v47, %v2914_v32  ;;  %v3541_v13 = vadd.f32 %v3540_v36, %v2922_v44  ;;  %4860 = vmatprep.subr.bf16.mxu0 %v5298_v28  ;;  %v5138_v32 = vld [vmem:[#allocation7 + $0xa0] sm:$0xff]  }
 0x6ec   :  { %v3501_v51 = vpop.f32.mrf.mxu1  ;;  %v3542_v46 = vpop.f32.mrf.mxu0 }
 0x6ed   :  { %3652 = vst [vmem:[%s5872_s7 + $0x19] sm:$0x1] %v3500_v1  ;;  %3654 = vst [vmem:[%s5872_s7 + $0x1b] sm:$0x1] %v3541_v13 }
 0x6ee   :  { %v3502_v15 = vpop.f32.mrf.mxu1  ;;  %v3543_v53 = vpop.f32.mrf.mxu0 }
 0x6f2   :  { %v5733_v19 = vpop.eup %5163 }
 0x6f3   :  { %v3706_v54 = vsel %vm3665_vm3, %v5733_v19, 0.0  ;;  %v3718_v24 = vsel %vm3665_vm3, 0.0, %v5733_v19 }
 0x6f4   :  { %3710 = vadd.xlane.f32.xlu0 %v3706_v54 }
 0x6f8   :  { %3722 = vadd.xlane.f32.xlu0 %v3718_v24 }
 0x708   :  { %v3579_v59 = vpop.f32.mrf.mxu1  ;;  %v3620_v60 = vpop.f32.mrf.mxu0 }
 0x709   :  { %v3580_v61 = vadd.f32 %v3579_v59, %v2926_v56  ;;  %v3621_v62 = vadd.f32 %v3620_v60, %v2934_v57 }
 0x70a   :  { %v3581_v63 = vpop.f32.mrf.mxu1  ;;  %v3622_v0 = vpop.f32.mrf.mxu0 }
 0x70b   :  { %3655 = vst [vmem:[%s5872_s7 + $0x1c] sm:$0x1] %v3580_v61  ;;  %3657 = vst [vmem:[%s5872_s7 + $0x1e] sm:$0x1] %v3621_v62  ;;  %v3582_v16 = vadd.f32 %v3581_v63, %v2930_v39  ;;  %v3623_v17 = vadd.f32 %v3622_v0, %v2938_v48  ;;  %v3918_v63 = vld [vmem:[%s5866_s1 + $0x2c] sm:$0x1] }
 0x70c   :  { %v3583_v2 = vpop.f32.mrf.mxu1  ;;  %v3624_v18 = vpop.f32.mrf.mxu0 }
 0x70d   :  { %3656 = vst [vmem:[%s5872_s7 + $0x1d] sm:$0x1] %v3582_v16  ;;  %3658 = vst [vmem:[%s5872_s7 + $0x1f] sm:$0x1] %v3623_v17  ;;  %v5139_v2 = vld [vmem:[#allocation7 + $0xf8] sm:$0xff]  }
 0x70e   :  { %v3584_v20 = vpop.f32.mrf.mxu1  ;;  %v3625_v14 = vpop.f32.mrf.mxu0 }
 0x714   :  { %v5760_v3 = vld [vmem:[%s5872_s7 + $0x18] sm:$0xff] }
 0x715   :  { %v3669_v4 = vsel %vm3665_vm3, %v5760_v3, -inf  ;;  %v3681_v6 = vsel %vm3665_vm3, -inf, %v5760_v3 }
 0x716   :  { %3676 = vmax.xlane.f32.xlu1 %v3669_v4  ;;  %v5141_v4 = vld [vmem:[#allocation7 + $0xe8] sm:$0xff]  }
 0x718   :  { %v3828_v5 = vpop.f32.mrf.mxu1  ;;  %v3892_v52 = vpop.f32.mrf.mxu0 }
 0x719   :  { %v3893_v58 = vadd.f32 %v3892_v52, %v3828_v5  ;;  %v5142_v5 = vld [vmem:[#allocation7 + $0xe0] sm:$0xff]   ;;  %v5143_v52 = vld [vmem:[#allocation7 + $0xd8] sm:$0xff]  }
 0x71a   :  { %v4822_v7 = vpop.f32.mrf.mxu1  ;;  %v4834_v8 = vpop.f32.mrf.mxu0  ;;  %3688 = vmax.xlane.f32.xlu1 %v3681_v6 }
 0x71b   :  { %v3899_v9 = vadd.f32 %v3898_v55, %v3893_v58  ;;  %v5144_v55 = vld [vmem:[#allocation7 + $0xd0] sm:$0xff]  }
 0x71c   :  { %v3831_v10 = vpop.f32.mrf.mxu1  ;;  %v3895_v11 = vpop.f32.mrf.mxu0 }
 0x71d   :  { %v3900_v12 = vmax.f32 %v3899_v9, 0.0  ;;  %v5145_v10 = vld [vmem:[#allocation7 + $0xc8] sm:$0xff]   ;;  %v5146_v11 = vld [vmem:[#allocation7 + $0xc0] sm:$0xff]  }
 0x71e   :  { %v4823_v21 = vpop.f32.mrf.mxu1  ;;  %v4835_v22 = vpop.f32.mrf.mxu0 }
 0x71f   :  { %v3917_v23 = vpack.c.bf16 %v3900_v12, %v3900_v12  ;;  %v3673_v25 = vpop.xlane.xlu0 %3672  ;;  %v3685_v40 = vpop.xlane.xlu1 %3684  ;;  %v5147_v12 = vld [vmem:[#allocation7 + $0x138] sm:$0xff]   ;;  %v5148_v21 = vld [vmem:[#allocation7 + $0x130] sm:$0xff]   ;;  %v5149_v22 = vld [vmem:[#allocation7 + $0x128] sm:$0xff]  }
 0x720   :  { %v3691_v27 = vsel %vm3665_vm3, %v3673_v25, %v3685_v40  ;;  %v5151_v25 = vld [vmem:[#allocation7 + $0x118] sm:$0xff]   ;;  %v5152_v40 = vld [vmem:[#allocation7 + $0x110] sm:$0xff]  }
 0x721   :  { %v3695_v29 = vsub.f32 %v5654_v42, %v3691_v27  ;;  %4853 = vmatmul.mubr.bf16.vlgmr.msra.gmra.mxu1 %v3917_v23  ;;  %v5137_v42 = vld [vmem:[#allocation7 + $0xa8] sm:$0xff]   ;;  %v5150_v23 = vld [vmem:[#allocation7 + $0x120] sm:$0xff]  }
 0x722   :  { %4904 = vmatprep.mubr.msk.bf16.mxu1 %vm5299_vm1, %v5298_v28  ;;  %4861 = vmatpush3.bf16.msra.mxu0 %v5137_v42 }
 0x723   :  { %v3700_v30 = vmul.f32 1.442695, %v3695_v29  ;;  %4862 = vmatprep.subr.bf16.mxu0 %v5298_v28  ;;  %4889 = vmatpush3.bf16.msra.mxu1 %v5147_v12 }
 0x724   :  { %4890 = vmatprep.subr.bf16.mxu1 %v5298_v28 }
 0x725   :  { %5165 = vpow2.f32 %v3700_v30 }
 0x726   :  { %4863 = vmatpush3.bf16.msra.mxu0 %v5138_v32 }
 0x727   :  { %4868 = vmatprep.subr.bf16.mxu0 %v5298_v28  ;;  %4891 = vmatpush3.bf16.msra.mxu1 %v5148_v21 }
 0x728   :  { %4892 = vmatprep.subr.bf16.mxu1 %v5298_v28 }
 0x72b   :  { %4893 = vmatpush3.bf16.msra.mxu1 %v5149_v22 }
 0x72c   :  { %4894 = vmatprep.subr.bf16.mxu1 %v5298_v28 }
 0x72f   :  { %4895 = vmatpush3.bf16.msra.mxu1 %v5150_v23 }
 0x730   :  { %4896 = vmatprep.subr.bf16.mxu1 %v5298_v28 }
 0x732   :  { %v5166_v31 = vpop.eup %5165 }
 0x733   :  { %v3707_v33 = vsel %vm3665_vm3, %v5166_v31, 0.0  ;;  %v3719_v34 = vsel %vm3665_vm3, 0.0, %v5166_v31  ;;  %4897 = vmatpush3.bf16.msra.mxu1 %v5151_v25 }
 0x734   :  { %3712 = vadd.xlane.f32.xlu1 %v3707_v33  ;;  %4898 = vmatprep.subr.bf16.mxu1 %v5298_v28 }
 0x737   :  { %4899 = vmatpush3.bf16.msra.mxu1 %v5152_v40 }
 0x738   :  { %3724 = vadd.xlane.f32.xlu1 %v3719_v34  ;;  %4900 = vmatprep.subr.bf16.mxu1 %v5298_v28  ;;  %v4017_v34 = vld [vmem:[%s5866_s1 + $0x2d] sm:$0x1] }
 0x75f   :  { %v3675_v38 = vpop.xlane.xlu0 %3674 }
 0x763   :  { %v3687_v44 = vpop.xlane.xlu0 %3686 }
 0x764   :  { %v3692_v49 = vsel %vm3665_vm3, %v3675_v38, %v3687_v44 }
 0x765   :  { %v3696_v41 = vsub.f32 %v5703_v26, %v3692_v49  ;;  %v5153_v49 = vld [vmem:[#allocation7 + $0x108] sm:$0xff]  }
 0x766   :  { %4901 = vmatpush3.bf16.msra.mxu1 %v5153_v49 }
 0x767   :  { %v3702_v43 = vmul.f32 1.442695, %v3696_v41  ;;  %4902 = vmatprep.subr.bf16.mxu1 %v5298_v28  ;;  %v5154_v41 = vld [vmem:[#allocation7 + $0x100] sm:$0xff]  }
 0x769   :  { %5167 = vpow2.f32 %v3702_v43  ;;  %v4103_v43 = vld [vmem:[%s5866_s1 + $0x2e] sm:$0x1] }
 0x76a   :  { %4903 = vmatpush3.bf16.msra.mxu1 %v5154_v41 }
 0x776   :  { %v5787_v45 = vpop.eup %5167 }
 0x777   :  { %v3708_v47 = vsel %vm3665_vm3, %v5787_v45, 0.0  ;;  %v3720_v36 = vsel %vm3665_vm3, 0.0, %v5787_v45 }
 0x778   :  { %3714 = vadd.xlane.f32.xlu0 %v3708_v47 }
 0x77c   :  { %3726 = vadd.xlane.f32.xlu0 %v3720_v36 }
 0x77d   :  { %v3711_v1 = vpop.xlane.xlu0 %3710 }
 0x781   :  { %v3723_v13 = vpop.xlane.xlu0 %3722 }
 0x782   :  { %v3730_v51 = vsel %vm3665_vm3, %v3711_v1, %v3723_v13 }
 0x783   :  { %5169 = vrcp.f32 %v3730_v51 }
 0x790   :  { %v5170_v26 = vpop.eup %5169 }
 0x791   :  { %v3738_v46 = vmul.f32 %v5170_v26, %v5733_v19 }
 0x793   :  { %3742 = vst [vmem:[%s5872_s7] sm:$0xff] %v3738_v46 }
 0x79f   :  { %v3677_v15 = vpop.xlane.xlu1 %3676 }
 0x7a3   :  { %v3689_v53 = vpop.xlane.xlu1 %3688 }
 0x7a4   :  { %v3693_v54 = vsel %vm3665_vm3, %v3677_v15, %v3689_v53 }
 0x7a5   :  { %v3697_v24 = vsub.f32 %v5760_v3, %v3693_v54  ;;  %v5140_v3 = vld [vmem:[#allocation7 + $0xf0] sm:$0xff]  }
 0x7a7   :  { %v3704_v56 = vmul.f32 1.442695, %v3697_v24 }
 0x7a9   :  { %5171 = vpow2.f32 %v3704_v56 }
 0x7b6   :  { %v5804_v57 = vpop.eup %5171 }
 0x7b7   :  { %v3709_v39 = vsel %vm3665_vm3, %v5804_v57, 0.0  ;;  %v3721_v19 = vsel %vm3665_vm3, 0.0, %v5804_v57 }
 0x7b8   :  { %3716 = vadd.xlane.f32.xlu1 %v3709_v39 }
 0x7bc   :  { %3728 = vadd.xlane.f32.xlu1 %v3721_v19 }
 0x7bd   :  { %v3713_v48 = vpop.xlane.xlu1 %3712 }
 0x7c1   :  { %v3725_v59 = vpop.xlane.xlu1 %3724 }
 0x7c2   :  { %v3731_v60 = vsel %vm3665_vm3, %v3713_v48, %v3725_v59 }
 0x7c3   :  { %5173 = vrcp.f32 %v3731_v60 }
 0x7d0   :  { %v5174_v61 = vpop.eup %5173 }
 0x7d1   :  { %v3739_v62 = vmul.f32 %v5174_v61, %v5166_v31 }
 0x7d3   :  { %3743 = vst [vmem:[%s5872_s7 + $0x8] sm:$0xff] %v3739_v62 }
 0x7e1   :  { %v4001_v0 = vpop.f32.mrf.mxu1 }
 0x7e2   :  { %v4002_v16 = vadd.f32 %v4001_v0, %v3918_v63 }
 0x7e3   :  { %v4854_v17 = vpop.f32.mrf.mxu1 }
 0x7e4   :  { %v4016_v18 = vpack.c.bf16 %v4002_v16, %v4002_v16  ;;  %4007 = vst.msk [vmem:[#allocation10] sm:$0x1] %vm1075_vm0, %v4002_v16 }
 0x7e5   :  { %v4004_v20 = vpop.f32.mrf.mxu1 }
 0x7e6   :  { %4865 = vmatmul.mubr.msk.bf16.vlgmr.msra.gmra.mxu0 %vm1221_vm2, %v4016_v18 }
 0x7e7   :  { %v4855_v14 = vpop.f32.mrf.mxu1  ;;  %4869 = vmatpush3.bf16.msra.mxu0 %v5139_v2  ;;  %4884 = vmatprep.mubr.msk.bf16.mxu0 %vm5299_vm1, %v5298_v28 }
 0x7e8   :  { %4870 = vmatprep.subr.bf16.mxu0 %v5298_v28 }
 0x7eb   :  { %4871 = vmatpush3.bf16.msra.mxu0 %v5140_v3 }
 0x7ec   :  { %4872 = vmatprep.subr.bf16.mxu0 %v5298_v28 }
 0x7ef   :  { %4873 = vmatpush3.bf16.msra.mxu0 %v5141_v4 }
 0x7f0   :  { %4874 = vmatprep.subr.bf16.mxu0 %v5298_v28 }
 0x7f3   :  { %4875 = vmatpush3.bf16.msra.mxu0 %v5142_v5 }
 0x7f4   :  { %4876 = vmatprep.subr.bf16.mxu0 %v5298_v28 }
 0x7f7   :  { %4877 = vmatpush3.bf16.msra.mxu0 %v5143_v52 }
 0x7f8   :  { %4878 = vmatprep.subr.bf16.mxu0 %v5298_v28 }
 0x7fb   :  { %4879 = vmatpush3.bf16.msra.mxu0 %v5144_v55 }
 0x7fc   :  { %4880 = vmatprep.subr.bf16.mxu0 %v5298_v28 }
 0x7ff   :  { %4881 = vmatpush3.bf16.msra.mxu0 %v5145_v10 }
 0x800   :  { %4882 = vmatprep.subr.bf16.mxu0 %v5298_v28 }
 0x801   :  { %v3715_v58 = vpop.xlane.xlu0 %3714 }
 0x803   :  { %4883 = vmatpush3.bf16.msra.mxu0 %v5146_v11 }
 0x805   :  { %v3727_v6 = vpop.xlane.xlu0 %3726 }
 0x806   :  { %v3732_v7 = vsel %vm3665_vm3, %v3715_v58, %v3727_v6 }
 0x807   :  { %5175 = vrcp.f32 %v3732_v7 }
 0x814   :  { %v5176_v8 = vpop.eup %5175 }
 0x815   :  { %v3740_v9 = vmul.f32 %v5176_v8, %v5787_v45 }
 0x817   :  { %3744 = vst [vmem:[%s5872_s7 + $0x10] sm:$0xff] %v3740_v9 }
 0x841   :  { %v3717_v27 = vpop.xlane.xlu1 %3716 }
 0x845   :  { %v3729_v29 = vpop.xlane.xlu1 %3728 }
 0x846   :  { %v3733_v30 = vsel %vm3665_vm3, %v3717_v27, %v3729_v29 }
 0x847   :  { %5177 = vrcp.f32 %v3733_v30 }
 0x854   :  { %v5178_v31 = vpop.eup %5177 }
 0x855   :  { %v3741_v33 = vmul.f32 %v5178_v31, %v5804_v57 }
 0x857   :  { %3745 = vst [vmem:[%s5872_s7 + $0x18] sm:$0xff] %v3741_v33 }
 0x8a6   :  { %v4079_v35 = vpop.f32.mrf.mxu0 }
 0x8a7   :  { %v4080_v37 = vadd.f32 %v4079_v35, %v4017_v34 }
 0x8a8   :  { %v4866_v42 = vpop.f32.mrf.mxu0 }
 0x8a9   :  { %v4085_v38 = vmax.f32 %v4080_v37, 0.0 }
 0x8aa   :  { %v4082_v32 = vpop.f32.mrf.mxu0 }
 0x8ab   :  { %v4102_v44 = vpack.c.bf16 %v4085_v38, %v4085_v38 }
 0x8ac   :  { %v4867_v50 = vpop.f32.mrf.mxu0 }
 0x8ad   :  { %4885 = vmatmul.mubr.bf16.vlgmr.msra.gmra.mxu0 %v4102_v44 }
 0x96d   :  { %v4186_v45 = vpop.f32.mrf.mxu0 }
 0x96e   :  { %v4187_v47 = vadd.f32 %v4186_v45, %v4103_v43 }
 0x96f   :  { %v4886_v36 = vpop.f32.mrf.mxu0 }
 0x970   :  { %v4192_v1 = vmax.f32 %v4187_v47, 0.0 }
 0x971   :  { %v4189_v13 = vpop.f32.mrf.mxu0 }
 0x972   :  { %v4209_v51 = vpack.c.bf16 %v4192_v1, %v4192_v1 }
 0x973   :  { %v4887_v26 = vpop.f32.mrf.mxu0 }
 0x974   :  { %4905 = vmatmul.mubr.bf16.vlgmr.msra.gmra.mxu1 %v4209_v51 }
 0x975   :  { %5270 = shalt.err (!%p5267_p10)
}
 0x976   :  { %4309 = dma.vmem_to_hbm [thread:$0]  %s4307_s0, 16, %s5871_s6, [#allocation4]   ;;  %v4210_v28 = vld [vmem:[%s5866_s1 + $0x2f] sm:$0x1] }
 0xa34   :  { %v4293_v46 = vpop.f32.mrf.mxu1 }
 0xa35   :  { %v4294_v15 = vadd.f32 %v4293_v46, %v4210_v28 }
 0xa36   :  { %v4906_v53 = vpop.f32.mrf.mxu1 }
 0xa37   :  { %4299 = vst [vmem:[%s5873_s8] sm:$0x1] %v4294_v15 }
 0xa38   :  { %v4296_v54 = vpop.f32.mrf.mxu1 }
 0xa3a   :  { %v4907_v24 = vpop.f32.mrf.mxu1 }
 0xa3b   :  { %5285 = dma.done.wait [#allocation4], 16  }
 0xa3c   :  { %5286 = vsyncadd [#allocation4], 4294967280 }
 0xa3d   :  { %4321 = vsyncpa [#allocation3], 1 }
 0xa3e   :  { %4322 = vsyncpa [#allocation6], 1 }
 0xa3f   :  { %4323 = vsyncpa [#allocation9], 1 }
 0xa40   :  { %4324 = vsyncpa [#allocation4], 1 }

</bundles_post_ra>
